<compile_context>
chip_gen: v7x
topology: tpu7x:2x2x1
jax: 0.10.0
libtpu: 0.0.40
codegen_flags: <defaults>
</compile_context>

<pallas_src>
import functools

import numpy as np
import jax
import jax.numpy as jnp
from jax.experimental import pallas as pl
from jax.experimental.pallas import tpu as pltpu

LN_EPS = 1e-5
NEG_INF = -1e30


# ---------------------------------------------------------------------------
# Single fused kernel: pre blocks -> fusion max-pool -> post blocks -> head.
# ---------------------------------------------------------------------------
def _fused_kernel(z_ref, ipwT_ref, ipb_ref, mats_ref, bvec_ref,
                  cln_ref, cwT_ref, cb_ref, o_ref,
                  *, n_heads, embed_dim, n_batch, seq_len,
                  n_pre, n_post, kernel_size, stride):
    E = embed_dim
    H = n_heads
    Dh = E // H
    B = n_batch
    S = seq_len
    scale = 1.0 / np.sqrt(Dh)

    def layer_norm(v, w=None, b=None):
        mu = jnp.mean(v, axis=-1, keepdims=True)
        var = jnp.mean((v - mu) ** 2, axis=-1, keepdims=True)
        out = (v - mu) * jax.lax.rsqrt(var + LN_EPS)
        if w is not None:
            out = out * w + b
        return out

    def batch_block_bias(seg):
        # Additive attention bias over the batch-fused slab: 0 within a batch
        # element, -1e30 across elements (so one score matmul serves all B).
        n = B * seg
        r = jax.lax.broadcasted_iota(jnp.int32, (n, n), 0)
        c = jax.lax.broadcasted_iota(jnp.int32, (n, n), 1)
        same = None
        for b in range(B):
            blk = ((r >= b * seg) & (r < (b + 1) * seg)
                   & (c >= b * seg) & (c < (b + 1) * seg))
            same = blk if same is None else (same | blk)
        return jnp.where(same, 0.0, NEG_INF).astype(jnp.float32)

    def block(x, bias, l):
        """One transformer block on the batch-fused [B*seg, E] fp32 slab."""
        # --- attention branch: non-affine pre-LN + MHA (dropout = id) ---
        xn = layer_norm(x)
        qkv = jnp.dot(xn, ipwT_ref[l],
                      preferred_element_type=jnp.float32) + ipb_ref[l]  # [N,3E]
        heads = []
        for h in range(H):
            lo = h * Dh
            qh = qkv[:, lo:lo + Dh] * scale                 # [N, Dh]
            kh = qkv[:, E + lo:E + lo + Dh]
            vh = qkv[:, 2 * E + lo:2 * E + lo + Dh]
            s = jax.lax.dot_general(                        # qh @ kh.T  [N, N]
                qh, kh, (((1,), (1,)), ((), ())),
                preferred_element_type=jnp.float32) + bias
            m = jnp.max(s, axis=-1, keepdims=True)
            e = jnp.exp(s - m)
            inv = pl.reciprocal(jnp.sum(e, axis=-1, keepdims=True),
                                approx=False)
            heads.append(jnp.dot(e * inv, vh,
                                 preferred_element_type=jnp.float32))
        o_cat = jnp.concatenate(heads, axis=-1)             # [N, E]
        z1 = x + jnp.dot(o_cat, mats_ref[l, 0],
                         preferred_element_type=jnp.float32) + bvec_ref[l, 0]

        # --- MLP branch: LayerNorm(affine) -> Linear -> ReLU -> Linear ---
        xn2 = layer_norm(z1, bvec_ref[l, 1], bvec_ref[l, 2])
        hid = jnp.maximum(jnp.dot(xn2, mats_ref[l, 1],
                                  preferred_element_type=jnp.float32)
                          + bvec_ref[l, 3], 0.0)
        return z1 + jnp.dot(hid, mats_ref[l, 2],
                            preferred_element_type=jnp.float32) + bvec_ref[l, 4]

    # Activations live as one [B*S, E] fp32 value for the whole network.
    x = z_ref[...].astype(jnp.float32)

    # ---- pre-fusion blocks ----
    bias_pre = batch_block_bias(S)
    for l in range(n_pre):
        x = block(x, bias_pre, l)

    # ---- fusion pooling: keep cls rows, MaxPool1d over the sequence axis ----
    out_len = (S - 1 - kernel_size) // stride + 1
    s_post = 1 + out_len
    rows = []
    for b in range(B):
        base = b * S
        rows.append(x[base:base + 1])                       # cls token row
        for j in range(out_len):
            lo = base + 1 + j * stride
            rows.append(jnp.max(x[lo:lo + kernel_size], axis=0, keepdims=True))
    x = jnp.concatenate(rows, axis=0)                       # [B*s_post, E]

    # ---- post-fusion blocks ----
    bias_post = batch_block_bias(s_post)
    for l in range(n_post):
        x = block(x, bias_post, n_pre + l)

    # ---- classifier head on the cls tokens (one matmul, one store) ----
    cls = jnp.concatenate([x[b * s_post:b * s_post + 1] for b in range(B)],
                          axis=0)                           # [B, E]
    xn = layer_norm(cls, cln_ref[0], cln_ref[1])
    o_ref[...] = (jnp.dot(xn, cwT_ref[...],
                          preferred_element_type=jnp.float32)
                  + cb_ref[...]).astype(o_ref.dtype)


def unimodal_transformer_forward(z, pre_params, post_params, cls_params,
                                 n_heads, kernel_size, stride):
    """z: [S, B, E] sequence-first (PyTorch convention) -> logits [B, n_classes]."""
    S, B, E = z.shape
    zb = jnp.transpose(z, (1, 0, 2)).reshape(B * S, E)      # batch-fused slab

    # Stack per-layer weights along a leading layer axis and pre-transpose so
    # every in-kernel matmul is a plain [M,K]@[K,N].  Weights with identical
    # trailing shapes are packed along extra leading axes (free to index).
    layers = list(pre_params) + list(post_params)
    ipwT = jnp.stack([p['ipw'].T for p in layers], axis=0)          # [L, E, 3E]
    ipb = jnp.stack([p['ipb'] for p in layers], axis=0)             # [L, 1, 3E]
    mats = jnp.stack([jnp.stack([p['ow'].T, p['w1'].T, p['w2'].T], axis=0)
                      for p in layers], axis=0)                     # [L, 3, E, E]
    bvec = jnp.stack([jnp.stack([p['ob'], p['lnw'], p['lnb'],
                                 p['b1'], p['b2']], axis=0)
                      for p in layers], axis=0)                     # [L, 5, 1, E]
    cln = jnp.stack([cls_params['lnw'], cls_params['lnb']], axis=0)  # [2, 1, E]
    cwT = cls_params['w'].T                                          # [E, C]
    cb = cls_params['b']                                             # [1, C]
    C = cwT.shape[1]

    kernel = functools.partial(
        _fused_kernel, n_heads=n_heads, embed_dim=E, n_batch=B, seq_len=S,
        n_pre=len(pre_params), n_post=len(post_params),
        kernel_size=kernel_size, stride=stride)

    vmem = lambda: pl.BlockSpec(memory_space=pltpu.MemorySpace.VMEM)
    return pl.pallas_call(
        kernel,
        out_shape=jax.ShapeDtypeStruct((B, C), z.dtype),
        in_specs=[vmem() for _ in range(8)],
        out_specs=vmem(),
    )(zb, ipwT, ipb, mats, bvec, cln, cwT, cb)


# ---------------------------------------------------------------------------
# Deterministic parameter initialization (shapes from the PyTorch __init__).
# ---------------------------------------------------------------------------
def init_block_params(key, E):
    ks = jax.random.split(key, 8)
    s = 0.1
    return dict(
        ipw=jax.random.normal(ks[0], (3 * E, E), jnp.float32) * s,   # in_proj_weight
        ipb=jax.random.normal(ks[1], (1, 3 * E), jnp.float32) * s,   # in_proj_bias
        ow=jax.random.normal(ks[2], (E, E), jnp.float32) * s,        # out_proj.weight
        ob=jax.random.normal(ks[3], (1, E), jnp.float32) * s,        # out_proj.bias
        lnw=jnp.ones((1, E), jnp.float32),                           # mlp LayerNorm
        lnb=jnp.zeros((1, E), jnp.float32),
        w1=jax.random.normal(ks[4], (E, E), jnp.float32) * s,
        b1=jax.random.normal(ks[5], (1, E), jnp.float32) * s,
        w2=jax.random.normal(ks[6], (E, E), jnp.float32) * s,
        b2=jax.random.normal(ks[7], (1, E), jnp.float32) * s,
    )


def init_classifier_params(key, E, n_classes):
    k0, k1 = jax.random.split(key)
    return dict(
        lnw=jnp.ones((1, E), jnp.float32),
        lnb=jnp.zeros((1, E), jnp.float32),
        w=jax.random.normal(k0, (n_classes, E), jnp.float32) * 0.1,
        b=jax.random.normal(k1, (1, n_classes), jnp.float32) * 0.1,
    )


# ---------------------------------------------------------------------------
# Pure-JAX reference (mirrors the PyTorch math) for a correctness check.
# ---------------------------------------------------------------------------
def _ref_ln(v, w=None, b=None):
    mu = v.mean(-1, keepdims=True)
    var = ((v - mu) ** 2).mean(-1, keepdims=True)
    out = (v - mu) / jnp.sqrt(var + LN_EPS)
    if w is not None:
        out = out * w + b
    return out


def _ref_block(z, p, H):
    B, S, E = z.shape
    Dh = E // H
    xn = _ref_ln(z)
    Wq, Wk, Wv = p['ipw'][:E], p['ipw'][E:2 * E], p['ipw'][2 * E:]
    bq, bk, bv = p['ipb'][0, :E], p['ipb'][0, E:2 * E], p['ipb'][0, 2 * E:]
    q = xn @ Wq.T + bq
    k = xn @ Wk.T + bk
    v = xn @ Wv.T + bv
    qh = q.reshape(B, S, H, Dh).transpose(0, 2, 1, 3)
    kh = k.reshape(B, S, H, Dh).transpose(0, 2, 1, 3)
    vh = v.reshape(B, S, H, Dh).transpose(0, 2, 1, 3)
    sc = jnp.einsum('bhqd,bhkd->bhqk', qh, kh) / np.sqrt(Dh)
    a = jax.nn.softmax(sc, -1)
    o = jnp.einsum('bhqk,bhkd->bhqd', a, vh).transpose(0, 2, 1, 3).reshape(B, S, E)
    z1 = z + (o @ p['ow'].T + p['ob'][0])
    xn2 = _ref_ln(z1, p['lnw'][0], p['lnb'][0])
    h = jax.nn.relu(xn2 @ p['w1'].T + p['b1'][0])
    return z1 + (h @ p['w2'].T + p['b2'][0])


def _ref_forward(z, pre, post, cls_p, H, ksz, stride):
    z = jnp.transpose(z, (1, 0, 2))
    for p in pre:
        z = _ref_block(z, p, H)
    z_cls = z[:, 0:1, :]
    body = z[:, 1:, :]
    L = body.shape[1]
    out_len = (L - ksz) // stride + 1
    pooled = jnp.stack(
        [jnp.max(body[:, j * stride:j * stride + ksz, :], axis=1)
         for j in range(out_len)], axis=1)
    z = jnp.concatenate([z_cls, pooled], axis=1)
    for p in post:
        z = _ref_block(z, p, H)
    x0 = _ref_ln(z[:, 0, :], cls_p['lnw'][0], cls_p['lnb'][0])
    return x0 @ cls_p['w'].T + cls_p['b'][0]


if __name__ == "__main__":
    # config (modality='rgb', inference mode => dropout is identity)
    E, H = 32, 4
    n_pre, n_post = 2, 2
    n_classes = 5
    kernel_sz, stride_sz = 2, 2
    S = 9          # n_rgb_tokens + 1 cls token
    B = 2

    key = jax.random.PRNGKey(0)
    kin, kp = jax.random.split(key)
    z_rgb = jax.random.normal(kin, (S, B, E), jnp.float32)  # seq-first, like PyTorch

    keys = jax.random.split(kp, n_pre + n_post + 1)
    pre_params = [init_block_params(keys[i], E) for i in range(n_pre)]
    post_params = [init_block_params(keys[n_pre + i], E) for i in range(n_post)]
    cls_params = init_classifier_params(keys[-1], E, n_classes)

    # TODO(synk): dropout layers are treated as inference-mode identity (no RNG).
    fwd = jax.jit(lambda zz, pre, post, clsp: unimodal_transformer_forward(
        zz, pre, post, clsp, H, kernel_sz, stride_sz))
    logits = fwd(z_rgb, pre_params, post_params, cls_params)
    logits = jax.block_until_ready(logits)

    ref = _ref_forward(z_rgb, pre_params, post_params, cls_params,
                       H, kernel_sz, stride_sz)
    np.testing.assert_allclose(np.asarray(logits), np.asarray(ref),
                               rtol=2e-2, atol=2e-2)
    assert logits.shape == (B, n_classes)
    print("KERNEL_OK")
</pallas_src>

<mosaic_0001>
module attributes {stable_mosaic.version = 11 : i64} {
  func.func @_fused_kernel(%arg0: memref<18x32xf32, #tpu.memory_space<vmem>>, %arg1: memref<4x32x96xf32, #tpu.memory_space<vmem>>, %arg2: memref<4x1x96xf32, #tpu.memory_space<vmem>>, %arg3: memref<4x3x32x32xf32, #tpu.memory_space<vmem>>, %arg4: memref<4x5x1x32xf32, #tpu.memory_space<vmem>>, %arg5: memref<2x1x32xf32, #tpu.memory_space<vmem>>, %arg6: memref<32x5xf32, #tpu.memory_space<vmem>>, %arg7: memref<1x5xf32, #tpu.memory_space<vmem>>, %arg8: memref<2x5xf32, #tpu.memory_space<vmem>>) attributes {dimension_semantics = [], scalar_prefetch = 0 : i64, scratch_operands = 0 : i64, tpu.core_type = #tpu.core_type<tc>} {
    %c0 = arith.constant 0 : index
    %c0_0 = arith.constant 0 : index
    %0 = vector.load %arg0[%c0, %c0_0] : memref<18x32xf32, #tpu.memory_space<vmem>>, vector<18x32xf32>
    %1 = tpu.iota {dimensions = array<i32: 0>} : vector<18x18xi32>
    %2 = tpu.iota {dimensions = array<i32: 1>} : vector<18x18xi32>
    %c0_i32 = arith.constant 0 : i32
    %3 = vector.broadcast %c0_i32 : i32 to vector<18x18xi32>
    %4 = arith.cmpi sge, %1, %3 : vector<18x18xi32>
    %c9_i32 = arith.constant 9 : i32
    %5 = vector.broadcast %c9_i32 : i32 to vector<18x18xi32>
    %6 = arith.cmpi slt, %1, %5 : vector<18x18xi32>
    %7 = arith.andi %4, %6 : vector<18x18xi1>
    %c0_i32_1 = arith.constant 0 : i32
    %8 = vector.broadcast %c0_i32_1 : i32 to vector<18x18xi32>
    %9 = arith.cmpi sge, %2, %8 : vector<18x18xi32>
    %10 = arith.andi %7, %9 : vector<18x18xi1>
    %c9_i32_2 = arith.constant 9 : i32
    %11 = vector.broadcast %c9_i32_2 : i32 to vector<18x18xi32>
    %12 = arith.cmpi slt, %2, %11 : vector<18x18xi32>
    %13 = arith.andi %10, %12 : vector<18x18xi1>
    %c9_i32_3 = arith.constant 9 : i32
    %14 = vector.broadcast %c9_i32_3 : i32 to vector<18x18xi32>
    %15 = arith.cmpi sge, %1, %14 : vector<18x18xi32>
    %c18_i32 = arith.constant 18 : i32
    %16 = vector.broadcast %c18_i32 : i32 to vector<18x18xi32>
    %17 = arith.cmpi slt, %1, %16 : vector<18x18xi32>
    %18 = arith.andi %15, %17 : vector<18x18xi1>
    %c9_i32_4 = arith.constant 9 : i32
    %19 = vector.broadcast %c9_i32_4 : i32 to vector<18x18xi32>
    %20 = arith.cmpi sge, %2, %19 : vector<18x18xi32>
    %21 = arith.andi %18, %20 : vector<18x18xi1>
    %c18_i32_5 = arith.constant 18 : i32
    %22 = vector.broadcast %c18_i32_5 : i32 to vector<18x18xi32>
    %23 = arith.cmpi slt, %2, %22 : vector<18x18xi32>
    %24 = arith.andi %21, %23 : vector<18x18xi1>
    %25 = arith.ori %13, %24 : vector<18x18xi1>
    %cst = arith.constant 0.000000e+00 : f32
    %cst_6 = arith.constant -1.000000e+30 : f32
    %26 = vector.broadcast %cst : f32 to vector<18x18xf32>
    %27 = vector.broadcast %cst_6 : f32 to vector<18x18xf32>
    %28 = arith.select %25, %26, %27 : vector<18x18xi1>, vector<18x18xf32>
    %cst_7 = arith.constant dense<0.000000e+00> : vector<18xf32>
    %29 = vector.multi_reduction <add>, %0, %cst_7 [1] : vector<18x32xf32> to vector<18xf32>
    %30 = vector.shape_cast %29 : vector<18xf32> to vector<18x1xf32>
    %cst_8 = arith.constant 3.200000e+01 : f32
    %31 = vector.broadcast %cst_8 : f32 to vector<18x1xf32>
    %32 = arith.divf %30, %31 : vector<18x1xf32>
    %33 = vector.broadcast %32 : vector<18x1xf32> to vector<18x32xf32>
    %34 = arith.subf %0, %33 : vector<18x32xf32>
    %35 = arith.mulf %34, %34 : vector<18x32xf32>
    %cst_9 = arith.constant dense<0.000000e+00> : vector<18xf32>
    %36 = vector.multi_reduction <add>, %35, %cst_9 [1] : vector<18x32xf32> to vector<18xf32>
    %37 = vector.shape_cast %36 : vector<18xf32> to vector<18x1xf32>
    %cst_10 = arith.constant 3.200000e+01 : f32
    %38 = vector.broadcast %cst_10 : f32 to vector<18x1xf32>
    %39 = arith.divf %37, %38 : vector<18x1xf32>
    %40 = vector.broadcast %32 : vector<18x1xf32> to vector<18x32xf32>
    %41 = arith.subf %0, %40 : vector<18x32xf32>
    %cst_11 = arith.constant 9.99999974E-6 : f32
    %42 = vector.broadcast %cst_11 : f32 to vector<18x1xf32>
    %43 = arith.addf %39, %42 : vector<18x1xf32>
    %44 = math.rsqrt %43 : vector<18x1xf32>
    %45 = vector.broadcast %44 : vector<18x1xf32> to vector<18x32xf32>
    %46 = arith.mulf %41, %45 : vector<18x32xf32>
    %c0_12 = arith.constant 0 : index
    %c0_13 = arith.constant 0 : index
    %c0_14 = arith.constant 0 : index
    %47 = vector.load %arg1[%c0_12, %c0_13, %c0_14] : memref<4x32x96xf32, #tpu.memory_space<vmem>>, vector<1x32x96xf32>
    %48 = vector.shape_cast %47 : vector<1x32x96xf32> to vector<32x96xf32>
    %cst_15 = arith.constant dense<0.000000e+00> : vector<18x96xf32>
    %49 = tpu.matmul %46, %48, %cst_15 {dimension_numbers = #tpu.dot_dimension_numbers<[1], [0], [0], [1], [0, 0, 1, 1], [], []>} : vector<18x32xf32>, vector<32x96xf32>, vector<18x96xf32> -> vector<18x96xf32>
    %c0_16 = arith.constant 0 : index
    %c0_17 = arith.constant 0 : index
    %c0_18 = arith.constant 0 : index
    %50 = vector.load %arg2[%c0_16, %c0_17, %c0_18] : memref<4x1x96xf32, #tpu.memory_space<vmem>>, vector<1x1x96xf32>
    %51 = vector.shape_cast %50 : vector<1x1x96xf32> to vector<1x96xf32>
    %52 = vector.broadcast %51 : vector<1x96xf32> to vector<18x96xf32>
    %53 = arith.addf %49, %52 : vector<18x96xf32>
    %54 = vector.extract_strided_slice %53 {offsets = [0, 0], sizes = [18, 8], strides = [1, 1]} : vector<18x96xf32> to vector<18x8xf32>
    %cst_19 = arith.constant 0.353553385 : f32
    %55 = vector.broadcast %cst_19 : f32 to vector<18x8xf32>
    %56 = arith.mulf %54, %55 : vector<18x8xf32>
    %57 = vector.extract_strided_slice %53 {offsets = [0, 32], sizes = [18, 8], strides = [1, 1]} : vector<18x96xf32> to vector<18x8xf32>
    %58 = vector.extract_strided_slice %53 {offsets = [0, 64], sizes = [18, 8], strides = [1, 1]} : vector<18x96xf32> to vector<18x8xf32>
    %cst_20 = arith.constant dense<0.000000e+00> : vector<18x18xf32>
    %59 = tpu.matmul %56, %57, %cst_20 {dimension_numbers = #tpu.dot_dimension_numbers<[1], [1], [0], [0], [0, 0, 1, 0], [], []>} : vector<18x8xf32>, vector<18x8xf32>, vector<18x18xf32> -> vector<18x18xf32>
    %60 = arith.addf %59, %28 : vector<18x18xf32>
    %cst_21 = arith.constant dense<0xFF800000> : vector<18xf32>
    %61 = vector.multi_reduction <maximumf>, %60, %cst_21 [1] : vector<18x18xf32> to vector<18xf32>
    %62 = vector.shape_cast %61 : vector<18xf32> to vector<18x1xf32>
    %63 = vector.broadcast %62 : vector<18x1xf32> to vector<18x18xf32>
    %64 = arith.subf %60, %63 : vector<18x18xf32>
    %65 = math.exp %64 : vector<18x18xf32>
    %cst_22 = arith.constant dense<0.000000e+00> : vector<18xf32>
    %66 = vector.multi_reduction <add>, %65, %cst_22 [1] : vector<18x18xf32> to vector<18xf32>
    %67 = vector.shape_cast %66 : vector<18xf32> to vector<18x1xf32>
    %68 = tpu.reciprocal %67 : vector<18x1xf32> -> vector<18x1xf32>
    %69 = vector.broadcast %68 : vector<18x1xf32> to vector<18x18xf32>
    %70 = arith.mulf %65, %69 : vector<18x18xf32>
    %cst_23 = arith.constant dense<0.000000e+00> : vector<18x8xf32>
    %71 = tpu.matmul %70, %58, %cst_23 {dimension_numbers = #tpu.dot_dimension_numbers<[1], [0], [0], [1], [0, 0, 1, 1], [], []>} : vector<18x18xf32>, vector<18x8xf32>, vector<18x8xf32> -> vector<18x8xf32>
    %72 = vector.extract_strided_slice %53 {offsets = [0, 8], sizes = [18, 8], strides = [1, 1]} : vector<18x96xf32> to vector<18x8xf32>
    %cst_24 = arith.constant 0.353553385 : f32
    %73 = vector.broadcast %cst_24 : f32 to vector<18x8xf32>
    %74 = arith.mulf %72, %73 : vector<18x8xf32>
    %75 = vector.extract_strided_slice %53 {offsets = [0, 40], sizes = [18, 8], strides = [1, 1]} : vector<18x96xf32> to vector<18x8xf32>
    %76 = vector.extract_strided_slice %53 {offsets = [0, 72], sizes = [18, 8], strides = [1, 1]} : vector<18x96xf32> to vector<18x8xf32>
    %cst_25 = arith.constant dense<0.000000e+00> : vector<18x18xf32>
    %77 = tpu.matmul %74, %75, %cst_25 {dimension_numbers = #tpu.dot_dimension_numbers<[1], [1], [0], [0], [0, 0, 1, 0], [], []>} : vector<18x8xf32>, vector<18x8xf32>, vector<18x18xf32> -> vector<18x18xf32>
    %78 = arith.addf %77, %28 : vector<18x18xf32>
    %cst_26 = arith.constant dense<0xFF800000> : vector<18xf32>
    %79 = vector.multi_reduction <maximumf>, %78, %cst_26 [1] : vector<18x18xf32> to vector<18xf32>
    %80 = vector.shape_cast %79 : vector<18xf32> to vector<18x1xf32>
    %81 = vector.broadcast %80 : vector<18x1xf32> to vector<18x18xf32>
    %82 = arith.subf %78, %81 : vector<18x18xf32>
    %83 = math.exp %82 : vector<18x18xf32>
    %cst_27 = arith.constant dense<0.000000e+00> : vector<18xf32>
    %84 = vector.multi_reduction <add>, %83, %cst_27 [1] : vector<18x18xf32> to vector<18xf32>
    %85 = vector.shape_cast %84 : vector<18xf32> to vector<18x1xf32>
    %86 = tpu.reciprocal %85 : vector<18x1xf32> -> vector<18x1xf32>
    %87 = vector.broadcast %86 : vector<18x1xf32> to vector<18x18xf32>
    %88 = arith.mulf %83, %87 : vector<18x18xf32>
    %cst_28 = arith.constant dense<0.000000e+00> : vector<18x8xf32>
    %89 = tpu.matmul %88, %76, %cst_28 {dimension_numbers = #tpu.dot_dimension_numbers<[1], [0], [0], [1], [0, 0, 1, 1], [], []>} : vector<18x18xf32>, vector<18x8xf32>, vector<18x8xf32> -> vector<18x8xf32>
    %90 = vector.extract_strided_slice %53 {offsets = [0, 16], sizes = [18, 8], strides = [1, 1]} : vector<18x96xf32> to vector<18x8xf32>
    %cst_29 = arith.constant 0.353553385 : f32
    %91 = vector.broadcast %cst_29 : f32 to vector<18x8xf32>
    %92 = arith.mulf %90, %91 : vector<18x8xf32>
    %93 = vector.extract_strided_slice %53 {offsets = [0, 48], sizes = [18, 8], strides = [1, 1]} : vector<18x96xf32> to vector<18x8xf32>
    %94 = vector.extract_strided_slice %53 {offsets = [0, 80], sizes = [18, 8], strides = [1, 1]} : vector<18x96xf32> to vector<18x8xf32>
    %cst_30 = arith.constant dense<0.000000e+00> : vector<18x18xf32>
    %95 = tpu.matmul %92, %93, %cst_30 {dimension_numbers = #tpu.dot_dimension_numbers<[1], [1], [0], [0], [0, 0, 1, 0], [], []>} : vector<18x8xf32>, vector<18x8xf32>, vector<18x18xf32> -> vector<18x18xf32>
    %96 = arith.addf %95, %28 : vector<18x18xf32>
    %cst_31 = arith.constant dense<0xFF800000> : vector<18xf32>
    %97 = vector.multi_reduction <maximumf>, %96, %cst_31 [1] : vector<18x18xf32> to vector<18xf32>
    %98 = vector.shape_cast %97 : vector<18xf32> to vector<18x1xf32>
    %99 = vector.broadcast %98 : vector<18x1xf32> to vector<18x18xf32>
    %100 = arith.subf %96, %99 : vector<18x18xf32>
    %101 = math.exp %100 : vector<18x18xf32>
    %cst_32 = arith.constant dense<0.000000e+00> : vector<18xf32>
    %102 = vector.multi_reduction <add>, %101, %cst_32 [1] : vector<18x18xf32> to vector<18xf32>
    %103 = vector.shape_cast %102 : vector<18xf32> to vector<18x1xf32>
    %104 = tpu.reciprocal %103 : vector<18x1xf32> -> vector<18x1xf32>
    %105 = vector.broadcast %104 : vector<18x1xf32> to vector<18x18xf32>
    %106 = arith.mulf %101, %105 : vector<18x18xf32>
    %cst_33 = arith.constant dense<0.000000e+00> : vector<18x8xf32>
    %107 = tpu.matmul %106, %94, %cst_33 {dimension_numbers = #tpu.dot_dimension_numbers<[1], [0], [0], [1], [0, 0, 1, 1], [], []>} : vector<18x18xf32>, vector<18x8xf32>, vector<18x8xf32> -> vector<18x8xf32>
    %108 = vector.extract_strided_slice %53 {offsets = [0, 24], sizes = [18, 8], strides = [1, 1]} : vector<18x96xf32> to vector<18x8xf32>
    %cst_34 = arith.constant 0.353553385 : f32
    %109 = vector.broadcast %cst_34 : f32 to vector<18x8xf32>
    %110 = arith.mulf %108, %109 : vector<18x8xf32>
    %111 = vector.extract_strided_slice %53 {offsets = [0, 56], sizes = [18, 8], strides = [1, 1]} : vector<18x96xf32> to vector<18x8xf32>
    %112 = vector.extract_strided_slice %53 {offsets = [0, 88], sizes = [18, 8], strides = [1, 1]} : vector<18x96xf32> to vector<18x8xf32>
    %cst_35 = arith.constant dense<0.000000e+00> : vector<18x18xf32>
    %113 = tpu.matmul %110, %111, %cst_35 {dimension_numbers = #tpu.dot_dimension_numbers<[1], [1], [0], [0], [0, 0, 1, 0], [], []>} : vector<18x8xf32>, vector<18x8xf32>, vector<18x18xf32> -> vector<18x18xf32>
    %114 = arith.addf %113, %28 : vector<18x18xf32>
    %cst_36 = arith.constant dense<0xFF800000> : vector<18xf32>
    %115 = vector.multi_reduction <maximumf>, %114, %cst_36 [1] : vector<18x18xf32> to vector<18xf32>
    %116 = vector.shape_cast %115 : vector<18xf32> to vector<18x1xf32>
    %117 = vector.broadcast %116 : vector<18x1xf32> to vector<18x18xf32>
    %118 = arith.subf %114, %117 : vector<18x18xf32>
    %119 = math.exp %118 : vector<18x18xf32>
    %cst_37 = arith.constant dense<0.000000e+00> : vector<18xf32>
    %120 = vector.multi_reduction <add>, %119, %cst_37 [1] : vector<18x18xf32> to vector<18xf32>
    %121 = vector.shape_cast %120 : vector<18xf32> to vector<18x1xf32>
    %122 = tpu.reciprocal %121 : vector<18x1xf32> -> vector<18x1xf32>
    %123 = vector.broadcast %122 : vector<18x1xf32> to vector<18x18xf32>
    %124 = arith.mulf %119, %123 : vector<18x18xf32>
    %cst_38 = arith.constant dense<0.000000e+00> : vector<18x8xf32>
    %125 = tpu.matmul %124, %112, %cst_38 {dimension_numbers = #tpu.dot_dimension_numbers<[1], [0], [0], [1], [0, 0, 1, 1], [], []>} : vector<18x18xf32>, vector<18x8xf32>, vector<18x8xf32> -> vector<18x8xf32>
    %126 = tpu.concatenate %71, %89, %107, %125 in 1 : vector<18x8xf32>, vector<18x8xf32>, vector<18x8xf32>, vector<18x8xf32> -> vector<18x32xf32>
    %c0_39 = arith.constant 0 : index
    %c0_40 = arith.constant 0 : index
    %c0_41 = arith.constant 0 : index
    %c0_42 = arith.constant 0 : index
    %127 = vector.load %arg3[%c0_39, %c0_40, %c0_41, %c0_42] : memref<4x3x32x32xf32, #tpu.memory_space<vmem>>, vector<1x1x32x32xf32>
    %128 = vector.shape_cast %127 : vector<1x1x32x32xf32> to vector<32x32xf32>
    %cst_43 = arith.constant dense<0.000000e+00> : vector<18x32xf32>
    %129 = tpu.matmul %126, %128, %cst_43 {dimension_numbers = #tpu.dot_dimension_numbers<[1], [0], [0], [1], [0, 0, 1, 1], [], []>} : vector<18x32xf32>, vector<32x32xf32>, vector<18x32xf32> -> vector<18x32xf32>
    %130 = arith.addf %0, %129 : vector<18x32xf32>
    %c0_44 = arith.constant 0 : index
    %c0_45 = arith.constant 0 : index
    %c0_46 = arith.constant 0 : index
    %c0_47 = arith.constant 0 : index
    %131 = vector.load %arg4[%c0_44, %c0_45, %c0_46, %c0_47] : memref<4x5x1x32xf32, #tpu.memory_space<vmem>>, vector<1x1x1x32xf32>
    %132 = vector.shape_cast %131 : vector<1x1x1x32xf32> to vector<1x32xf32>
    %133 = vector.broadcast %132 : vector<1x32xf32> to vector<18x32xf32>
    %134 = arith.addf %130, %133 : vector<18x32xf32>
    %c0_48 = arith.constant 0 : index
    %c1 = arith.constant 1 : index
    %c0_49 = arith.constant 0 : index
    %c0_50 = arith.constant 0 : index
    %135 = vector.load %arg4[%c0_48, %c1, %c0_49, %c0_50] : memref<4x5x1x32xf32, #tpu.memory_space<vmem>>, vector<1x1x1x32xf32>
    %136 = vector.shape_cast %135 : vector<1x1x1x32xf32> to vector<1x32xf32>
    %c0_51 = arith.constant 0 : index
    %c2 = arith.constant 2 : index
    %c0_52 = arith.constant 0 : index
    %c0_53 = arith.constant 0 : index
    %137 = vector.load %arg4[%c0_51, %c2, %c0_52, %c0_53] : memref<4x5x1x32xf32, #tpu.memory_space<vmem>>, vector<1x1x1x32xf32>
    %138 = vector.shape_cast %137 : vector<1x1x1x32xf32> to vector<1x32xf32>
    %cst_54 = arith.constant dense<0.000000e+00> : vector<18xf32>
    %139 = vector.multi_reduction <add>, %134, %cst_54 [1] : vector<18x32xf32> to vector<18xf32>
    %140 = vector.shape_cast %139 : vector<18xf32> to vector<18x1xf32>
    %cst_55 = arith.constant 3.200000e+01 : f32
    %141 = vector.broadcast %cst_55 : f32 to vector<18x1xf32>
    %142 = arith.divf %140, %141 : vector<18x1xf32>
    %143 = vector.broadcast %142 : vector<18x1xf32> to vector<18x32xf32>
    %144 = arith.subf %134, %143 : vector<18x32xf32>
    %145 = arith.mulf %144, %144 : vector<18x32xf32>
    %cst_56 = arith.constant dense<0.000000e+00> : vector<18xf32>
    %146 = vector.multi_reduction <add>, %145, %cst_56 [1] : vector<18x32xf32> to vector<18xf32>
    %147 = vector.shape_cast %146 : vector<18xf32> to vector<18x1xf32>
    %cst_57 = arith.constant 3.200000e+01 : f32
    %148 = vector.broadcast %cst_57 : f32 to vector<18x1xf32>
    %149 = arith.divf %147, %148 : vector<18x1xf32>
    %150 = vector.broadcast %142 : vector<18x1xf32> to vector<18x32xf32>
    %151 = arith.subf %134, %150 : vector<18x32xf32>
    %cst_58 = arith.constant 9.99999974E-6 : f32
    %152 = vector.broadcast %cst_58 : f32 to vector<18x1xf32>
    %153 = arith.addf %149, %152 : vector<18x1xf32>
    %154 = math.rsqrt %153 : vector<18x1xf32>
    %155 = vector.broadcast %154 : vector<18x1xf32> to vector<18x32xf32>
    %156 = arith.mulf %151, %155 : vector<18x32xf32>
    %157 = vector.broadcast %136 : vector<1x32xf32> to vector<18x32xf32>
    %158 = arith.mulf %156, %157 : vector<18x32xf32>
    %159 = vector.broadcast %138 : vector<1x32xf32> to vector<18x32xf32>
    %160 = arith.addf %158, %159 : vector<18x32xf32>
    %c0_59 = arith.constant 0 : index
    %c1_60 = arith.constant 1 : index
    %c0_61 = arith.constant 0 : index
    %c0_62 = arith.constant 0 : index
    %161 = vector.load %arg3[%c0_59, %c1_60, %c0_61, %c0_62] : memref<4x3x32x32xf32, #tpu.memory_space<vmem>>, vector<1x1x32x32xf32>
    %162 = vector.shape_cast %161 : vector<1x1x32x32xf32> to vector<32x32xf32>
    %cst_63 = arith.constant dense<0.000000e+00> : vector<18x32xf32>
    %163 = tpu.matmul %160, %162, %cst_63 {dimension_numbers = #tpu.dot_dimension_numbers<[1], [0], [0], [1], [0, 0, 1, 1], [], []>} : vector<18x32xf32>, vector<32x32xf32>, vector<18x32xf32> -> vector<18x32xf32>
    %c0_64 = arith.constant 0 : index
    %c3 = arith.constant 3 : index
    %c0_65 = arith.constant 0 : index
    %c0_66 = arith.constant 0 : index
    %164 = vector.load %arg4[%c0_64, %c3, %c0_65, %c0_66] : memref<4x5x1x32xf32, #tpu.memory_space<vmem>>, vector<1x1x1x32xf32>
    %165 = vector.shape_cast %164 : vector<1x1x1x32xf32> to vector<1x32xf32>
    %166 = vector.broadcast %165 : vector<1x32xf32> to vector<18x32xf32>
    %167 = arith.addf %163, %166 : vector<18x32xf32>
    %cst_67 = arith.constant 0.000000e+00 : f32
    %168 = vector.broadcast %cst_67 : f32 to vector<18x32xf32>
    %169 = arith.maximumf %167, %168 : vector<18x32xf32>
    %c0_68 = arith.constant 0 : index
    %c2_69 = arith.constant 2 : index
    %c0_70 = arith.constant 0 : index
    %c0_71 = arith.constant 0 : index
    %170 = vector.load %arg3[%c0_68, %c2_69, %c0_70, %c0_71] : memref<4x3x32x32xf32, #tpu.memory_space<vmem>>, vector<1x1x32x32xf32>
    %171 = vector.shape_cast %170 : vector<1x1x32x32xf32> to vector<32x32xf32>
    %cst_72 = arith.constant dense<0.000000e+00> : vector<18x32xf32>
    %172 = tpu.matmul %169, %171, %cst_72 {dimension_numbers = #tpu.dot_dimension_numbers<[1], [0], [0], [1], [0, 0, 1, 1], [], []>} : vector<18x32xf32>, vector<32x32xf32>, vector<18x32xf32> -> vector<18x32xf32>
    %173 = arith.addf %134, %172 : vector<18x32xf32>
    %c0_73 = arith.constant 0 : index
    %c4 = arith.constant 4 : index
    %c0_74 = arith.constant 0 : index
    %c0_75 = arith.constant 0 : index
    %174 = vector.load %arg4[%c0_73, %c4, %c0_74, %c0_75] : memref<4x5x1x32xf32, #tpu.memory_space<vmem>>, vector<1x1x1x32xf32>
    %175 = vector.shape_cast %174 : vector<1x1x1x32xf32> to vector<1x32xf32>
    %176 = vector.broadcast %175 : vector<1x32xf32> to vector<18x32xf32>
    %177 = arith.addf %173, %176 : vector<18x32xf32>
    %cst_76 = arith.constant dense<0.000000e+00> : vector<18xf32>
    %178 = vector.multi_reduction <add>, %177, %cst_76 [1] : vector<18x32xf32> to vector<18xf32>
    %179 = vector.shape_cast %178 : vector<18xf32> to vector<18x1xf32>
    %cst_77 = arith.constant 3.200000e+01 : f32
    %180 = vector.broadcast %cst_77 : f32 to vector<18x1xf32>
    %181 = arith.divf %179, %180 : vector<18x1xf32>
    %182 = vector.broadcast %181 : vector<18x1xf32> to vector<18x32xf32>
    %183 = arith.subf %177, %182 : vector<18x32xf32>
    %184 = arith.mulf %183, %183 : vector<18x32xf32>
    %cst_78 = arith.constant dense<0.000000e+00> : vector<18xf32>
    %185 = vector.multi_reduction <add>, %184, %cst_78 [1] : vector<18x32xf32> to vector<18xf32>
    %186 = vector.shape_cast %185 : vector<18xf32> to vector<18x1xf32>
    %cst_79 = arith.constant 3.200000e+01 : f32
    %187 = vector.broadcast %cst_79 : f32 to vector<18x1xf32>
    %188 = arith.divf %186, %187 : vector<18x1xf32>
    %189 = vector.broadcast %181 : vector<18x1xf32> to vector<18x32xf32>
    %190 = arith.subf %177, %189 : vector<18x32xf32>
    %cst_80 = arith.constant 9.99999974E-6 : f32
    %191 = vector.broadcast %cst_80 : f32 to vector<18x1xf32>
    %192 = arith.addf %188, %191 : vector<18x1xf32>
    %193 = math.rsqrt %192 : vector<18x1xf32>
    %194 = vector.broadcast %193 : vector<18x1xf32> to vector<18x32xf32>
    %195 = arith.mulf %190, %194 : vector<18x32xf32>
    %c1_81 = arith.constant 1 : index
    %c0_82 = arith.constant 0 : index
    %c0_83 = arith.constant 0 : index
    %196 = vector.load %arg1[%c1_81, %c0_82, %c0_83] : memref<4x32x96xf32, #tpu.memory_space<vmem>>, vector<1x32x96xf32>
    %197 = vector.shape_cast %196 : vector<1x32x96xf32> to vector<32x96xf32>
    %cst_84 = arith.constant dense<0.000000e+00> : vector<18x96xf32>
    %198 = tpu.matmul %195, %197, %cst_84 {dimension_numbers = #tpu.dot_dimension_numbers<[1], [0], [0], [1], [0, 0, 1, 1], [], []>} : vector<18x32xf32>, vector<32x96xf32>, vector<18x96xf32> -> vector<18x96xf32>
    %c1_85 = arith.constant 1 : index
    %c0_86 = arith.constant 0 : index
    %c0_87 = arith.constant 0 : index
    %199 = vector.load %arg2[%c1_85, %c0_86, %c0_87] : memref<4x1x96xf32, #tpu.memory_space<vmem>>, vector<1x1x96xf32>
    %200 = vector.shape_cast %199 : vector<1x1x96xf32> to vector<1x96xf32>
    %201 = vector.broadcast %200 : vector<1x96xf32> to vector<18x96xf32>
    %202 = arith.addf %198, %201 : vector<18x96xf32>
    %203 = vector.extract_strided_slice %202 {offsets = [0, 0], sizes = [18, 8], strides = [1, 1]} : vector<18x96xf32> to vector<18x8xf32>
    %cst_88 = arith.constant 0.353553385 : f32
    %204 = vector.broadcast %cst_88 : f32 to vector<18x8xf32>
    %205 = arith.mulf %203, %204 : vector<18x8xf32>
    %206 = vector.extract_strided_slice %202 {offsets = [0, 32], sizes = [18, 8], strides = [1, 1]} : vector<18x96xf32> to vector<18x8xf32>
    %207 = vector.extract_strided_slice %202 {offsets = [0, 64], sizes = [18, 8], strides = [1, 1]} : vector<18x96xf32> to vector<18x8xf32>
    %cst_89 = arith.constant dense<0.000000e+00> : vector<18x18xf32>
    %208 = tpu.matmul %205, %206, %cst_89 {dimension_numbers = #tpu.dot_dimension_numbers<[1], [1], [0], [0], [0, 0, 1, 0], [], []>} : vector<18x8xf32>, vector<18x8xf32>, vector<18x18xf32> -> vector<18x18xf32>
    %209 = arith.addf %208, %28 : vector<18x18xf32>
    %cst_90 = arith.constant dense<0xFF800000> : vector<18xf32>
    %210 = vector.multi_reduction <maximumf>, %209, %cst_90 [1] : vector<18x18xf32> to vector<18xf32>
    %211 = vector.shape_cast %210 : vector<18xf32> to vector<18x1xf32>
    %212 = vector.broadcast %211 : vector<18x1xf32> to vector<18x18xf32>
    %213 = arith.subf %209, %212 : vector<18x18xf32>
    %214 = math.exp %213 : vector<18x18xf32>
    %cst_91 = arith.constant dense<0.000000e+00> : vector<18xf32>
    %215 = vector.multi_reduction <add>, %214, %cst_91 [1] : vector<18x18xf32> to vector<18xf32>
    %216 = vector.shape_cast %215 : vector<18xf32> to vector<18x1xf32>
    %217 = tpu.reciprocal %216 : vector<18x1xf32> -> vector<18x1xf32>
    %218 = vector.broadcast %217 : vector<18x1xf32> to vector<18x18xf32>
    %219 = arith.mulf %214, %218 : vector<18x18xf32>
    %cst_92 = arith.constant dense<0.000000e+00> : vector<18x8xf32>
    %220 = tpu.matmul %219, %207, %cst_92 {dimension_numbers = #tpu.dot_dimension_numbers<[1], [0], [0], [1], [0, 0, 1, 1], [], []>} : vector<18x18xf32>, vector<18x8xf32>, vector<18x8xf32> -> vector<18x8xf32>
    %221 = vector.extract_strided_slice %202 {offsets = [0, 8], sizes = [18, 8], strides = [1, 1]} : vector<18x96xf32> to vector<18x8xf32>
    %cst_93 = arith.constant 0.353553385 : f32
    %222 = vector.broadcast %cst_93 : f32 to vector<18x8xf32>
    %223 = arith.mulf %221, %222 : vector<18x8xf32>
    %224 = vector.extract_strided_slice %202 {offsets = [0, 40], sizes = [18, 8], strides = [1, 1]} : vector<18x96xf32> to vector<18x8xf32>
    %225 = vector.extract_strided_slice %202 {offsets = [0, 72], sizes = [18, 8], strides = [1, 1]} : vector<18x96xf32> to vector<18x8xf32>
    %cst_94 = arith.constant dense<0.000000e+00> : vector<18x18xf32>
    %226 = tpu.matmul %223, %224, %cst_94 {dimension_numbers = #tpu.dot_dimension_numbers<[1], [1], [0], [0], [0, 0, 1, 0], [], []>} : vector<18x8xf32>, vector<18x8xf32>, vector<18x18xf32> -> vector<18x18xf32>
    %227 = arith.addf %226, %28 : vector<18x18xf32>
    %cst_95 = arith.constant dense<0xFF800000> : vector<18xf32>
    %228 = vector.multi_reduction <maximumf>, %227, %cst_95 [1] : vector<18x18xf32> to vector<18xf32>
    %229 = vector.shape_cast %228 : vector<18xf32> to vector<18x1xf32>
    %230 = vector.broadcast %229 : vector<18x1xf32> to vector<18x18xf32>
    %231 = arith.subf %227, %230 : vector<18x18xf32>
    %232 = math.exp %231 : vector<18x18xf32>
    %cst_96 = arith.constant dense<0.000000e+00> : vector<18xf32>
    %233 = vector.multi_reduction <add>, %232, %cst_96 [1] : vector<18x18xf32> to vector<18xf32>
    %234 = vector.shape_cast %233 : vector<18xf32> to vector<18x1xf32>
    %235 = tpu.reciprocal %234 : vector<18x1xf32> -> vector<18x1xf32>
    %236 = vector.broadcast %235 : vector<18x1xf32> to vector<18x18xf32>
    %237 = arith.mulf %232, %236 : vector<18x18xf32>
    %cst_97 = arith.constant dense<0.000000e+00> : vector<18x8xf32>
    %238 = tpu.matmul %237, %225, %cst_97 {dimension_numbers = #tpu.dot_dimension_numbers<[1], [0], [0], [1], [0, 0, 1, 1], [], []>} : vector<18x18xf32>, vector<18x8xf32>, vector<18x8xf32> -> vector<18x8xf32>
    %239 = vector.extract_strided_slice %202 {offsets = [0, 16], sizes = [18, 8], strides = [1, 1]} : vector<18x96xf32> to vector<18x8xf32>
    %cst_98 = arith.constant 0.353553385 : f32
    %240 = vector.broadcast %cst_98 : f32 to vector<18x8xf32>
    %241 = arith.mulf %239, %240 : vector<18x8xf32>
    %242 = vector.extract_strided_slice %202 {offsets = [0, 48], sizes = [18, 8], strides = [1, 1]} : vector<18x96xf32> to vector<18x8xf32>
    %243 = vector.extract_strided_slice %202 {offsets = [0, 80], sizes = [18, 8], strides = [1, 1]} : vector<18x96xf32> to vector<18x8xf32>
    %cst_99 = arith.constant dense<0.000000e+00> : vector<18x18xf32>
    %244 = tpu.matmul %241, %242, %cst_99 {dimension_numbers = #tpu.dot_dimension_numbers<[1], [1], [0], [0], [0, 0, 1, 0], [], []>} : vector<18x8xf32>, vector<18x8xf32>, vector<18x18xf32> -> vector<18x18xf32>
    %245 = arith.addf %244, %28 : vector<18x18xf32>
    %cst_100 = arith.constant dense<0xFF800000> : vector<18xf32>
    %246 = vector.multi_reduction <maximumf>, %245, %cst_100 [1] : vector<18x18xf32> to vector<18xf32>
    %247 = vector.shape_cast %246 : vector<18xf32> to vector<18x1xf32>
    %248 = vector.broadcast %247 : vector<18x1xf32> to vector<18x18xf32>
    %249 = arith.subf %245, %248 : vector<18x18xf32>
    %250 = math.exp %249 : vector<18x18xf32>
    %cst_101 = arith.constant dense<0.000000e+00> : vector<18xf32>
    %251 = vector.multi_reduction <add>, %250, %cst_101 [1] : vector<18x18xf32> to vector<18xf32>
    %252 = vector.shape_cast %251 : vector<18xf32> to vector<18x1xf32>
    %253 = tpu.reciprocal %252 : vector<18x1xf32> -> vector<18x1xf32>
    %254 = vector.broadcast %253 : vector<18x1xf32> to vector<18x18xf32>
    %255 = arith.mulf %250, %254 : vector<18x18xf32>
    %cst_102 = arith.constant dense<0.000000e+00> : vector<18x8xf32>
    %256 = tpu.matmul %255, %243, %cst_102 {dimension_numbers = #tpu.dot_dimension_numbers<[1], [0], [0], [1], [0, 0, 1, 1], [], []>} : vector<18x18xf32>, vector<18x8xf32>, vector<18x8xf32> -> vector<18x8xf32>
    %257 = vector.extract_strided_slice %202 {offsets = [0, 24], sizes = [18, 8], strides = [1, 1]} : vector<18x96xf32> to vector<18x8xf32>
    %cst_103 = arith.constant 0.353553385 : f32
    %258 = vector.broadcast %cst_103 : f32 to vector<18x8xf32>
    %259 = arith.mulf %257, %258 : vector<18x8xf32>
    %260 = vector.extract_strided_slice %202 {offsets = [0, 56], sizes = [18, 8], strides = [1, 1]} : vector<18x96xf32> to vector<18x8xf32>
    %261 = vector.extract_strided_slice %202 {offsets = [0, 88], sizes = [18, 8], strides = [1, 1]} : vector<18x96xf32> to vector<18x8xf32>
    %cst_104 = arith.constant dense<0.000000e+00> : vector<18x18xf32>
    %262 = tpu.matmul %259, %260, %cst_104 {dimension_numbers = #tpu.dot_dimension_numbers<[1], [1], [0], [0], [0, 0, 1, 0], [], []>} : vector<18x8xf32>, vector<18x8xf32>, vector<18x18xf32> -> vector<18x18xf32>
    %263 = arith.addf %262, %28 : vector<18x18xf32>
    %cst_105 = arith.constant dense<0xFF800000> : vector<18xf32>
    %264 = vector.multi_reduction <maximumf>, %263, %cst_105 [1] : vector<18x18xf32> to vector<18xf32>
    %265 = vector.shape_cast %264 : vector<18xf32> to vector<18x1xf32>
    %266 = vector.broadcast %265 : vector<18x1xf32> to vector<18x18xf32>
    %267 = arith.subf %263, %266 : vector<18x18xf32>
    %268 = math.exp %267 : vector<18x18xf32>
    %cst_106 = arith.constant dense<0.000000e+00> : vector<18xf32>
    %269 = vector.multi_reduction <add>, %268, %cst_106 [1] : vector<18x18xf32> to vector<18xf32>
    %270 = vector.shape_cast %269 : vector<18xf32> to vector<18x1xf32>
    %271 = tpu.reciprocal %270 : vector<18x1xf32> -> vector<18x1xf32>
    %272 = vector.broadcast %271 : vector<18x1xf32> to vector<18x18xf32>
    %273 = arith.mulf %268, %272 : vector<18x18xf32>
    %cst_107 = arith.constant dense<0.000000e+00> : vector<18x8xf32>
    %274 = tpu.matmul %273, %261, %cst_107 {dimension_numbers = #tpu.dot_dimension_numbers<[1], [0], [0], [1], [0, 0, 1, 1], [], []>} : vector<18x18xf32>, vector<18x8xf32>, vector<18x8xf32> -> vector<18x8xf32>
    %275 = tpu.concatenate %220, %238, %256, %274 in 1 : vector<18x8xf32>, vector<18x8xf32>, vector<18x8xf32>, vector<18x8xf32> -> vector<18x32xf32>
    %c1_108 = arith.constant 1 : index
    %c0_109 = arith.constant 0 : index
    %c0_110 = arith.constant 0 : index
    %c0_111 = arith.constant 0 : index
    %276 = vector.load %arg3[%c1_108, %c0_109, %c0_110, %c0_111] : memref<4x3x32x32xf32, #tpu.memory_space<vmem>>, vector<1x1x32x32xf32>
    %277 = vector.shape_cast %276 : vector<1x1x32x32xf32> to vector<32x32xf32>
    %cst_112 = arith.constant dense<0.000000e+00> : vector<18x32xf32>
    %278 = tpu.matmul %275, %277, %cst_112 {dimension_numbers = #tpu.dot_dimension_numbers<[1], [0], [0], [1], [0, 0, 1, 1], [], []>} : vector<18x32xf32>, vector<32x32xf32>, vector<18x32xf32> -> vector<18x32xf32>
    %279 = arith.addf %177, %278 : vector<18x32xf32>
    %c1_113 = arith.constant 1 : index
    %c0_114 = arith.constant 0 : index
    %c0_115 = arith.constant 0 : index
    %c0_116 = arith.constant 0 : index
    %280 = vector.load %arg4[%c1_113, %c0_114, %c0_115, %c0_116] : memref<4x5x1x32xf32, #tpu.memory_space<vmem>>, vector<1x1x1x32xf32>
    %281 = vector.shape_cast %280 : vector<1x1x1x32xf32> to vector<1x32xf32>
    %282 = vector.broadcast %281 : vector<1x32xf32> to vector<18x32xf32>
    %283 = arith.addf %279, %282 : vector<18x32xf32>
    %c1_117 = arith.constant 1 : index
    %c1_118 = arith.constant 1 : index
    %c0_119 = arith.constant 0 : index
    %c0_120 = arith.constant 0 : index
    %284 = vector.load %arg4[%c1_117, %c1_118, %c0_119, %c0_120] : memref<4x5x1x32xf32, #tpu.memory_space<vmem>>, vector<1x1x1x32xf32>
    %285 = vector.shape_cast %284 : vector<1x1x1x32xf32> to vector<1x32xf32>
    %c1_121 = arith.constant 1 : index
    %c2_122 = arith.constant 2 : index
    %c0_123 = arith.constant 0 : index
    %c0_124 = arith.constant 0 : index
    %286 = vector.load %arg4[%c1_121, %c2_122, %c0_123, %c0_124] : memref<4x5x1x32xf32, #tpu.memory_space<vmem>>, vector<1x1x1x32xf32>
    %287 = vector.shape_cast %286 : vector<1x1x1x32xf32> to vector<1x32xf32>
    %cst_125 = arith.constant dense<0.000000e+00> : vector<18xf32>
    %288 = vector.multi_reduction <add>, %283, %cst_125 [1] : vector<18x32xf32> to vector<18xf32>
    %289 = vector.shape_cast %288 : vector<18xf32> to vector<18x1xf32>
    %cst_126 = arith.constant 3.200000e+01 : f32
    %290 = vector.broadcast %cst_126 : f32 to vector<18x1xf32>
    %291 = arith.divf %289, %290 : vector<18x1xf32>
    %292 = vector.broadcast %291 : vector<18x1xf32> to vector<18x32xf32>
    %293 = arith.subf %283, %292 : vector<18x32xf32>
    %294 = arith.mulf %293, %293 : vector<18x32xf32>
    %cst_127 = arith.constant dense<0.000000e+00> : vector<18xf32>
    %295 = vector.multi_reduction <add>, %294, %cst_127 [1] : vector<18x32xf32> to vector<18xf32>
    %296 = vector.shape_cast %295 : vector<18xf32> to vector<18x1xf32>
    %cst_128 = arith.constant 3.200000e+01 : f32
    %297 = vector.broadcast %cst_128 : f32 to vector<18x1xf32>
    %298 = arith.divf %296, %297 : vector<18x1xf32>
    %299 = vector.broadcast %291 : vector<18x1xf32> to vector<18x32xf32>
    %300 = arith.subf %283, %299 : vector<18x32xf32>
    %cst_129 = arith.constant 9.99999974E-6 : f32
    %301 = vector.broadcast %cst_129 : f32 to vector<18x1xf32>
    %302 = arith.addf %298, %301 : vector<18x1xf32>
    %303 = math.rsqrt %302 : vector<18x1xf32>
    %304 = vector.broadcast %303 : vector<18x1xf32> to vector<18x32xf32>
    %305 = arith.mulf %300, %304 : vector<18x32xf32>
    %306 = vector.broadcast %285 : vector<1x32xf32> to vector<18x32xf32>
    %307 = arith.mulf %305, %306 : vector<18x32xf32>
    %308 = vector.broadcast %287 : vector<1x32xf32> to vector<18x32xf32>
    %309 = arith.addf %307, %308 : vector<18x32xf32>
    %c1_130 = arith.constant 1 : index
    %c1_131 = arith.constant 1 : index
    %c0_132 = arith.constant 0 : index
    %c0_133 = arith.constant 0 : index
    %310 = vector.load %arg3[%c1_130, %c1_131, %c0_132, %c0_133] : memref<4x3x32x32xf32, #tpu.memory_space<vmem>>, vector<1x1x32x32xf32>
    %311 = vector.shape_cast %310 : vector<1x1x32x32xf32> to vector<32x32xf32>
    %cst_134 = arith.constant dense<0.000000e+00> : vector<18x32xf32>
    %312 = tpu.matmul %309, %311, %cst_134 {dimension_numbers = #tpu.dot_dimension_numbers<[1], [0], [0], [1], [0, 0, 1, 1], [], []>} : vector<18x32xf32>, vector<32x32xf32>, vector<18x32xf32> -> vector<18x32xf32>
    %c1_135 = arith.constant 1 : index
    %c3_136 = arith.constant 3 : index
    %c0_137 = arith.constant 0 : index
    %c0_138 = arith.constant 0 : index
    %313 = vector.load %arg4[%c1_135, %c3_136, %c0_137, %c0_138] : memref<4x5x1x32xf32, #tpu.memory_space<vmem>>, vector<1x1x1x32xf32>
    %314 = vector.shape_cast %313 : vector<1x1x1x32xf32> to vector<1x32xf32>
    %315 = vector.broadcast %314 : vector<1x32xf32> to vector<18x32xf32>
    %316 = arith.addf %312, %315 : vector<18x32xf32>
    %cst_139 = arith.constant 0.000000e+00 : f32
    %317 = vector.broadcast %cst_139 : f32 to vector<18x32xf32>
    %318 = arith.maximumf %316, %317 : vector<18x32xf32>
    %c1_140 = arith.constant 1 : index
    %c2_141 = arith.constant 2 : index
    %c0_142 = arith.constant 0 : index
    %c0_143 = arith.constant 0 : index
    %319 = vector.load %arg3[%c1_140, %c2_141, %c0_142, %c0_143] : memref<4x3x32x32xf32, #tpu.memory_space<vmem>>, vector<1x1x32x32xf32>
    %320 = vector.shape_cast %319 : vector<1x1x32x32xf32> to vector<32x32xf32>
    %cst_144 = arith.constant dense<0.000000e+00> : vector<18x32xf32>
    %321 = tpu.matmul %318, %320, %cst_144 {dimension_numbers = #tpu.dot_dimension_numbers<[1], [0], [0], [1], [0, 0, 1, 1], [], []>} : vector<18x32xf32>, vector<32x32xf32>, vector<18x32xf32> -> vector<18x32xf32>
    %322 = arith.addf %283, %321 : vector<18x32xf32>
    %c1_145 = arith.constant 1 : index
    %c4_146 = arith.constant 4 : index
    %c0_147 = arith.constant 0 : index
    %c0_148 = arith.constant 0 : index
    %323 = vector.load %arg4[%c1_145, %c4_146, %c0_147, %c0_148] : memref<4x5x1x32xf32, #tpu.memory_space<vmem>>, vector<1x1x1x32xf32>
    %324 = vector.shape_cast %323 : vector<1x1x1x32xf32> to vector<1x32xf32>
    %325 = vector.broadcast %324 : vector<1x32xf32> to vector<18x32xf32>
    %326 = arith.addf %322, %325 : vector<18x32xf32>
    %327 = vector.extract_strided_slice %326 {offsets = [0, 0], sizes = [1, 32], strides = [1, 1]} : vector<18x32xf32> to vector<1x32xf32>
    %328 = vector.extract_strided_slice %326 {offsets = [1, 0], sizes = [2, 32], strides = [1, 1]} : vector<18x32xf32> to vector<2x32xf32>
    %cst_149 = arith.constant dense<0xFF800000> : vector<32xf32>
    %329 = vector.multi_reduction <maximumf>, %328, %cst_149 [0] : vector<2x32xf32> to vector<32xf32>
    %330 = vector.shape_cast %329 : vector<32xf32> to vector<1x32xf32>
    %331 = vector.extract_strided_slice %326 {offsets = [3, 0], sizes = [2, 32], strides = [1, 1]} : vector<18x32xf32> to vector<2x32xf32>
    %cst_150 = arith.constant dense<0xFF800000> : vector<32xf32>
    %332 = vector.multi_reduction <maximumf>, %331, %cst_150 [0] : vector<2x32xf32> to vector<32xf32>
    %333 = vector.shape_cast %332 : vector<32xf32> to vector<1x32xf32>
    %334 = vector.extract_strided_slice %326 {offsets = [5, 0], sizes = [2, 32], strides = [1, 1]} : vector<18x32xf32> to vector<2x32xf32>
    %cst_151 = arith.constant dense<0xFF800000> : vector<32xf32>
    %335 = vector.multi_reduction <maximumf>, %334, %cst_151 [0] : vector<2x32xf32> to vector<32xf32>
    %336 = vector.shape_cast %335 : vector<32xf32> to vector<1x32xf32>
    %337 = vector.extract_strided_slice %326 {offsets = [7, 0], sizes = [2, 32], strides = [1, 1]} : vector<18x32xf32> to vector<2x32xf32>
    %cst_152 = arith.constant dense<0xFF800000> : vector<32xf32>
    %338 = vector.multi_reduction <maximumf>, %337, %cst_152 [0] : vector<2x32xf32> to vector<32xf32>
    %339 = vector.shape_cast %338 : vector<32xf32> to vector<1x32xf32>
    %340 = vector.extract_strided_slice %326 {offsets = [9, 0], sizes = [1, 32], strides = [1, 1]} : vector<18x32xf32> to vector<1x32xf32>
    %341 = vector.extract_strided_slice %326 {offsets = [10, 0], sizes = [2, 32], strides = [1, 1]} : vector<18x32xf32> to vector<2x32xf32>
    %cst_153 = arith.constant dense<0xFF800000> : vector<32xf32>
    %342 = vector.multi_reduction <maximumf>, %341, %cst_153 [0] : vector<2x32xf32> to vector<32xf32>
    %343 = vector.shape_cast %342 : vector<32xf32> to vector<1x32xf32>
    %344 = vector.extract_strided_slice %326 {offsets = [12, 0], sizes = [2, 32], strides = [1, 1]} : vector<18x32xf32> to vector<2x32xf32>
    %cst_154 = arith.constant dense<0xFF800000> : vector<32xf32>
    %345 = vector.multi_reduction <maximumf>, %344, %cst_154 [0] : vector<2x32xf32> to vector<32xf32>
    %346 = vector.shape_cast %345 : vector<32xf32> to vector<1x32xf32>
    %347 = vector.extract_strided_slice %326 {offsets = [14, 0], sizes = [2, 32], strides = [1, 1]} : vector<18x32xf32> to vector<2x32xf32>
    %cst_155 = arith.constant dense<0xFF800000> : vector<32xf32>
    %348 = vector.multi_reduction <maximumf>, %347, %cst_155 [0] : vector<2x32xf32> to vector<32xf32>
    %349 = vector.shape_cast %348 : vector<32xf32> to vector<1x32xf32>
    %350 = vector.extract_strided_slice %326 {offsets = [16, 0], sizes = [2, 32], strides = [1, 1]} : vector<18x32xf32> to vector<2x32xf32>
    %cst_156 = arith.constant dense<0xFF800000> : vector<32xf32>
    %351 = vector.multi_reduction <maximumf>, %350, %cst_156 [0] : vector<2x32xf32> to vector<32xf32>
    %352 = vector.shape_cast %351 : vector<32xf32> to vector<1x32xf32>
    %353 = tpu.concatenate %327, %330, %333, %336, %339, %340, %343, %346, %349, %352 in 0 : vector<1x32xf32>, vector<1x32xf32>, vector<1x32xf32>, vector<1x32xf32>, vector<1x32xf32>, vector<1x32xf32>, vector<1x32xf32>, vector<1x32xf32>, vector<1x32xf32>, vector<1x32xf32> -> vector<10x32xf32>
    %354 = tpu.iota {dimensions = array<i32: 0>} : vector<10x10xi32>
    %355 = tpu.iota {dimensions = array<i32: 1>} : vector<10x10xi32>
    %c0_i32_157 = arith.constant 0 : i32
    %356 = vector.broadcast %c0_i32_157 : i32 to vector<10x10xi32>
    %357 = arith.cmpi sge, %354, %356 : vector<10x10xi32>
    %c5_i32 = arith.constant 5 : i32
    %358 = vector.broadcast %c5_i32 : i32 to vector<10x10xi32>
    %359 = arith.cmpi slt, %354, %358 : vector<10x10xi32>
    %360 = arith.andi %357, %359 : vector<10x10xi1>
    %c0_i32_158 = arith.constant 0 : i32
    %361 = vector.broadcast %c0_i32_158 : i32 to vector<10x10xi32>
    %362 = arith.cmpi sge, %355, %361 : vector<10x10xi32>
    %363 = arith.andi %360, %362 : vector<10x10xi1>
    %c5_i32_159 = arith.constant 5 : i32
    %364 = vector.broadcast %c5_i32_159 : i32 to vector<10x10xi32>
    %365 = arith.cmpi slt, %355, %364 : vector<10x10xi32>
    %366 = arith.andi %363, %365 : vector<10x10xi1>
    %c5_i32_160 = arith.constant 5 : i32
    %367 = vector.broadcast %c5_i32_160 : i32 to vector<10x10xi32>
    %368 = arith.cmpi sge, %354, %367 : vector<10x10xi32>
    %c10_i32 = arith.constant 10 : i32
    %369 = vector.broadcast %c10_i32 : i32 to vector<10x10xi32>
    %370 = arith.cmpi slt, %354, %369 : vector<10x10xi32>
    %371 = arith.andi %368, %370 : vector<10x10xi1>
    %c5_i32_161 = arith.constant 5 : i32
    %372 = vector.broadcast %c5_i32_161 : i32 to vector<10x10xi32>
    %373 = arith.cmpi sge, %355, %372 : vector<10x10xi32>
    %374 = arith.andi %371, %373 : vector<10x10xi1>
    %c10_i32_162 = arith.constant 10 : i32
    %375 = vector.broadcast %c10_i32_162 : i32 to vector<10x10xi32>
    %376 = arith.cmpi slt, %355, %375 : vector<10x10xi32>
    %377 = arith.andi %374, %376 : vector<10x10xi1>
    %378 = arith.ori %366, %377 : vector<10x10xi1>
    %cst_163 = arith.constant 0.000000e+00 : f32
    %cst_164 = arith.constant -1.000000e+30 : f32
    %379 = vector.broadcast %cst_163 : f32 to vector<10x10xf32>
    %380 = vector.broadcast %cst_164 : f32 to vector<10x10xf32>
    %381 = arith.select %378, %379, %380 : vector<10x10xi1>, vector<10x10xf32>
    %cst_165 = arith.constant dense<0.000000e+00> : vector<10xf32>
    %382 = vector.multi_reduction <add>, %353, %cst_165 [1] : vector<10x32xf32> to vector<10xf32>
    %383 = vector.shape_cast %382 : vector<10xf32> to vector<10x1xf32>
    %cst_166 = arith.constant 3.200000e+01 : f32
    %384 = vector.broadcast %cst_166 : f32 to vector<10x1xf32>
    %385 = arith.divf %383, %384 : vector<10x1xf32>
    %386 = vector.broadcast %385 : vector<10x1xf32> to vector<10x32xf32>
    %387 = arith.subf %353, %386 : vector<10x32xf32>
    %388 = arith.mulf %387, %387 : vector<10x32xf32>
    %cst_167 = arith.constant dense<0.000000e+00> : vector<10xf32>
    %389 = vector.multi_reduction <add>, %388, %cst_167 [1] : vector<10x32xf32> to vector<10xf32>
    %390 = vector.shape_cast %389 : vector<10xf32> to vector<10x1xf32>
    %cst_168 = arith.constant 3.200000e+01 : f32
    %391 = vector.broadcast %cst_168 : f32 to vector<10x1xf32>
    %392 = arith.divf %390, %391 : vector<10x1xf32>
    %393 = vector.broadcast %385 : vector<10x1xf32> to vector<10x32xf32>
    %394 = arith.subf %353, %393 : vector<10x32xf32>
    %cst_169 = arith.constant 9.99999974E-6 : f32
    %395 = vector.broadcast %cst_169 : f32 to vector<10x1xf32>
    %396 = arith.addf %392, %395 : vector<10x1xf32>
    %397 = math.rsqrt %396 : vector<10x1xf32>
    %398 = vector.broadcast %397 : vector<10x1xf32> to vector<10x32xf32>
    %399 = arith.mulf %394, %398 : vector<10x32xf32>
    %c2_170 = arith.constant 2 : index
    %c0_171 = arith.constant 0 : index
    %c0_172 = arith.constant 0 : index
    %400 = vector.load %arg1[%c2_170, %c0_171, %c0_172] : memref<4x32x96xf32, #tpu.memory_space<vmem>>, vector<1x32x96xf32>
    %401 = vector.shape_cast %400 : vector<1x32x96xf32> to vector<32x96xf32>
    %cst_173 = arith.constant dense<0.000000e+00> : vector<10x96xf32>
    %402 = tpu.matmul %399, %401, %cst_173 {dimension_numbers = #tpu.dot_dimension_numbers<[1], [0], [0], [1], [0, 0, 1, 1], [], []>} : vector<10x32xf32>, vector<32x96xf32>, vector<10x96xf32> -> vector<10x96xf32>
    %c2_174 = arith.constant 2 : index
    %c0_175 = arith.constant 0 : index
    %c0_176 = arith.constant 0 : index
    %403 = vector.load %arg2[%c2_174, %c0_175, %c0_176] : memref<4x1x96xf32, #tpu.memory_space<vmem>>, vector<1x1x96xf32>
    %404 = vector.shape_cast %403 : vector<1x1x96xf32> to vector<1x96xf32>
    %405 = vector.broadcast %404 : vector<1x96xf32> to vector<10x96xf32>
    %406 = arith.addf %402, %405 : vector<10x96xf32>
    %407 = vector.extract_strided_slice %406 {offsets = [0, 0], sizes = [10, 8], strides = [1, 1]} : vector<10x96xf32> to vector<10x8xf32>
    %cst_177 = arith.constant 0.353553385 : f32
    %408 = vector.broadcast %cst_177 : f32 to vector<10x8xf32>
    %409 = arith.mulf %407, %408 : vector<10x8xf32>
    %410 = vector.extract_strided_slice %406 {offsets = [0, 32], sizes = [10, 8], strides = [1, 1]} : vector<10x96xf32> to vector<10x8xf32>
    %411 = vector.extract_strided_slice %406 {offsets = [0, 64], sizes = [10, 8], strides = [1, 1]} : vector<10x96xf32> to vector<10x8xf32>
    %cst_178 = arith.constant dense<0.000000e+00> : vector<10x10xf32>
    %412 = tpu.matmul %409, %410, %cst_178 {dimension_numbers = #tpu.dot_dimension_numbers<[1], [1], [0], [0], [0, 0, 1, 0], [], []>} : vector<10x8xf32>, vector<10x8xf32>, vector<10x10xf32> -> vector<10x10xf32>
    %413 = arith.addf %412, %381 : vector<10x10xf32>
    %cst_179 = arith.constant dense<0xFF800000> : vector<10xf32>
    %414 = vector.multi_reduction <maximumf>, %413, %cst_179 [1] : vector<10x10xf32> to vector<10xf32>
    %415 = vector.shape_cast %414 : vector<10xf32> to vector<10x1xf32>
    %416 = vector.broadcast %415 : vector<10x1xf32> to vector<10x10xf32>
    %417 = arith.subf %413, %416 : vector<10x10xf32>
    %418 = math.exp %417 : vector<10x10xf32>
    %cst_180 = arith.constant dense<0.000000e+00> : vector<10xf32>
    %419 = vector.multi_reduction <add>, %418, %cst_180 [1] : vector<10x10xf32> to vector<10xf32>
    %420 = vector.shape_cast %419 : vector<10xf32> to vector<10x1xf32>
    %421 = tpu.reciprocal %420 : vector<10x1xf32> -> vector<10x1xf32>
    %422 = vector.broadcast %421 : vector<10x1xf32> to vector<10x10xf32>
    %423 = arith.mulf %418, %422 : vector<10x10xf32>
    %cst_181 = arith.constant dense<0.000000e+00> : vector<10x8xf32>
    %424 = tpu.matmul %423, %411, %cst_181 {dimension_numbers = #tpu.dot_dimension_numbers<[1], [0], [0], [1], [0, 0, 1, 1], [], []>} : vector<10x10xf32>, vector<10x8xf32>, vector<10x8xf32> -> vector<10x8xf32>
    %425 = vector.extract_strided_slice %406 {offsets = [0, 8], sizes = [10, 8], strides = [1, 1]} : vector<10x96xf32> to vector<10x8xf32>
    %cst_182 = arith.constant 0.353553385 : f32
    %426 = vector.broadcast %cst_182 : f32 to vector<10x8xf32>
    %427 = arith.mulf %425, %426 : vector<10x8xf32>
    %428 = vector.extract_strided_slice %406 {offsets = [0, 40], sizes = [10, 8], strides = [1, 1]} : vector<10x96xf32> to vector<10x8xf32>
    %429 = vector.extract_strided_slice %406 {offsets = [0, 72], sizes = [10, 8], strides = [1, 1]} : vector<10x96xf32> to vector<10x8xf32>
    %cst_183 = arith.constant dense<0.000000e+00> : vector<10x10xf32>
    %430 = tpu.matmul %427, %428, %cst_183 {dimension_numbers = #tpu.dot_dimension_numbers<[1], [1], [0], [0], [0, 0, 1, 0], [], []>} : vector<10x8xf32>, vector<10x8xf32>, vector<10x10xf32> -> vector<10x10xf32>
    %431 = arith.addf %430, %381 : vector<10x10xf32>
    %cst_184 = arith.constant dense<0xFF800000> : vector<10xf32>
    %432 = vector.multi_reduction <maximumf>, %431, %cst_184 [1] : vector<10x10xf32> to vector<10xf32>
    %433 = vector.shape_cast %432 : vector<10xf32> to vector<10x1xf32>
    %434 = vector.broadcast %433 : vector<10x1xf32> to vector<10x10xf32>
    %435 = arith.subf %431, %434 : vector<10x10xf32>
    %436 = math.exp %435 : vector<10x10xf32>
    %cst_185 = arith.constant dense<0.000000e+00> : vector<10xf32>
    %437 = vector.multi_reduction <add>, %436, %cst_185 [1] : vector<10x10xf32> to vector<10xf32>
    %438 = vector.shape_cast %437 : vector<10xf32> to vector<10x1xf32>
    %439 = tpu.reciprocal %438 : vector<10x1xf32> -> vector<10x1xf32>
    %440 = vector.broadcast %439 : vector<10x1xf32> to vector<10x10xf32>
    %441 = arith.mulf %436, %440 : vector<10x10xf32>
    %cst_186 = arith.constant dense<0.000000e+00> : vector<10x8xf32>
    %442 = tpu.matmul %441, %429, %cst_186 {dimension_numbers = #tpu.dot_dimension_numbers<[1], [0], [0], [1], [0, 0, 1, 1], [], []>} : vector<10x10xf32>, vector<10x8xf32>, vector<10x8xf32> -> vector<10x8xf32>
    %443 = vector.extract_strided_slice %406 {offsets = [0, 16], sizes = [10, 8], strides = [1, 1]} : vector<10x96xf32> to vector<10x8xf32>
    %cst_187 = arith.constant 0.353553385 : f32
    %444 = vector.broadcast %cst_187 : f32 to vector<10x8xf32>
    %445 = arith.mulf %443, %444 : vector<10x8xf32>
    %446 = vector.extract_strided_slice %406 {offsets = [0, 48], sizes = [10, 8], strides = [1, 1]} : vector<10x96xf32> to vector<10x8xf32>
    %447 = vector.extract_strided_slice %406 {offsets = [0, 80], sizes = [10, 8], strides = [1, 1]} : vector<10x96xf32> to vector<10x8xf32>
    %cst_188 = arith.constant dense<0.000000e+00> : vector<10x10xf32>
    %448 = tpu.matmul %445, %446, %cst_188 {dimension_numbers = #tpu.dot_dimension_numbers<[1], [1], [0], [0], [0, 0, 1, 0], [], []>} : vector<10x8xf32>, vector<10x8xf32>, vector<10x10xf32> -> vector<10x10xf32>
    %449 = arith.addf %448, %381 : vector<10x10xf32>
    %cst_189 = arith.constant dense<0xFF800000> : vector<10xf32>
    %450 = vector.multi_reduction <maximumf>, %449, %cst_189 [1] : vector<10x10xf32> to vector<10xf32>
    %451 = vector.shape_cast %450 : vector<10xf32> to vector<10x1xf32>
    %452 = vector.broadcast %451 : vector<10x1xf32> to vector<10x10xf32>
    %453 = arith.subf %449, %452 : vector<10x10xf32>
    %454 = math.exp %453 : vector<10x10xf32>
    %cst_190 = arith.constant dense<0.000000e+00> : vector<10xf32>
    %455 = vector.multi_reduction <add>, %454, %cst_190 [1] : vector<10x10xf32> to vector<10xf32>
    %456 = vector.shape_cast %455 : vector<10xf32> to vector<10x1xf32>
    %457 = tpu.reciprocal %456 : vector<10x1xf32> -> vector<10x1xf32>
    %458 = vector.broadcast %457 : vector<10x1xf32> to vector<10x10xf32>
    %459 = arith.mulf %454, %458 : vector<10x10xf32>
    %cst_191 = arith.constant dense<0.000000e+00> : vector<10x8xf32>
    %460 = tpu.matmul %459, %447, %cst_191 {dimension_numbers = #tpu.dot_dimension_numbers<[1], [0], [0], [1], [0, 0, 1, 1], [], []>} : vector<10x10xf32>, vector<10x8xf32>, vector<10x8xf32> -> vector<10x8xf32>
    %461 = vector.extract_strided_slice %406 {offsets = [0, 24], sizes = [10, 8], strides = [1, 1]} : vector<10x96xf32> to vector<10x8xf32>
    %cst_192 = arith.constant 0.353553385 : f32
    %462 = vector.broadcast %cst_192 : f32 to vector<10x8xf32>
    %463 = arith.mulf %461, %462 : vector<10x8xf32>
    %464 = vector.extract_strided_slice %406 {offsets = [0, 56], sizes = [10, 8], strides = [1, 1]} : vector<10x96xf32> to vector<10x8xf32>
    %465 = vector.extract_strided_slice %406 {offsets = [0, 88], sizes = [10, 8], strides = [1, 1]} : vector<10x96xf32> to vector<10x8xf32>
    %cst_193 = arith.constant dense<0.000000e+00> : vector<10x10xf32>
    %466 = tpu.matmul %463, %464, %cst_193 {dimension_numbers = #tpu.dot_dimension_numbers<[1], [1], [0], [0], [0, 0, 1, 0], [], []>} : vector<10x8xf32>, vector<10x8xf32>, vector<10x10xf32> -> vector<10x10xf32>
    %467 = arith.addf %466, %381 : vector<10x10xf32>
    %cst_194 = arith.constant dense<0xFF800000> : vector<10xf32>
    %468 = vector.multi_reduction <maximumf>, %467, %cst_194 [1] : vector<10x10xf32> to vector<10xf32>
    %469 = vector.shape_cast %468 : vector<10xf32> to vector<10x1xf32>
    %470 = vector.broadcast %469 : vector<10x1xf32> to vector<10x10xf32>
    %471 = arith.subf %467, %470 : vector<10x10xf32>
    %472 = math.exp %471 : vector<10x10xf32>
    %cst_195 = arith.constant dense<0.000000e+00> : vector<10xf32>
    %473 = vector.multi_reduction <add>, %472, %cst_195 [1] : vector<10x10xf32> to vector<10xf32>
    %474 = vector.shape_cast %473 : vector<10xf32> to vector<10x1xf32>
    %475 = tpu.reciprocal %474 : vector<10x1xf32> -> vector<10x1xf32>
    %476 = vector.broadcast %475 : vector<10x1xf32> to vector<10x10xf32>
    %477 = arith.mulf %472, %476 : vector<10x10xf32>
    %cst_196 = arith.constant dense<0.000000e+00> : vector<10x8xf32>
    %478 = tpu.matmul %477, %465, %cst_196 {dimension_numbers = #tpu.dot_dimension_numbers<[1], [0], [0], [1], [0, 0, 1, 1], [], []>} : vector<10x10xf32>, vector<10x8xf32>, vector<10x8xf32> -> vector<10x8xf32>
    %479 = tpu.concatenate %424, %442, %460, %478 in 1 : vector<10x8xf32>, vector<10x8xf32>, vector<10x8xf32>, vector<10x8xf32> -> vector<10x32xf32>
    %c2_197 = arith.constant 2 : index
    %c0_198 = arith.constant 0 : index
    %c0_199 = arith.constant 0 : index
    %c0_200 = arith.constant 0 : index
    %480 = vector.load %arg3[%c2_197, %c0_198, %c0_199, %c0_200] : memref<4x3x32x32xf32, #tpu.memory_space<vmem>>, vector<1x1x32x32xf32>
    %481 = vector.shape_cast %480 : vector<1x1x32x32xf32> to vector<32x32xf32>
    %cst_201 = arith.constant dense<0.000000e+00> : vector<10x32xf32>
    %482 = tpu.matmul %479, %481, %cst_201 {dimension_numbers = #tpu.dot_dimension_numbers<[1], [0], [0], [1], [0, 0, 1, 1], [], []>} : vector<10x32xf32>, vector<32x32xf32>, vector<10x32xf32> -> vector<10x32xf32>
    %483 = arith.addf %353, %482 : vector<10x32xf32>
    %c2_202 = arith.constant 2 : index
    %c0_203 = arith.constant 0 : index
    %c0_204 = arith.constant 0 : index
    %c0_205 = arith.constant 0 : index
    %484 = vector.load %arg4[%c2_202, %c0_203, %c0_204, %c0_205] : memref<4x5x1x32xf32, #tpu.memory_space<vmem>>, vector<1x1x1x32xf32>
    %485 = vector.shape_cast %484 : vector<1x1x1x32xf32> to vector<1x32xf32>
    %486 = vector.broadcast %485 : vector<1x32xf32> to vector<10x32xf32>
    %487 = arith.addf %483, %486 : vector<10x32xf32>
    %c2_206 = arith.constant 2 : index
    %c1_207 = arith.constant 1 : index
    %c0_208 = arith.constant 0 : index
    %c0_209 = arith.constant 0 : index
    %488 = vector.load %arg4[%c2_206, %c1_207, %c0_208, %c0_209] : memref<4x5x1x32xf32, #tpu.memory_space<vmem>>, vector<1x1x1x32xf32>
    %489 = vector.shape_cast %488 : vector<1x1x1x32xf32> to vector<1x32xf32>
    %c2_210 = arith.constant 2 : index
    %c2_211 = arith.constant 2 : index
    %c0_212 = arith.constant 0 : index
    %c0_213 = arith.constant 0 : index
    %490 = vector.load %arg4[%c2_210, %c2_211, %c0_212, %c0_213] : memref<4x5x1x32xf32, #tpu.memory_space<vmem>>, vector<1x1x1x32xf32>
    %491 = vector.shape_cast %490 : vector<1x1x1x32xf32> to vector<1x32xf32>
    %cst_214 = arith.constant dense<0.000000e+00> : vector<10xf32>
    %492 = vector.multi_reduction <add>, %487, %cst_214 [1] : vector<10x32xf32> to vector<10xf32>
    %493 = vector.shape_cast %492 : vector<10xf32> to vector<10x1xf32>
    %cst_215 = arith.constant 3.200000e+01 : f32
    %494 = vector.broadcast %cst_215 : f32 to vector<10x1xf32>
    %495 = arith.divf %493, %494 : vector<10x1xf32>
    %496 = vector.broadcast %495 : vector<10x1xf32> to vector<10x32xf32>
    %497 = arith.subf %487, %496 : vector<10x32xf32>
    %498 = arith.mulf %497, %497 : vector<10x32xf32>
    %cst_216 = arith.constant dense<0.000000e+00> : vector<10xf32>
    %499 = vector.multi_reduction <add>, %498, %cst_216 [1] : vector<10x32xf32> to vector<10xf32>
    %500 = vector.shape_cast %499 : vector<10xf32> to vector<10x1xf32>
    %cst_217 = arith.constant 3.200000e+01 : f32
    %501 = vector.broadcast %cst_217 : f32 to vector<10x1xf32>
    %502 = arith.divf %500, %501 : vector<10x1xf32>
    %503 = vector.broadcast %495 : vector<10x1xf32> to vector<10x32xf32>
    %504 = arith.subf %487, %503 : vector<10x32xf32>
    %cst_218 = arith.constant 9.99999974E-6 : f32
    %505 = vector.broadcast %cst_218 : f32 to vector<10x1xf32>
    %506 = arith.addf %502, %505 : vector<10x1xf32>
    %507 = math.rsqrt %506 : vector<10x1xf32>
    %508 = vector.broadcast %507 : vector<10x1xf32> to vector<10x32xf32>
    %509 = arith.mulf %504, %508 : vector<10x32xf32>
    %510 = vector.broadcast %489 : vector<1x32xf32> to vector<10x32xf32>
    %511 = arith.mulf %509, %510 : vector<10x32xf32>
    %512 = vector.broadcast %491 : vector<1x32xf32> to vector<10x32xf32>
    %513 = arith.addf %511, %512 : vector<10x32xf32>
    %c2_219 = arith.constant 2 : index
    %c1_220 = arith.constant 1 : index
    %c0_221 = arith.constant 0 : index
    %c0_222 = arith.constant 0 : index
    %514 = vector.load %arg3[%c2_219, %c1_220, %c0_221, %c0_222] : memref<4x3x32x32xf32, #tpu.memory_space<vmem>>, vector<1x1x32x32xf32>
    %515 = vector.shape_cast %514 : vector<1x1x32x32xf32> to vector<32x32xf32>
    %cst_223 = arith.constant dense<0.000000e+00> : vector<10x32xf32>
    %516 = tpu.matmul %513, %515, %cst_223 {dimension_numbers = #tpu.dot_dimension_numbers<[1], [0], [0], [1], [0, 0, 1, 1], [], []>} : vector<10x32xf32>, vector<32x32xf32>, vector<10x32xf32> -> vector<10x32xf32>
    %c2_224 = arith.constant 2 : index
    %c3_225 = arith.constant 3 : index
    %c0_226 = arith.constant 0 : index
    %c0_227 = arith.constant 0 : index
    %517 = vector.load %arg4[%c2_224, %c3_225, %c0_226, %c0_227] : memref<4x5x1x32xf32, #tpu.memory_space<vmem>>, vector<1x1x1x32xf32>
    %518 = vector.shape_cast %517 : vector<1x1x1x32xf32> to vector<1x32xf32>
    %519 = vector.broadcast %518 : vector<1x32xf32> to vector<10x32xf32>
    %520 = arith.addf %516, %519 : vector<10x32xf32>
    %cst_228 = arith.constant 0.000000e+00 : f32
    %521 = vector.broadcast %cst_228 : f32 to vector<10x32xf32>
    %522 = arith.maximumf %520, %521 : vector<10x32xf32>
    %c2_229 = arith.constant 2 : index
    %c2_230 = arith.constant 2 : index
    %c0_231 = arith.constant 0 : index
    %c0_232 = arith.constant 0 : index
    %523 = vector.load %arg3[%c2_229, %c2_230, %c0_231, %c0_232] : memref<4x3x32x32xf32, #tpu.memory_space<vmem>>, vector<1x1x32x32xf32>
    %524 = vector.shape_cast %523 : vector<1x1x32x32xf32> to vector<32x32xf32>
    %cst_233 = arith.constant dense<0.000000e+00> : vector<10x32xf32>
    %525 = tpu.matmul %522, %524, %cst_233 {dimension_numbers = #tpu.dot_dimension_numbers<[1], [0], [0], [1], [0, 0, 1, 1], [], []>} : vector<10x32xf32>, vector<32x32xf32>, vector<10x32xf32> -> vector<10x32xf32>
    %526 = arith.addf %487, %525 : vector<10x32xf32>
    %c2_234 = arith.constant 2 : index
    %c4_235 = arith.constant 4 : index
    %c0_236 = arith.constant 0 : index
    %c0_237 = arith.constant 0 : index
    %527 = vector.load %arg4[%c2_234, %c4_235, %c0_236, %c0_237] : memref<4x5x1x32xf32, #tpu.memory_space<vmem>>, vector<1x1x1x32xf32>
    %528 = vector.shape_cast %527 : vector<1x1x1x32xf32> to vector<1x32xf32>
    %529 = vector.broadcast %528 : vector<1x32xf32> to vector<10x32xf32>
    %530 = arith.addf %526, %529 : vector<10x32xf32>
    %cst_238 = arith.constant dense<0.000000e+00> : vector<10xf32>
    %531 = vector.multi_reduction <add>, %530, %cst_238 [1] : vector<10x32xf32> to vector<10xf32>
    %532 = vector.shape_cast %531 : vector<10xf32> to vector<10x1xf32>
    %cst_239 = arith.constant 3.200000e+01 : f32
    %533 = vector.broadcast %cst_239 : f32 to vector<10x1xf32>
    %534 = arith.divf %532, %533 : vector<10x1xf32>
    %535 = vector.broadcast %534 : vector<10x1xf32> to vector<10x32xf32>
    %536 = arith.subf %530, %535 : vector<10x32xf32>
    %537 = arith.mulf %536, %536 : vector<10x32xf32>
    %cst_240 = arith.constant dense<0.000000e+00> : vector<10xf32>
    %538 = vector.multi_reduction <add>, %537, %cst_240 [1] : vector<10x32xf32> to vector<10xf32>
    %539 = vector.shape_cast %538 : vector<10xf32> to vector<10x1xf32>
    %cst_241 = arith.constant 3.200000e+01 : f32
    %540 = vector.broadcast %cst_241 : f32 to vector<10x1xf32>
    %541 = arith.divf %539, %540 : vector<10x1xf32>
    %542 = vector.broadcast %534 : vector<10x1xf32> to vector<10x32xf32>
    %543 = arith.subf %530, %542 : vector<10x32xf32>
    %cst_242 = arith.constant 9.99999974E-6 : f32
    %544 = vector.broadcast %cst_242 : f32 to vector<10x1xf32>
    %545 = arith.addf %541, %544 : vector<10x1xf32>
    %546 = math.rsqrt %545 : vector<10x1xf32>
    %547 = vector.broadcast %546 : vector<10x1xf32> to vector<10x32xf32>
    %548 = arith.mulf %543, %547 : vector<10x32xf32>
    %c3_243 = arith.constant 3 : index
    %c0_244 = arith.constant 0 : index
    %c0_245 = arith.constant 0 : index
    %549 = vector.load %arg1[%c3_243, %c0_244, %c0_245] : memref<4x32x96xf32, #tpu.memory_space<vmem>>, vector<1x32x96xf32>
    %550 = vector.shape_cast %549 : vector<1x32x96xf32> to vector<32x96xf32>
    %cst_246 = arith.constant dense<0.000000e+00> : vector<10x96xf32>
    %551 = tpu.matmul %548, %550, %cst_246 {dimension_numbers = #tpu.dot_dimension_numbers<[1], [0], [0], [1], [0, 0, 1, 1], [], []>} : vector<10x32xf32>, vector<32x96xf32>, vector<10x96xf32> -> vector<10x96xf32>
    %c3_247 = arith.constant 3 : index
    %c0_248 = arith.constant 0 : index
    %c0_249 = arith.constant 0 : index
    %552 = vector.load %arg2[%c3_247, %c0_248, %c0_249] : memref<4x1x96xf32, #tpu.memory_space<vmem>>, vector<1x1x96xf32>
    %553 = vector.shape_cast %552 : vector<1x1x96xf32> to vector<1x96xf32>
    %554 = vector.broadcast %553 : vector<1x96xf32> to vector<10x96xf32>
    %555 = arith.addf %551, %554 : vector<10x96xf32>
    %556 = vector.extract_strided_slice %555 {offsets = [0, 0], sizes = [10, 8], strides = [1, 1]} : vector<10x96xf32> to vector<10x8xf32>
    %cst_250 = arith.constant 0.353553385 : f32
    %557 = vector.broadcast %cst_250 : f32 to vector<10x8xf32>
    %558 = arith.mulf %556, %557 : vector<10x8xf32>
    %559 = vector.extract_strided_slice %555 {offsets = [0, 32], sizes = [10, 8], strides = [1, 1]} : vector<10x96xf32> to vector<10x8xf32>
    %560 = vector.extract_strided_slice %555 {offsets = [0, 64], sizes = [10, 8], strides = [1, 1]} : vector<10x96xf32> to vector<10x8xf32>
    %cst_251 = arith.constant dense<0.000000e+00> : vector<10x10xf32>
    %561 = tpu.matmul %558, %559, %cst_251 {dimension_numbers = #tpu.dot_dimension_numbers<[1], [1], [0], [0], [0, 0, 1, 0], [], []>} : vector<10x8xf32>, vector<10x8xf32>, vector<10x10xf32> -> vector<10x10xf32>
    %562 = arith.addf %561, %381 : vector<10x10xf32>
    %cst_252 = arith.constant dense<0xFF800000> : vector<10xf32>
    %563 = vector.multi_reduction <maximumf>, %562, %cst_252 [1] : vector<10x10xf32> to vector<10xf32>
    %564 = vector.shape_cast %563 : vector<10xf32> to vector<10x1xf32>
    %565 = vector.broadcast %564 : vector<10x1xf32> to vector<10x10xf32>
    %566 = arith.subf %562, %565 : vector<10x10xf32>
    %567 = math.exp %566 : vector<10x10xf32>
    %cst_253 = arith.constant dense<0.000000e+00> : vector<10xf32>
    %568 = vector.multi_reduction <add>, %567, %cst_253 [1] : vector<10x10xf32> to vector<10xf32>
    %569 = vector.shape_cast %568 : vector<10xf32> to vector<10x1xf32>
    %570 = tpu.reciprocal %569 : vector<10x1xf32> -> vector<10x1xf32>
    %571 = vector.broadcast %570 : vector<10x1xf32> to vector<10x10xf32>
    %572 = arith.mulf %567, %571 : vector<10x10xf32>
    %cst_254 = arith.constant dense<0.000000e+00> : vector<10x8xf32>
    %573 = tpu.matmul %572, %560, %cst_254 {dimension_numbers = #tpu.dot_dimension_numbers<[1], [0], [0], [1], [0, 0, 1, 1], [], []>} : vector<10x10xf32>, vector<10x8xf32>, vector<10x8xf32> -> vector<10x8xf32>
    %574 = vector.extract_strided_slice %555 {offsets = [0, 8], sizes = [10, 8], strides = [1, 1]} : vector<10x96xf32> to vector<10x8xf32>
    %cst_255 = arith.constant 0.353553385 : f32
    %575 = vector.broadcast %cst_255 : f32 to vector<10x8xf32>
    %576 = arith.mulf %574, %575 : vector<10x8xf32>
    %577 = vector.extract_strided_slice %555 {offsets = [0, 40], sizes = [10, 8], strides = [1, 1]} : vector<10x96xf32> to vector<10x8xf32>
    %578 = vector.extract_strided_slice %555 {offsets = [0, 72], sizes = [10, 8], strides = [1, 1]} : vector<10x96xf32> to vector<10x8xf32>
    %cst_256 = arith.constant dense<0.000000e+00> : vector<10x10xf32>
    %579 = tpu.matmul %576, %577, %cst_256 {dimension_numbers = #tpu.dot_dimension_numbers<[1], [1], [0], [0], [0, 0, 1, 0], [], []>} : vector<10x8xf32>, vector<10x8xf32>, vector<10x10xf32> -> vector<10x10xf32>
    %580 = arith.addf %579, %381 : vector<10x10xf32>
    %cst_257 = arith.constant dense<0xFF800000> : vector<10xf32>
    %581 = vector.multi_reduction <maximumf>, %580, %cst_257 [1] : vector<10x10xf32> to vector<10xf32>
    %582 = vector.shape_cast %581 : vector<10xf32> to vector<10x1xf32>
    %583 = vector.broadcast %582 : vector<10x1xf32> to vector<10x10xf32>
    %584 = arith.subf %580, %583 : vector<10x10xf32>
    %585 = math.exp %584 : vector<10x10xf32>
    %cst_258 = arith.constant dense<0.000000e+00> : vector<10xf32>
    %586 = vector.multi_reduction <add>, %585, %cst_258 [1] : vector<10x10xf32> to vector<10xf32>
    %587 = vector.shape_cast %586 : vector<10xf32> to vector<10x1xf32>
    %588 = tpu.reciprocal %587 : vector<10x1xf32> -> vector<10x1xf32>
    %589 = vector.broadcast %588 : vector<10x1xf32> to vector<10x10xf32>
    %590 = arith.mulf %585, %589 : vector<10x10xf32>
    %cst_259 = arith.constant dense<0.000000e+00> : vector<10x8xf32>
    %591 = tpu.matmul %590, %578, %cst_259 {dimension_numbers = #tpu.dot_dimension_numbers<[1], [0], [0], [1], [0, 0, 1, 1], [], []>} : vector<10x10xf32>, vector<10x8xf32>, vector<10x8xf32> -> vector<10x8xf32>
    %592 = vector.extract_strided_slice %555 {offsets = [0, 16], sizes = [10, 8], strides = [1, 1]} : vector<10x96xf32> to vector<10x8xf32>
    %cst_260 = arith.constant 0.353553385 : f32
    %593 = vector.broadcast %cst_260 : f32 to vector<10x8xf32>
    %594 = arith.mulf %592, %593 : vector<10x8xf32>
    %595 = vector.extract_strided_slice %555 {offsets = [0, 48], sizes = [10, 8], strides = [1, 1]} : vector<10x96xf32> to vector<10x8xf32>
    %596 = vector.extract_strided_slice %555 {offsets = [0, 80], sizes = [10, 8], strides = [1, 1]} : vector<10x96xf32> to vector<10x8xf32>
    %cst_261 = arith.constant dense<0.000000e+00> : vector<10x10xf32>
    %597 = tpu.matmul %594, %595, %cst_261 {dimension_numbers = #tpu.dot_dimension_numbers<[1], [1], [0], [0], [0, 0, 1, 0], [], []>} : vector<10x8xf32>, vector<10x8xf32>, vector<10x10xf32> -> vector<10x10xf32>
    %598 = arith.addf %597, %381 : vector<10x10xf32>
    %cst_262 = arith.constant dense<0xFF800000> : vector<10xf32>
    %599 = vector.multi_reduction <maximumf>, %598, %cst_262 [1] : vector<10x10xf32> to vector<10xf32>
    %600 = vector.shape_cast %599 : vector<10xf32> to vector<10x1xf32>
    %601 = vector.broadcast %600 : vector<10x1xf32> to vector<10x10xf32>
    %602 = arith.subf %598, %601 : vector<10x10xf32>
    %603 = math.exp %602 : vector<10x10xf32>
    %cst_263 = arith.constant dense<0.000000e+00> : vector<10xf32>
    %604 = vector.multi_reduction <add>, %603, %cst_263 [1] : vector<10x10xf32> to vector<10xf32>
    %605 = vector.shape_cast %604 : vector<10xf32> to vector<10x1xf32>
    %606 = tpu.reciprocal %605 : vector<10x1xf32> -> vector<10x1xf32>
    %607 = vector.broadcast %606 : vector<10x1xf32> to vector<10x10xf32>
    %608 = arith.mulf %603, %607 : vector<10x10xf32>
    %cst_264 = arith.constant dense<0.000000e+00> : vector<10x8xf32>
    %609 = tpu.matmul %608, %596, %cst_264 {dimension_numbers = #tpu.dot_dimension_numbers<[1], [0], [0], [1], [0, 0, 1, 1], [], []>} : vector<10x10xf32>, vector<10x8xf32>, vector<10x8xf32> -> vector<10x8xf32>
    %610 = vector.extract_strided_slice %555 {offsets = [0, 24], sizes = [10, 8], strides = [1, 1]} : vector<10x96xf32> to vector<10x8xf32>
    %cst_265 = arith.constant 0.353553385 : f32
    %611 = vector.broadcast %cst_265 : f32 to vector<10x8xf32>
    %612 = arith.mulf %610, %611 : vector<10x8xf32>
    %613 = vector.extract_strided_slice %555 {offsets = [0, 56], sizes = [10, 8], strides = [1, 1]} : vector<10x96xf32> to vector<10x8xf32>
    %614 = vector.extract_strided_slice %555 {offsets = [0, 88], sizes = [10, 8], strides = [1, 1]} : vector<10x96xf32> to vector<10x8xf32>
    %cst_266 = arith.constant dense<0.000000e+00> : vector<10x10xf32>
    %615 = tpu.matmul %612, %613, %cst_266 {dimension_numbers = #tpu.dot_dimension_numbers<[1], [1], [0], [0], [0, 0, 1, 0], [], []>} : vector<10x8xf32>, vector<10x8xf32>, vector<10x10xf32> -> vector<10x10xf32>
    %616 = arith.addf %615, %381 : vector<10x10xf32>
    %cst_267 = arith.constant dense<0xFF800000> : vector<10xf32>
    %617 = vector.multi_reduction <maximumf>, %616, %cst_267 [1] : vector<10x10xf32> to vector<10xf32>
    %618 = vector.shape_cast %617 : vector<10xf32> to vector<10x1xf32>
    %619 = vector.broadcast %618 : vector<10x1xf32> to vector<10x10xf32>
    %620 = arith.subf %616, %619 : vector<10x10xf32>
    %621 = math.exp %620 : vector<10x10xf32>
    %cst_268 = arith.constant dense<0.000000e+00> : vector<10xf32>
    %622 = vector.multi_reduction <add>, %621, %cst_268 [1] : vector<10x10xf32> to vector<10xf32>
    %623 = vector.shape_cast %622 : vector<10xf32> to vector<10x1xf32>
    %624 = tpu.reciprocal %623 : vector<10x1xf32> -> vector<10x1xf32>
    %625 = vector.broadcast %624 : vector<10x1xf32> to vector<10x10xf32>
    %626 = arith.mulf %621, %625 : vector<10x10xf32>
    %cst_269 = arith.constant dense<0.000000e+00> : vector<10x8xf32>
    %627 = tpu.matmul %626, %614, %cst_269 {dimension_numbers = #tpu.dot_dimension_numbers<[1], [0], [0], [1], [0, 0, 1, 1], [], []>} : vector<10x10xf32>, vector<10x8xf32>, vector<10x8xf32> -> vector<10x8xf32>
    %628 = tpu.concatenate %573, %591, %609, %627 in 1 : vector<10x8xf32>, vector<10x8xf32>, vector<10x8xf32>, vector<10x8xf32> -> vector<10x32xf32>
    %c3_270 = arith.constant 3 : index
    %c0_271 = arith.constant 0 : index
    %c0_272 = arith.constant 0 : index
    %c0_273 = arith.constant 0 : index
    %629 = vector.load %arg3[%c3_270, %c0_271, %c0_272, %c0_273] : memref<4x3x32x32xf32, #tpu.memory_space<vmem>>, vector<1x1x32x32xf32>
    %630 = vector.shape_cast %629 : vector<1x1x32x32xf32> to vector<32x32xf32>
    %cst_274 = arith.constant dense<0.000000e+00> : vector<10x32xf32>
    %631 = tpu.matmul %628, %630, %cst_274 {dimension_numbers = #tpu.dot_dimension_numbers<[1], [0], [0], [1], [0, 0, 1, 1], [], []>} : vector<10x32xf32>, vector<32x32xf32>, vector<10x32xf32> -> vector<10x32xf32>
    %632 = arith.addf %530, %631 : vector<10x32xf32>
    %c3_275 = arith.constant 3 : index
    %c0_276 = arith.constant 0 : index
    %c0_277 = arith.constant 0 : index
    %c0_278 = arith.constant 0 : index
    %633 = vector.load %arg4[%c3_275, %c0_276, %c0_277, %c0_278] : memref<4x5x1x32xf32, #tpu.memory_space<vmem>>, vector<1x1x1x32xf32>
    %634 = vector.shape_cast %633 : vector<1x1x1x32xf32> to vector<1x32xf32>
    %635 = vector.broadcast %634 : vector<1x32xf32> to vector<10x32xf32>
    %636 = arith.addf %632, %635 : vector<10x32xf32>
    %c3_279 = arith.constant 3 : index
    %c1_280 = arith.constant 1 : index
    %c0_281 = arith.constant 0 : index
    %c0_282 = arith.constant 0 : index
    %637 = vector.load %arg4[%c3_279, %c1_280, %c0_281, %c0_282] : memref<4x5x1x32xf32, #tpu.memory_space<vmem>>, vector<1x1x1x32xf32>
    %638 = vector.shape_cast %637 : vector<1x1x1x32xf32> to vector<1x32xf32>
    %c3_283 = arith.constant 3 : index
    %c2_284 = arith.constant 2 : index
    %c0_285 = arith.constant 0 : index
    %c0_286 = arith.constant 0 : index
    %639 = vector.load %arg4[%c3_283, %c2_284, %c0_285, %c0_286] : memref<4x5x1x32xf32, #tpu.memory_space<vmem>>, vector<1x1x1x32xf32>
    %640 = vector.shape_cast %639 : vector<1x1x1x32xf32> to vector<1x32xf32>
    %cst_287 = arith.constant dense<0.000000e+00> : vector<10xf32>
    %641 = vector.multi_reduction <add>, %636, %cst_287 [1] : vector<10x32xf32> to vector<10xf32>
    %642 = vector.shape_cast %641 : vector<10xf32> to vector<10x1xf32>
    %cst_288 = arith.constant 3.200000e+01 : f32
    %643 = vector.broadcast %cst_288 : f32 to vector<10x1xf32>
    %644 = arith.divf %642, %643 : vector<10x1xf32>
    %645 = vector.broadcast %644 : vector<10x1xf32> to vector<10x32xf32>
    %646 = arith.subf %636, %645 : vector<10x32xf32>
    %647 = arith.mulf %646, %646 : vector<10x32xf32>
    %cst_289 = arith.constant dense<0.000000e+00> : vector<10xf32>
    %648 = vector.multi_reduction <add>, %647, %cst_289 [1] : vector<10x32xf32> to vector<10xf32>
    %649 = vector.shape_cast %648 : vector<10xf32> to vector<10x1xf32>
    %cst_290 = arith.constant 3.200000e+01 : f32
    %650 = vector.broadcast %cst_290 : f32 to vector<10x1xf32>
    %651 = arith.divf %649, %650 : vector<10x1xf32>
    %652 = vector.broadcast %644 : vector<10x1xf32> to vector<10x32xf32>
    %653 = arith.subf %636, %652 : vector<10x32xf32>
    %cst_291 = arith.constant 9.99999974E-6 : f32
    %654 = vector.broadcast %cst_291 : f32 to vector<10x1xf32>
    %655 = arith.addf %651, %654 : vector<10x1xf32>
    %656 = math.rsqrt %655 : vector<10x1xf32>
    %657 = vector.broadcast %656 : vector<10x1xf32> to vector<10x32xf32>
    %658 = arith.mulf %653, %657 : vector<10x32xf32>
    %659 = vector.broadcast %638 : vector<1x32xf32> to vector<10x32xf32>
    %660 = arith.mulf %658, %659 : vector<10x32xf32>
    %661 = vector.broadcast %640 : vector<1x32xf32> to vector<10x32xf32>
    %662 = arith.addf %660, %661 : vector<10x32xf32>
    %c3_292 = arith.constant 3 : index
    %c1_293 = arith.constant 1 : index
    %c0_294 = arith.constant 0 : index
    %c0_295 = arith.constant 0 : index
    %663 = vector.load %arg3[%c3_292, %c1_293, %c0_294, %c0_295] : memref<4x3x32x32xf32, #tpu.memory_space<vmem>>, vector<1x1x32x32xf32>
    %664 = vector.shape_cast %663 : vector<1x1x32x32xf32> to vector<32x32xf32>
    %cst_296 = arith.constant dense<0.000000e+00> : vector<10x32xf32>
    %665 = tpu.matmul %662, %664, %cst_296 {dimension_numbers = #tpu.dot_dimension_numbers<[1], [0], [0], [1], [0, 0, 1, 1], [], []>} : vector<10x32xf32>, vector<32x32xf32>, vector<10x32xf32> -> vector<10x32xf32>
    %c3_297 = arith.constant 3 : index
    %c3_298 = arith.constant 3 : index
    %c0_299 = arith.constant 0 : index
    %c0_300 = arith.constant 0 : index
    %666 = vector.load %arg4[%c3_297, %c3_298, %c0_299, %c0_300] : memref<4x5x1x32xf32, #tpu.memory_space<vmem>>, vector<1x1x1x32xf32>
    %667 = vector.shape_cast %666 : vector<1x1x1x32xf32> to vector<1x32xf32>
    %668 = vector.broadcast %667 : vector<1x32xf32> to vector<10x32xf32>
    %669 = arith.addf %665, %668 : vector<10x32xf32>
    %cst_301 = arith.constant 0.000000e+00 : f32
    %670 = vector.broadcast %cst_301 : f32 to vector<10x32xf32>
    %671 = arith.maximumf %669, %670 : vector<10x32xf32>
    %c3_302 = arith.constant 3 : index
    %c2_303 = arith.constant 2 : index
    %c0_304 = arith.constant 0 : index
    %c0_305 = arith.constant 0 : index
    %672 = vector.load %arg3[%c3_302, %c2_303, %c0_304, %c0_305] : memref<4x3x32x32xf32, #tpu.memory_space<vmem>>, vector<1x1x32x32xf32>
    %673 = vector.shape_cast %672 : vector<1x1x32x32xf32> to vector<32x32xf32>
    %cst_306 = arith.constant dense<0.000000e+00> : vector<10x32xf32>
    %674 = tpu.matmul %671, %673, %cst_306 {dimension_numbers = #tpu.dot_dimension_numbers<[1], [0], [0], [1], [0, 0, 1, 1], [], []>} : vector<10x32xf32>, vector<32x32xf32>, vector<10x32xf32> -> vector<10x32xf32>
    %675 = arith.addf %636, %674 : vector<10x32xf32>
    %c3_307 = arith.constant 3 : index
    %c4_308 = arith.constant 4 : index
    %c0_309 = arith.constant 0 : index
    %c0_310 = arith.constant 0 : index
    %676 = vector.load %arg4[%c3_307, %c4_308, %c0_309, %c0_310] : memref<4x5x1x32xf32, #tpu.memory_space<vmem>>, vector<1x1x1x32xf32>
    %677 = vector.shape_cast %676 : vector<1x1x1x32xf32> to vector<1x32xf32>
    %678 = vector.broadcast %677 : vector<1x32xf32> to vector<10x32xf32>
    %679 = arith.addf %675, %678 : vector<10x32xf32>
    %680 = vector.extract_strided_slice %679 {offsets = [0, 0], sizes = [1, 32], strides = [1, 1]} : vector<10x32xf32> to vector<1x32xf32>
    %681 = vector.extract_strided_slice %679 {offsets = [5, 0], sizes = [1, 32], strides = [1, 1]} : vector<10x32xf32> to vector<1x32xf32>
    %682 = tpu.concatenate %680, %681 in 0 : vector<1x32xf32>, vector<1x32xf32> -> vector<2x32xf32>
    %c0_311 = arith.constant 0 : index
    %c0_312 = arith.constant 0 : index
    %c0_313 = arith.constant 0 : index
    %683 = vector.load %arg5[%c0_311, %c0_312, %c0_313] : memref<2x1x32xf32, #tpu.memory_space<vmem>>, vector<1x1x32xf32>
    %684 = vector.shape_cast %683 : vector<1x1x32xf32> to vector<1x32xf32>
    %c1_314 = arith.constant 1 : index
    %c0_315 = arith.constant 0 : index
    %c0_316 = arith.constant 0 : index
    %685 = vector.load %arg5[%c1_314, %c0_315, %c0_316] : memref<2x1x32xf32, #tpu.memory_space<vmem>>, vector<1x1x32xf32>
    %686 = vector.shape_cast %685 : vector<1x1x32xf32> to vector<1x32xf32>
    %cst_317 = arith.constant dense<0.000000e+00> : vector<2xf32>
    %687 = vector.multi_reduction <add>, %682, %cst_317 [1] : vector<2x32xf32> to vector<2xf32>
    %688 = vector.shape_cast %687 : vector<2xf32> to vector<2x1xf32>
    %cst_318 = arith.constant 3.200000e+01 : f32
    %689 = vector.broadcast %cst_318 : f32 to vector<2x1xf32>
    %690 = arith.divf %688, %689 : vector<2x1xf32>
    %691 = vector.broadcast %690 : vector<2x1xf32> to vector<2x32xf32>
    %692 = arith.subf %682, %691 : vector<2x32xf32>
    %693 = arith.mulf %692, %692 : vector<2x32xf32>
    %cst_319 = arith.constant dense<0.000000e+00> : vector<2xf32>
    %694 = vector.multi_reduction <add>, %693, %cst_319 [1] : vector<2x32xf32> to vector<2xf32>
    %695 = vector.shape_cast %694 : vector<2xf32> to vector<2x1xf32>
    %cst_320 = arith.constant 3.200000e+01 : f32
    %696 = vector.broadcast %cst_320 : f32 to vector<2x1xf32>
    %697 = arith.divf %695, %696 : vector<2x1xf32>
    %698 = vector.broadcast %690 : vector<2x1xf32> to vector<2x32xf32>
    %699 = arith.subf %682, %698 : vector<2x32xf32>
    %cst_321 = arith.constant 9.99999974E-6 : f32
    %700 = vector.broadcast %cst_321 : f32 to vector<2x1xf32>
    %701 = arith.addf %697, %700 : vector<2x1xf32>
    %702 = math.rsqrt %701 : vector<2x1xf32>
    %703 = vector.broadcast %702 : vector<2x1xf32> to vector<2x32xf32>
    %704 = arith.mulf %699, %703 : vector<2x32xf32>
    %705 = vector.broadcast %684 : vector<1x32xf32> to vector<2x32xf32>
    %706 = arith.mulf %704, %705 : vector<2x32xf32>
    %707 = vector.broadcast %686 : vector<1x32xf32> to vector<2x32xf32>
    %708 = arith.addf %706, %707 : vector<2x32xf32>
    %c0_322 = arith.constant 0 : index
    %c0_323 = arith.constant 0 : index
    %709 = vector.load %arg6[%c0_322, %c0_323] : memref<32x5xf32, #tpu.memory_space<vmem>>, vector<32x5xf32>
    %cst_324 = arith.constant dense<0.000000e+00> : vector<2x5xf32>
    %710 = tpu.matmul %708, %709, %cst_324 {dimension_numbers = #tpu.dot_dimension_numbers<[1], [0], [0], [1], [0, 0, 1, 1], [], []>} : vector<2x32xf32>, vector<32x5xf32>, vector<2x5xf32> -> vector<2x5xf32>
    %c0_325 = arith.constant 0 : index
    %c0_326 = arith.constant 0 : index
    %711 = vector.load %arg7[%c0_325, %c0_326] : memref<1x5xf32, #tpu.memory_space<vmem>>, vector<1x5xf32>
    %712 = vector.broadcast %711 : vector<1x5xf32> to vector<2x5xf32>
    %713 = arith.addf %710, %712 : vector<2x5xf32>
    %c0_327 = arith.constant 0 : index
    %c0_328 = arith.constant 0 : index
    %714 = vector.load %arg8[%c0_327, %c0_328] : memref<2x5xf32, #tpu.memory_space<vmem>>, vector<2x5xf32>
    tpu.vector_store %arg8[%c0_327, %c0_328], %713 {strides = array<i32>} : memref<2x5xf32, #tpu.memory_space<vmem>>, vector<2x5xf32>,
    return
  }
}

</mosaic_0001>

<bundles_post_ra>
// kernel: _lambda_.1
= control target key start
LH: loop header
LB: loop body
LE: loop exit
PB: predicated region body
PF: predicated region fallthrough
CT: control target
= control target key end

     0   :  { %vm9303_vm0 = vcmask 261120   ;;  %vm9302_vm1 = vcmask 254976   ;;  %s9293_s0 = inlined_call_operand.vmem [shape: f32[18,32], index: 0, kind: input, shape index: {}]   ;;  %s9294_s1 = inlined_call_operand.vmem [shape: f32[4,32,96], index: 1, kind: input, shape index: {}]   ;;  %s9295_s2 = inlined_call_operand.vmem [shape: f32[4,1,96], index: 2, kind: input, shape index: {}]   ;;  %s9296_s3 = inlined_call_operand.vmem [shape: f32[4,3,32,32], index: 3, kind: input, shape index: {}]   ;;  %s9297_s4 = inlined_call_operand.vmem [shape: f32[4,5,1,32], index: 4, kind: input, shape index: {}]   ;;  %s9298_s5 = inlined_call_operand.vmem [shape: f32[2,1,32], index: 5, kind: input, shape index: {}]   ;;  %s9299_s6 = inlined_call_operand.vmem [shape: f32[32,5], index: 6, kind: input, shape index: {}]   ;;  %s9300_s7 = inlined_call_operand.vmem [shape: f32[1,5], index: 7, kind: input, shape index: {}]   ;;  %s9301_s8 = inlined_call_operand.hbm [shape: f32[2,5], index: 8, kind: output, shape index: {}]  }
   0x1   :  { %v30_v0 = vld [vmem:[%s9293_s0] sm:$0xff]  ;;  %v32_v1 = vld [vmem:[%s9293_s0 + $0x10] sm:$0x3]  ;;  %v31_v2 = vld [vmem:[%s9293_s0 + $0x8] sm:$0xff] }
   0x2   :  { %v80_v3 = vsel %vm9303_vm0, %v30_v0, 0.0  ;;  %v87_v4 = vsel %vm9302_vm1, %v32_v1, 0.0 }
   0x3   :  { %13 = vsyncpa [#allocation3], 0  ;;  %81 = vadd.xlane.f32.xlu0 %v80_v3  ;;  %88 = vadd.xlane.f32.xlu1 %v87_v4  ;;  %v83_v5 = vsel %vm9303_vm0, %v31_v2, 0.0  ;;  %v121_v21 = vld [vmem:[%s9294_s1] sm:$0xff]  ;;  %v122_v22 = vld [vmem:[%s9294_s1 + $0x8] sm:$0xff]  ;;  %v7761_v26 = vmov 0.0|0.0  }
   0x4   :  { %v7083_v23 = vpack.c.bf16 %v122_v22, %v121_v21  ;;  %v123_v24 = vld [vmem:[%s9294_s1 + $0x10] sm:$0xff]  ;;  %v124_v25 = vld [vmem:[%s9294_s1 + $0x18] sm:$0xff]  ;;  %7082 = vmatprep.subr.bf16.mxu0 %v7761_v26  ;;  %vm9305_vm2 = vmmov 0   ;;  %v7763_v27 = vmov 0.0   ;;  %7088 = vmatprep.subr.bf16.mxu1 %v7761_v26  ;;  %v5943_v46 = vld [vmem:[%s9295_s2] ss:$0 sm:$0xff] }
   0x5   :  { %6503 = vmatprep.mubr.msk.f32.mxu0 %vm9305_vm2, %v7763_v27  ;;  %v7086_v28 = vpack.c.bf16 %v124_v25, %v123_v24  ;;  %6518 = vmatprep.mubr.msk.f32.mxu1 %vm9305_vm2, %v7763_v27  ;;  %s7764_s21 = smov 96   ;;  %s7765_s22 = smov 80   ;;  %vm233_vm3 = vcmask 64512   ;;  %vm381_vm5 = vcmask 1041408  }
   0x6   :  { %7084 = vmatpush3.bf16.msra.mxu0 %v7083_v23  ;;  %s7766_s23 = smov 88   ;;  %s7767_s24 = smov 120   ;;  %vm7909_vm4 = vmpackc.low %vm233_vm3, %vm233_vm3 }
   0x7   :  { %84 = vadd.xlane.f32.xlu0 %v83_v5  ;;  %7085 = vmatprep.subr.bf16.mxu0 %v7761_v26  ;;  %s7768_s25 = smov 112   ;;  %s7769_s26 = smov 72  }
   0x8   :  { %s7770_s27 = smov 104   ;;  %s7771_s28 = smov 64  }
   0x9   :  { %s7773_s29 = smov 56   ;;  %s7774_s30 = smov 48  }
   0xa   :  { %7087 = vmatpush3.bf16.msra.mxu0 %v7086_v28  ;;  %s7775_s9 = smov 40   ;;  %s7776_s10 = smov 8  }
   0xb   :  { %7092 = vmatprep.subr.bf16.mxu0 %v7761_v26  ;;  %s7777_s19 = smov 16   ;;  %s7778_s20 = smov 24  }
  0x90   :  { %v82_v6 = vpop.xlane.xlu0 %81  ;;  %v89_v7 = vpop.xlane.xlu1 %88 }
  0x91   :  { %v91_v8 = vmul.f32 0.03125, %v82_v6  ;;  %v93_v9 = vmul.f32 0.03125, %v89_v7 }
  0x93   :  { %v94_v10 = vsub.f32 %v30_v0, %v91_v8  ;;  %v96_v11 = vsub.f32 %v32_v1, %v93_v9 }
  0x94   :  { %v85_v12 = vpop.xlane.xlu0 %84 }
  0x95   :  { %v92_v13 = vmul.f32 0.03125, %v85_v12  ;;  %v97_v14 = vmul.f32 %v94_v10, %v94_v10  ;;  %v99_v15 = vmul.f32 %v96_v11, %v96_v11 }
  0x97   :  { %v95_v16 = vsub.f32 %v31_v2, %v92_v13  ;;  %v100_v17 = vsel %vm9303_vm0, %v97_v14, 0.0  ;;  %v106_v18 = vsel %vm9302_vm1, %v99_v15, 0.0  ;;  %vm329_vm1 = vcmask 146432  }
  0x98   :  { %101 = vadd.xlane.f32.xlu1 %v100_v17 }
  0x99   :  { %v98_v19 = vmul.f32 %v95_v16, %v95_v16 }
  0x9b   :  { %v103_v20 = vsel %vm9303_vm0, %v98_v19, 0.0 }
  0x9c   :  { %107 = vadd.xlane.f32.xlu1 %v106_v18  ;;  %104 = vadd.xlane.f32.xlu0 %v103_v20 }
 0x125   :  { %v102_v29 = vpop.xlane.xlu1 %101 }
 0x126   :  { %v109_v30 = vmul.f32 0.03125, %v102_v29 }
 0x128   :  { %v112_v31 = vadd.f32 1e-05, %v109_v30 }
 0x129   :  { %v108_v32 = vpop.xlane.xlu1 %107  ;;  %v105_v33 = vpop.xlane.xlu0 %104 }
 0x12a   :  { %7532 = vrsqrt.f32 %v112_v31  ;;  %v111_v34 = vmul.f32 0.03125, %v108_v32  ;;  %v110_v35 = vmul.f32 0.03125, %v105_v33  ;;  %v33_v31 = vlaneseq }
 0x12c   :  { %v113_v36 = vadd.f32 1e-05, %v110_v35  ;;  %v114_v37 = vadd.f32 1e-05, %v111_v34  ;;  %v7972_v32 = vshrl.u32 %v33_v31, 7  ;;  %v7974_v33 = vand.u32 127, %v33_v31 }
 0x12e   :  { %7534 = vrsqrt.f32 %v113_v36  ;;  %v7977_v34 = vadd.s32 8, %v7972_v32  ;;  %vm65_vm7 = vcmp.ge.s32.totalorder %v7974_v33, 9  ;;  %vm69_vm10 = vcmp.lt.s32.totalorder %v7974_v33, 18 }
 0x12f   :  { %7536 = vrsqrt.f32 %v114_v37  ;;  %v36_v35 = vadd.s32 16, %v7972_v32  ;;  %vm52_vm11 = vcmp.lt.s32.totalorder %v7974_v33, 9  ;;  %v7772_v36 = vmov -1e+30  }
 0x130   :  { %vm57_vm6 = vcmp.ge.s32.totalorder %v7977_v34, 9  ;;  %vm43_vm8 = vcmp.lt.s32.totalorder %v7977_v34, 9  ;;  %v7988_v37 = vsel %vm52_vm11, 0.0, %v7772_v36 }
 0x131   :  { %vm67_vm9 = vmand %vm57_vm6, %vm65_vm7  ;;  %vm61_vm14 = vcmp.lt.s32.totalorder %v36_v35, 18 }
 0x132   :  { %vm54_vm12 = vmand %vm43_vm8, %vm52_vm11  ;;  %vm9306_vm8 = vcmask 195584  }
 0x133   :  { %vm71_vm13 = vmand %vm67_vm9, %vm69_vm10  ;;  %vm9310_vm9 = vcmask 261120  }
 0x134   :  { %v7533_v38 = vpop.eup %7532  ;;  %vm74_vm15 = vmor %vm54_vm12, %vm71_vm13 }
 0x135   :  { %v118_v39 = vmul.f32 %v7533_v38, %v94_v10  ;;  %vm9312_vm11 = vmmov %vm9310_vm9 }
 0x136   :  { %vm9313_vm12 = vmmov %vm9310_vm9 }
 0x137   :  { %6504 = vmatmul.mubr.msk.f32.vlgmr.msra.gmra.mrb[0].mxu0 %vm9303_vm0, %v118_v39  ;;  %vm9314_vm13 = vmmov %vm9310_vm9 }
 0x138   :  { %6506 = vmatprep.mubr.msk.f32.mxu0 %vm9305_vm2, %v7763_v27  ;;  %v7535_v40 = vpop.eup %7534 }
 0x139   :  { %v119_v41 = vmul.f32 %v7535_v40, %v95_v16  ;;  %v7537_v42 = vpop.eup %7536 }
 0x13a   :  { %v120_v43 = vmul.f32 %v7537_v42, %v96_v11 }
 0x13b   :  { %6507 = vmatmul.mubr.msk.f32.gmra.mrb[2].mxu0 %vm9303_vm0, %v119_v41  ;;  %v7994_v41 = vsel %vm74_vm15, 0.0, %v7772_v36  ;;  %vm9316_vm15 = vmmov %vm9310_vm9 }
 0x13c   :  { %6509 = vmatprep.mubr.msk.f32.mxu0 %vm9305_vm2, %v7763_v27 }
 0x13f   :  { %6510 = vmatmul.mubr.msk.f32.gmra.mrb[4].mxu0 %vm9303_vm0, %v120_v43  ;;  %vm68_vm0 = vmand %vm61_vm14, %vm65_vm7  ;;  %vm336_vm7 = vcmask 140288   ;;  %vm9315_vm14 = vcmask 254976  }
 0x140   :  { %6533 = vmatprep.mubr.msk.f32.mxu0 %vm9305_vm2, %v7763_v27  ;;  %vm72_vm6 = vmand %vm68_vm0, %vm69_vm10  ;;  %vm9307_vm0 = vcmask 130048  }
 0x141   :  { %vm9311_vm10 = vmmov %vm9310_vm9 }
 0x20a   :  { %v207_v44 = vpop.f32.mrb[0].mxu0 }
 0x20b   :  { %v6505_v45 = vpop.f32.mrb[1].mxu0  ;;  %v208_v48 = vadd.f32 %v5943_v46, %v207_v44 }
 0x20d   :  { %v221_v56 = vmul.f32 0.35355338, %v208_v48 }
 0x20e   :  { %v212_v47 = vpop.f32.mrb[2].mxu0 }
 0x20f   :  { %v213_v49 = vadd.f32 %v5943_v46, %v212_v47  ;;  %v6508_v50 = vpop.f32.mrb[3].mxu0 }
 0x211   :  { %v7873_v51 = vpack.i.bf16 %v213_v49, %v208_v48  ;;  %v222_v55 = vmul.f32 0.35355338, %v213_v49 }
 0x212   :  { %v217_v52 = vpop.f32.mrb[4].mxu0 }
 0x213   :  { %v7875_v53 = vadd.f32 %v5943_v46, %v217_v52  ;;  %7373 = vrot.lane.b32.xlu0 %v7873_v51, %s7764_s21  ;;  %v6511_v54 = vpop.f32.mrb[5].mxu0  ;;  %v8004_v46 = vsel %vm72_vm6, 0.0, %v7772_v36  ;;  %vm9317_vm6 = vmmov %vm9310_vm9 }
 0x215   :  { %231 = vrot.lane.b32.xlu1 %v7875_v53, %s7764_s21  ;;  %v223_v57 = vmul.f32 0.35355338, %v7875_v53 }
 0x217   :  { %7383 = vrot.lane.b32.xlu0 %v7873_v51, %s7765_s22 }
 0x219   :  { %7378 = vrot.lane.b32.xlu1 %v7873_v51, %s7766_s23 }
 0x21b   :  { %466 = vrot.lane.b32.xlu0 %v222_v55, %s7767_s24 }
 0x21d   :  { %474 = vrot.lane.b32.xlu1 %v7875_v53, %s7766_s23 }
 0x21f   :  { %710 = vrot.lane.b32.xlu0 %v7875_v53, %s7765_s22 }
 0x221   :  { %464 = vrot.lane.b32.xlu1 %v221_v56, %s7767_s24 }
 0x223   :  { %700 = vrot.lane.b32.xlu0 %v221_v56, %s7768_s25 }
 0x225   :  { %468 = vrot.lane.b32.xlu1 %v223_v57, %s7767_s24 }
 0x227   :  { %704 = vrot.lane.b32.xlu0 %v223_v57, %s7768_s25 }
 0x229   :  { %7388 = vrot.lane.b32.xlu1 %v7873_v51, %s7769_s26 }
 0x22b   :  { %936 = vrot.lane.b32.xlu0 %v221_v56, %s7770_s27 }
 0x22d   :  { %702 = vrot.lane.b32.xlu1 %v222_v55, %s7768_s25 }
 0x22f   :  { %940 = vrot.lane.b32.xlu0 %v223_v57, %s7770_s27 }
 0x231   :  { %946 = vrot.lane.b32.xlu1 %v7875_v53, %s7769_s26 }
 0x233   :  { %7393 = vrot.lane.b32.xlu0 %v7873_v51, %s7771_s28 }
 0x235   :  { %938 = vrot.lane.b32.xlu1 %v222_v55, %s7770_s27 }
 0x239   :  { %368 = vrot.lane.b32.xlu1 %v7875_v53, %s7771_s28 }
 0x285   :  { %v7374_v58 = vpop.permute.xlu0 %7373 }
 0x286   :  { %v7376_v59 = vunpack.i.h.bf16 %v7374_v58  ;;  %v7375_v60 = vunpack.i.l.bf16 %v7374_v58 }
 0x287   :  { %v232_v61 = vpop.permute.xlu1 %231 }
 0x288   :  { %v7089_v63 = vpack.c.bf16 %v7376_v59, %v7375_v60 }
 0x289   :  { %v7384_v0 = vpop.permute.xlu0 %7383 }
 0x28a   :  { %7091 = vmatpush3.bf16.xpose.msk.msra.mxu1 %vm7909_vm4, %v7089_v63  ;;  %v7386_v13 = vunpack.i.h.bf16 %v7384_v0  ;;  %v7385_v14 = vunpack.i.l.bf16 %v7384_v0 }
 0x28b   :  { %v7379_v1 = vpop.permute.xlu1 %7378  ;;  %6516 = vmatprep.subr.mxu1 %v7763_v27 }
 0x28c   :  { %v7381_v4 = vunpack.i.h.bf16 %v7379_v1  ;;  %v7380_v5 = vunpack.i.l.bf16 %v7379_v1  ;;  %v7103_v17 = vpack.c.bf16 %v7386_v13, %v7385_v14 }
 0x28d   :  { %v467_v2 = vpop.permute.xlu0 %466 }
 0x28e   :  { %v7096_v8 = vpack.c.bf16 %v7381_v4, %v7380_v5 }
 0x28f   :  { %v475_v3 = vpop.permute.xlu1 %474 }
 0x291   :  { %v711_v6 = vpop.permute.xlu0 %710 }
 0x292   :  { %6517 = vmatpush3.xpose.msk.msra.mxu1 %vm233_vm3, %v232_v61 }
 0x293   :  { %v465_v7 = vpop.permute.xlu1 %464  ;;  %7095 = vmatprep.subr.bf16.mxu1 %v7761_v26 }
 0x295   :  { %v701_v9 = vpop.permute.xlu0 %700  ;;  %6519 = vmatmul.mubr.msk.f32.vlgmr.msra.gmra.mrb[0].mxu1 %vm233_vm3, %v221_v56 }
 0x296   :  { %7098 = vmatpush3.bf16.xpose.msk.msra.mxu1 %vm7909_vm4, %v7096_v8  ;;  %6521 = vmatprep.mubr.msk.f32.mxu1 %vm9305_vm2, %v7763_v27 }
 0x297   :  { %v469_v10 = vpop.permute.xlu1 %468  ;;  %6546 = vmatprep.subr.mxu1 %v7763_v27 }
 0x299   :  { %6522 = vmatmul.mubr.msk.f32.gmra.mrb[2].mxu1 %vm233_vm3, %v222_v55  ;;  %v705_v11 = vpop.permute.xlu0 %704 }
 0x29a   :  { %6524 = vmatprep.mubr.msk.f32.mxu1 %vm9305_vm2, %v7763_v27 }
 0x29b   :  { %v7389_v12 = vpop.permute.xlu1 %7388 }
 0x29c   :  { %v7391_v24 = vunpack.i.h.bf16 %v7389_v12  ;;  %v7390_v25 = vunpack.i.l.bf16 %v7389_v12 }
 0x29d   :  { %v937_v15 = vpop.permute.xlu0 %936  ;;  %6525 = vmatmul.mubr.msk.f32.gmra.mrb[4].mxu1 %vm233_vm3, %v223_v57 }
 0x29e   :  { %6547 = vmatpush3.xpose.msk.msra.mxu1 %vm233_vm3, %v475_v3  ;;  %6548 = vmatprep.mubr.msk.f32.mxu1 %vm9305_vm2, %v7763_v27  ;;  %v7110_v29 = vpack.c.bf16 %v7391_v24, %v7390_v25 }
 0x29f   :  { %v703_v16 = vpop.permute.xlu1 %702  ;;  %7102 = vmatprep.subr.bf16.mxu1 %v7761_v26 }
 0x2a1   :  { %v941_v18 = vpop.permute.xlu0 %940  ;;  %6549 = vmatmul.mubr.msk.f32.vlgmr.msra.gmra.mrb[6].mxu1 %vm233_vm3, %v465_v7 }
 0x2a2   :  { %7105 = vmatpush3.bf16.xpose.msk.msra.mxu1 %vm7909_vm4, %v7103_v17  ;;  %6551 = vmatprep.mubr.msk.f32.mxu1 %vm9305_vm2, %v7763_v27 }
 0x2a3   :  { %v947_v19 = vpop.permute.xlu1 %946  ;;  %6576 = vmatprep.subr.mxu1 %v7763_v27 }
 0x2a5   :  { %v7394_v20 = vpop.permute.xlu0 %7393  ;;  %6552 = vmatmul.mubr.msk.f32.gmra.mrb[8].mxu1 %vm233_vm3, %v467_v2 }
 0x2a6   :  { %v7396_v21 = vunpack.i.h.bf16 %v7394_v20  ;;  %v7395_v22 = vunpack.i.l.bf16 %v7394_v20  ;;  %6554 = vmatprep.mubr.msk.f32.mxu1 %vm9305_vm2, %v7763_v27 }
 0x2a7   :  { %v939_v23 = vpop.permute.xlu1 %938 }
 0x2a8   :  { %v7093_v28 = vpack.c.bf16 %v7396_v21, %v7395_v22 }
 0x2a9   :  { %6555 = vmatmul.mubr.msk.f32.gmra.mrb[10].mxu1 %vm233_vm3, %v469_v10 }
 0x2aa   :  { %7094 = vmatpush3.bf16.msra.mxu0 %v7093_v28  ;;  %6577 = vmatpush3.xpose.msk.msra.mxu1 %vm233_vm3, %v711_v6 }
 0x2ab   :  { %6578 = vmatprep.mubr.msk.f32.mxu1 %vm9305_vm2, %v7763_v27  ;;  %6531 = vmatprep.subr.mxu0 %v7763_v27  ;;  %v369_v30 = vpop.permute.xlu1 %368 }
 0x2ac   :  { %7109 = vmatprep.subr.bf16.mxu1 %v7761_v26 }
 0x2ad   :  { %6579 = vmatmul.mubr.msk.f32.vlgmr.msra.gmra.mrb[12].mxu1 %vm233_vm3, %v701_v9 }
 0x2ae   :  { %6532 = vmatpush3.msk.msra.mxu0 %vm381_vm5, %v369_v30  ;;  %7112 = vmatpush3.bf16.xpose.msk.msra.mxu1 %vm7909_vm4, %v7110_v29 }
 0x2af   :  { %6581 = vmatprep.mubr.msk.f32.mxu1 %vm9305_vm2, %v7763_v27  ;;  %6606 = vmatprep.subr.mxu1 %v7763_v27 }
 0x2b0   :  { %7099 = vmatprep.subr.bf16.mxu0 %v7761_v26 }
 0x2b1   :  { %6582 = vmatmul.mubr.msk.f32.gmra.mrb[14].mxu1 %vm233_vm3, %v703_v16 }
 0x2b2   :  { %6584 = vmatprep.mubr.msk.f32.mxu1 %vm9305_vm2, %v7763_v27 }
 0x2b5   :  { %6585 = vmatmul.mubr.msk.f32.gmra.mrb[16].mxu1 %vm233_vm3, %v705_v11 }
 0x2b6   :  { %6607 = vmatpush3.xpose.msk.msra.mxu1 %vm233_vm3, %v947_v19  ;;  %6608 = vmatprep.mubr.msk.f32.mxu1 %vm9305_vm2, %v7763_v27 }
 0x2b7   :  { %7116 = vmatprep.subr.bf16.mxu1 %v7761_v26 }
 0x2b9   :  { %6609 = vmatmul.mubr.msk.f32.vlgmr.msra.gmra.mrb[18].mxu1 %vm233_vm3, %v937_v15 }
 0x2ba   :  { %6611 = vmatprep.mubr.msk.f32.mxu1 %vm9305_vm2, %v7763_v27 }
 0x2bd   :  { %6612 = vmatmul.mubr.msk.f32.gmra.mrb[20].mxu1 %vm233_vm3, %v939_v23 }
 0x2be   :  { %6614 = vmatprep.mubr.msk.f32.mxu1 %vm9305_vm2, %v7763_v27 }
 0x2c1   :  { %6615 = vmatmul.mubr.msk.f32.gmra.mrb[22].mxu1 %vm233_vm3, %v941_v18 }
 0x2c2   :  { %6640 = vmatprep.mubr.msk.f32.mxu1 %vm9305_vm2, %v7763_v27 }
 0x368   :  { %v315_v38 = vpop.f32.mrb[0].mxu1 }
 0x369   :  { %v7991_v39 = vadd.f32 %v315_v38, %v7988_v37  ;;  %v6520_v40 = vpop.f32.mrb[1].mxu1 }
 0x36b   :  { %v330_v42 = vsel %vm329_vm1, %v7991_v39, -inf }
 0x36c   :  { %v320_v43 = vpop.f32.mrb[2].mxu1  ;;  %331 = vmax.xlane.f32.xlu1 %v330_v42 }
 0x36d   :  { %v8001_v44 = vadd.f32 %v320_v43, %v7994_v41  ;;  %v6523_v45 = vpop.f32.mrb[3].mxu1 }
 0x36f   :  { %v333_v47 = vsel %vm329_vm1, %v8001_v44, -inf }
 0x370   :  { %334 = vmax.xlane.f32.xlu0 %v333_v47  ;;  %v325_v48 = vpop.f32.mrb[4].mxu1 }
 0x371   :  { %v8009_v49 = vadd.f32 %v325_v48, %v8004_v46  ;;  %v6526_v50 = vpop.f32.mrb[5].mxu1 }
 0x373   :  { %v337_v52 = vsel %vm336_vm7, %v8009_v49, -inf }
 0x374   :  { %338 = vmax.xlane.f32.xlu0 %v337_v52  ;;  %v554_v54 = vpop.f32.mrb[6].mxu1 }
 0x375   :  { %v8014_v55 = vadd.f32 %v554_v54, %v7988_v37  ;;  %v6550_v56 = vpop.f32.mrb[7].mxu1 }
 0x377   :  { %v568_v57 = vsel %vm329_vm1, %v8014_v55, -inf }
 0x378   :  { %569 = vmax.xlane.f32.xlu0 %v568_v57  ;;  %v559_v58 = vpop.f32.mrb[8].mxu1 }
 0x379   :  { %v8019_v59 = vadd.f32 %v559_v58, %v7994_v41  ;;  %v6553_v60 = vpop.f32.mrb[9].mxu1 }
 0x37b   :  { %v571_v61 = vsel %vm329_vm1, %v8019_v59, -inf }
 0x37c   :  { %572 = vmax.xlane.f32.xlu1 %v571_v61  ;;  %v564_v63 = vpop.f32.mrb[10].mxu1 }
 0x37d   :  { %v8024_v0 = vadd.f32 %v564_v63, %v8004_v46  ;;  %v6556_v1 = vpop.f32.mrb[11].mxu1 }
 0x37f   :  { %v574_v2 = vsel %vm336_vm7, %v8024_v0, -inf }
 0x380   :  { %575 = vmax.xlane.f32.xlu0 %v574_v2  ;;  %v790_v3 = vpop.f32.mrb[12].mxu1 }
 0x381   :  { %v6580_v4 = vpop.f32.mrb[13].mxu1  ;;  %v8046_v21 = vadd.f32 %v790_v3, %v7988_v37 }
 0x383   :  { %v804_v23 = vsel %vm329_vm1, %v8046_v21, -inf }
 0x384   :  { %v795_v5 = vpop.f32.mrb[14].mxu1 }
 0x385   :  { %v8029_v6 = vadd.f32 %v795_v5, %v7994_v41  ;;  %v6583_v7 = vpop.f32.mrb[15].mxu1 }
 0x387   :  { %v807_v8 = vsel %vm329_vm1, %v8029_v6, -inf }
 0x388   :  { %808 = vmax.xlane.f32.xlu0 %v807_v8  ;;  %v800_v9 = vpop.f32.mrb[16].mxu1 }
 0x389   :  { %v6586_v10 = vpop.f32.mrb[17].mxu1  ;;  %v8051_v22 = vadd.f32 %v800_v9, %v8004_v46 }
 0x38b   :  { %v810_v25 = vsel %vm336_vm7, %v8051_v22, -inf }
 0x38c   :  { %v1026_v11 = vpop.f32.mrb[18].mxu1 }
 0x38d   :  { %v8034_v12 = vadd.f32 %v1026_v11, %v7988_v37  ;;  %7398 = vrot.lane.b32.xlu1 %v7873_v51, %s7773_s29  ;;  %v6610_v13 = vpop.f32.mrb[19].mxu1 }
 0x38f   :  { %v1040_v14 = vsel %vm329_vm1, %v8034_v12, -inf }
 0x390   :  { %1041 = vmax.xlane.f32.xlu0 %v1040_v14  ;;  %v1031_v15 = vpop.f32.mrb[20].mxu1 }
 0x391   :  { %v6613_v16 = vpop.f32.mrb[21].mxu1  ;;  %v8056_v24 = vadd.f32 %v1031_v15, %v7994_v41 }
 0x393   :  { %v1043_v28 = vsel %vm329_vm1, %v8056_v24, -inf }
 0x394   :  { %v1036_v17 = vpop.f32.mrb[22].mxu1 }
 0x395   :  { %v8041_v18 = vadd.f32 %v1036_v17, %v8004_v46  ;;  %v6616_v19 = vpop.f32.mrb[23].mxu1 }
 0x397   :  { %v1046_v20 = vsel %vm336_vm7, %v8041_v18, -inf }
 0x398   :  { %1047 = vmax.xlane.f32.xlu0 %v1046_v20 }
 0x3ae   :  { %605 = vrot.lane.b32.xlu0 %v7875_v53, %s7773_s29 }
 0x3b1   :  { %805 = vmax.xlane.f32.xlu1 %v804_v23 }
 0x3b5   :  { %811 = vmax.xlane.f32.xlu1 %v810_v25 }
 0x3b9   :  { %1044 = vmax.xlane.f32.xlu1 %v1043_v28 }
 0x3ca   :  { %7403 = vrot.lane.b32.xlu1 %v7873_v51, %s7774_s30 }
 0x3f9   :  { %v332_v29 = vpop.xlane.xlu1 %331 }
 0x3fa   :  { %v340_v30 = vsub.f32 %v7991_v39, %v332_v29 }
 0x3fc   :  { %v343_v31 = vmul.f32 1.442695, %v340_v30 }
 0x3fd   :  { %v335_v35 = vpop.xlane.xlu0 %334 }
 0x3fe   :  { %7538 = vpow2.f32 %v343_v31  ;;  %v341_v38 = vsub.f32 %v8001_v44, %v335_v35 }
 0x400   :  { %v345_v40 = vmul.f32 1.442695, %v341_v38 }
 0x401   :  { %v339_v42 = vpop.xlane.xlu0 %338 }
 0x402   :  { %7540 = vpow2.f32 %v345_v40  ;;  %v342_v43 = vsub.f32 %v8009_v49, %v339_v42 }
 0x404   :  { %v347_v45 = vmul.f32 1.442695, %v342_v43 }
 0x405   :  { %v570_v47 = vpop.xlane.xlu0 %569 }
 0x406   :  { %7542 = vpow2.f32 %v347_v45  ;;  %v577_v48 = vsub.f32 %v8014_v55, %v570_v47 }
 0x408   :  { %v8068_v50 = vpop.eup %7538  ;;  %v580_v52 = vmul.f32 1.442695, %v577_v48 }
 0x409   :  { %v573_v54 = vpop.xlane.xlu1 %572  ;;  %v349_v39 = vsel %vm329_vm1, %v8068_v50, 0.0 }
 0x40a   :  { %7544 = vpow2.f32 %v580_v52  ;;  %v578_v44 = vsub.f32 %v8019_v59, %v573_v54  ;;  %350 = vadd.xlane.f32.xlu1 %v349_v39 }
 0x40c   :  { %v8073_v56 = vpop.eup %7540  ;;  %v582_v57 = vmul.f32 1.442695, %v578_v44 }
 0x40d   :  { %v576_v49 = vpop.xlane.xlu0 %575  ;;  %v352_v58 = vsel %vm329_vm1, %v8073_v56, 0.0  ;;  %v7399_v16 = vpop.permute.xlu1 %7398 }
 0x40e   :  { %7546 = vpow2.f32 %v582_v57  ;;  %v579_v55 = vsub.f32 %v8024_v0, %v576_v49  ;;  %353 = vadd.xlane.f32.xlu0 %v352_v58  ;;  %v7401_v44 = vunpack.i.h.bf16 %v7399_v16  ;;  %v7400_v57 = vunpack.i.l.bf16 %v7399_v16 }
 0x410   :  { %v8078_v60 = vpop.eup %7542  ;;  %v584_v61 = vmul.f32 1.442695, %v579_v55 }
 0x411   :  { %v355_v63 = vsel %vm336_vm7, %v8078_v60, 0.0 }
 0x412   :  { %7548 = vpow2.f32 %v584_v61  ;;  %356 = vadd.xlane.f32.xlu1 %v355_v63  ;;  %v7100_v61 = vpack.c.bf16 %v7401_v44, %v7400_v57 }
 0x414   :  { %v8082_v59 = vpop.eup %7544 }
 0x415   :  { %v809_v1 = vpop.xlane.xlu0 %808  ;;  %v586_v2 = vsel %vm329_vm1, %v8082_v59, 0.0 }
 0x416   :  { %v814_v3 = vsub.f32 %v8029_v6, %v809_v1  ;;  %587 = vadd.xlane.f32.xlu0 %v586_v2 }
 0x418   :  { %v8087_v4 = vpop.eup %7546  ;;  %v818_v0 = vmul.f32 1.442695, %v814_v3 }
 0x419   :  { %v589_v5 = vsel %vm329_vm1, %v8087_v4, 0.0 }
 0x41a   :  { %7550 = vpow2.f32 %v818_v0  ;;  %590 = vadd.xlane.f32.xlu1 %v589_v5 }
 0x41c   :  { %v8091_v7 = vpop.eup %7548 }
 0x41d   :  { %v1042_v8 = vpop.xlane.xlu0 %1041  ;;  %v592_v9 = vsel %vm336_vm7, %v8091_v7, 0.0 }
 0x41e   :  { %v1049_v10 = vsub.f32 %v8034_v12, %v1042_v8  ;;  %593 = vadd.xlane.f32.xlu1 %v592_v9 }
 0x420   :  { %v1052_v11 = vmul.f32 1.442695, %v1049_v10 }
 0x422   :  { %7552 = vpow2.f32 %v1052_v11 }
 0x424   :  { %v8096_v6 = vpop.eup %7550 }
 0x425   :  { %v825_v13 = vsel %vm329_vm1, %v8096_v6, 0.0  ;;  %v1048_v31 = vpop.xlane.xlu0 %1047 }
 0x426   :  { %826 = vadd.xlane.f32.xlu0 %v825_v13 }
 0x429   :  { %v606_v48 = vpop.permute.xlu0 %605 }
 0x42c   :  { %v8100_v14 = vpop.eup %7552 }
 0x42d   :  { %v1058_v15 = vsel %vm329_vm1, %v8100_v14, 0.0 }
 0x42e   :  { %1059 = vadd.xlane.f32.xlu0 %v1058_v15 }
 0x43e   :  { %v806_v17 = vpop.xlane.xlu1 %805 }
 0x43f   :  { %v813_v19 = vsub.f32 %v8046_v21, %v806_v17  ;;  %v1051_v21 = vsub.f32 %v8041_v18, %v1048_v31 }
 0x441   :  { %v816_v12 = vmul.f32 1.442695, %v813_v19  ;;  %v1056_v40 = vmul.f32 1.442695, %v1051_v21 }
 0x442   :  { %v812_v20 = vpop.xlane.xlu1 %811 }
 0x443   :  { %7554 = vpow2.f32 %v816_v12  ;;  %v815_v23 = vsub.f32 %v8051_v22, %v812_v20 }
 0x444   :  { %841 = vrot.lane.b32.xlu0 %v7875_v53, %s7774_s30 }
 0x445   :  { %v820_v25 = vmul.f32 1.442695, %v815_v23 }
 0x446   :  { %v1045_v28 = vpop.xlane.xlu1 %1044 }
 0x447   :  { %7556 = vpow2.f32 %v820_v25  ;;  %v1050_v29 = vsub.f32 %v8056_v24, %v1045_v28 }
 0x449   :  { %v1054_v30 = vmul.f32 1.442695, %v1050_v29 }
 0x44a   :  { %v7404_v47 = vpop.permute.xlu1 %7403 }
 0x44b   :  { %7558 = vpow2.f32 %v1054_v30  ;;  %v7406_v3 = vunpack.i.h.bf16 %v7404_v47  ;;  %v7405_v0 = vunpack.i.l.bf16 %v7404_v47 }
 0x44c   :  { %7560 = vpow2.f32 %v1056_v40 }
 0x44d   :  { %v8109_v35 = vpop.eup %7554  ;;  %v7107_v8 = vpack.c.bf16 %v7406_v3, %v7405_v0 }
 0x44e   :  { %v822_v38 = vsel %vm329_vm1, %v8109_v35, 0.0 }
 0x44f   :  { %823 = vadd.xlane.f32.xlu1 %v822_v38 }
 0x451   :  { %v8114_v22 = vpop.eup %7556 }
 0x452   :  { %v828_v42 = vsel %vm336_vm7, %v8114_v22, 0.0 }
 0x453   :  { %829 = vadd.xlane.f32.xlu1 %v828_v42 }
 0x455   :  { %v8118_v43 = vpop.eup %7558 }
 0x456   :  { %v1061_v24 = vsel %vm329_vm1, %v8118_v43, 0.0  ;;  %v8122_v45 = vpop.eup %7560 }
 0x457   :  { %1062 = vadd.xlane.f32.xlu1 %v1061_v24  ;;  %v1064_v18 = vsel %vm336_vm7, %v8122_v45, 0.0 }
 0x463   :  { %1065 = vadd.xlane.f32.xlu0 %v1064_v18 }
 0x468   :  { %7408 = vrot.lane.b32.xlu1 %v7873_v51, %s7775_s9 }
 0x46c   :  { %1077 = vrot.lane.b32.xlu1 %v7875_v53, %s7775_s9 }
 0x497   :  { %v351_v52 = vpop.xlane.xlu1 %350 }
 0x498   :  { %7562 = vrcp.f32 %v351_v52 }
 0x49b   :  { %v354_v54 = vpop.xlane.xlu0 %353 }
 0x49c   :  { %7564 = vrcp.f32 %v354_v54 }
 0x49f   :  { %v357_v39 = vpop.xlane.xlu1 %356 }
 0x4a0   :  { %7566 = vrcp.f32 %v357_v39 }
 0x4a2   :  { %v7563_v49 = vpop.eup %7562 }
 0x4a3   :  { %v361_v58 = vmul.f32 %v7563_v49, %v8068_v50  ;;  %v588_v55 = vpop.xlane.xlu0 %587 }
 0x4a4   :  { %7568 = vrcp.f32 %v588_v55  ;;  %v1220_v55 = vld [vmem:[%s9296_s3 + $0x8] sm:$0xff] }
 0x4a5   :  { %6534 = vmatmul.mubr.msk.f32.vlgmr.msra.gmra.mrb[6].mxu0 %vm329_vm1, %v361_v58  ;;  %v1219_v58 = vld [vmem:[%s9296_s3] sm:$0xff] }
 0x4a6   :  { %v7565_v51 = vpop.eup %7564  ;;  %7101 = vmatpush3.bf16.msra.mxu0 %v7100_v61  ;;  %6536 = vmatprep.mubr.msk.f32.mxu0 %vm9305_vm2, %v7763_v27  ;;  %v1221_v61 = vld [vmem:[%s9296_s3 + $0x10] sm:$0xff] }
 0x4a7   :  { %v591_v53 = vpop.xlane.xlu1 %590  ;;  %6561 = vmatprep.subr.mxu0 %v7763_v27  ;;  %v362_v63 = vmul.f32 %v7565_v51, %v8073_v56  ;;  %v7117_v51 = vpack.c.bf16 %v1220_v55, %v1219_v58 }
 0x4a8   :  { %7570 = vrcp.f32 %v591_v53  ;;  %v1222_v53 = vld [vmem:[%s9296_s3 + $0x18] sm:$0xff] }
 0x4a9   :  { %6537 = vmatmul.mubr.msk.f32.gmra.mrb[8].mxu0 %vm329_vm1, %v362_v63  ;;  %7118 = vmatpush3.bf16.msra.mxu1 %v7117_v51  ;;  %v7120_v63 = vpack.c.bf16 %v1222_v53, %v1221_v61 }
 0x4aa   :  { %v7567_v1 = vpop.eup %7566  ;;  %6562 = vmatpush3.msk.msra.mxu0 %vm381_vm5, %v606_v48  ;;  %6539 = vmatprep.mubr.msk.f32.mxu0 %vm9305_vm2, %v7763_v27 }
 0x4ab   :  { %v594_v50 = vpop.xlane.xlu1 %593  ;;  %v363_v2 = vmul.f32 %v7567_v1, %v8078_v60  ;;  %7106 = vmatprep.subr.bf16.mxu0 %v7761_v26  ;;  %7119 = vmatprep.subr.bf16.mxu1 %v7761_v26 }
 0x4ac   :  { %7572 = vrcp.f32 %v594_v50 }
 0x4ad   :  { %6540 = vmatmul.mubr.msk.f32.gmra.mrb[10].mxu0 %vm329_vm1, %v363_v2  ;;  %7121 = vmatpush3.bf16.msra.mxu1 %v7120_v63 }
 0x4ae   :  { %v7569_v56 = vpop.eup %7568  ;;  %6563 = vmatprep.mubr.msk.f32.mxu0 %vm9305_vm2, %v7763_v27  ;;  %7128 = vmatprep.subr.bf16.mxu1 %v7761_v26 }
 0x4af   :  { %v598_v5 = vmul.f32 %v7569_v56, %v8082_v59 }
 0x4b1   :  { %6564 = vmatmul.mubr.msk.f32.vlgmr.msra.gmra.mrb[12].mxu0 %vm329_vm1, %v598_v5 }
 0x4b2   :  { %v7571_v9 = vpop.eup %7570  ;;  %7108 = vmatpush3.bf16.msra.mxu0 %v7107_v8  ;;  %6566 = vmatprep.mubr.msk.f32.mxu0 %vm9305_vm2, %v7763_v27 }
 0x4b3   :  { %v599_v60 = vmul.f32 %v7571_v9, %v8087_v4  ;;  %6591 = vmatprep.subr.mxu0 %v7763_v27  ;;  %v827_v11 = vpop.xlane.xlu0 %826 }
 0x4b5   :  { %6567 = vmatmul.mubr.msk.f32.gmra.mrb[14].mxu0 %vm329_vm1, %v599_v60 }
 0x4b6   :  { %v7573_v10 = vpop.eup %7572  ;;  %6569 = vmatprep.mubr.msk.f32.mxu0 %vm9305_vm2, %v7763_v27 }
 0x4b7   :  { %v600_v59 = vmul.f32 %v7573_v10, %v8091_v7 }
 0x4b9   :  { %6570 = vmatmul.mubr.msk.f32.gmra.mrb[16].mxu0 %vm329_vm1, %v600_v59 }
 0x4ba   :  { %6593 = vmatprep.mubr.msk.f32.mxu0 %vm9305_vm2, %v7763_v27 }
 0x4bb   :  { %v1060_v13 = vpop.xlane.xlu0 %1059 }
 0x4bf   :  { %v842_v15 = vpop.permute.xlu0 %841 }
 0x4c0   :  { %6592 = vmatpush3.msk.msra.mxu0 %vm381_vm5, %v842_v15 }
 0x4c1   :  { %7113 = vmatprep.subr.bf16.mxu0 %v7761_v26 }
 0x4dc   :  { %v824_v4 = vpop.xlane.xlu1 %823 }
 0x4dd   :  { %7574 = vrcp.f32 %v824_v4 }
 0x4de   :  { %7576 = vrcp.f32 %v827_v11 }
 0x4e0   :  { %v830_v16 = vpop.xlane.xlu1 %829 }
 0x4e1   :  { %7578 = vrcp.f32 %v830_v16 }
 0x4e2   :  { %7580 = vrcp.f32 %v1060_v13 }
 0x4e4   :  { %v1063_v17 = vpop.xlane.xlu1 %1062 }
 0x4e5   :  { %7582 = vrcp.f32 %v1063_v17 }
 0x4e7   :  { %v7575_v19 = vpop.eup %7574 }
 0x4e8   :  { %v834_v7 = vmul.f32 %v7575_v19, %v8109_v35  ;;  %v7409_v12 = vpop.permute.xlu1 %7408  ;;  %v7577_v20 = vpop.eup %7576 }
 0x4e9   :  { %v7411_v23 = vunpack.i.h.bf16 %v7409_v12  ;;  %v7410_v25 = vunpack.i.l.bf16 %v7409_v12  ;;  %v835_v29 = vmul.f32 %v7577_v20, %v8096_v6 }
 0x4ea   :  { %6594 = vmatmul.mubr.msk.f32.vlgmr.msra.gmra.mrb[18].mxu0 %vm329_vm1, %v834_v7 }
 0x4eb   :  { %v7114_v28 = vpack.c.bf16 %v7411_v23, %v7410_v25  ;;  %6596 = vmatprep.mubr.msk.f32.mxu0 %vm9305_vm2, %v7763_v27  ;;  %v7579_v30 = vpop.eup %7578 }
 0x4ec   :  { %v1078_v31 = vpop.permute.xlu1 %1077  ;;  %v836_v21 = vmul.f32 %v7579_v30, %v8114_v22  ;;  %v7581_v38 = vpop.eup %7580 }
 0x4ed   :  { %7115 = vmatpush3.bf16.msra.mxu0 %v7114_v28  ;;  %v1070_v6 = vmul.f32 %v7581_v38, %v8100_v14 }
 0x4ee   :  { %6597 = vmatmul.mubr.msk.f32.gmra.mrb[20].mxu0 %vm329_vm1, %v835_v29  ;;  %6621 = vmatprep.subr.mxu0 %v7763_v27 }
 0x4ef   :  { %6599 = vmatprep.mubr.msk.f32.mxu0 %vm9305_vm2, %v7763_v27  ;;  %v7583_v40 = vpop.eup %7582 }
 0x4f0   :  { %v1066_v35 = vpop.xlane.xlu0 %1065  ;;  %v1071_v22 = vmul.f32 %v7583_v40, %v8118_v43  ;;  %v7734_v40 = vld [vmem:[%s9293_s0] sm:$0xff] }
 0x4f1   :  { %7584 = vrcp.f32 %v1066_v35  ;;  %6622 = vmatpush3.msk.msra.mxu0 %vm381_vm5, %v1078_v31 }
 0x4f2   :  { %6600 = vmatmul.mubr.msk.f32.gmra.mrb[22].mxu0 %vm329_vm1, %v836_v21  ;;  %7122 = vmatprep.subr.bf16.mxu0 %v7761_v26 }
 0x4f3   :  { %6623 = vmatprep.mubr.msk.f32.mxu0 %vm9305_vm2, %v7763_v27 }
 0x4f6   :  { %6624 = vmatmul.mubr.msk.f32.vlgmr.msra.gmra.mrb[24].mxu0 %vm329_vm1, %v1070_v6  ;;  %v5990_v6 = vld [vmem:[%s9297_s4] ss:$0 sm:$0xff] }
 0x4f7   :  { %6626 = vmatprep.mubr.msk.f32.mxu0 %vm9305_vm2, %v7763_v27 }
 0x4fa   :  { %6627 = vmatmul.mubr.msk.f32.gmra.mrb[26].mxu0 %vm329_vm1, %v1071_v22 }
 0x4fb   :  { %v7585_v42 = vpop.eup %7584  ;;  %6629 = vmatprep.mubr.msk.f32.mxu0 %vm9305_vm2, %v7763_v27 }
 0x4fc   :  { %v1072_v24 = vmul.f32 %v7585_v42, %v8122_v45 }
 0x4fe   :  { %6630 = vmatmul.mubr.msk.f32.gmra.mrb[28].mxu0 %vm329_vm1, %v1072_v24 }
 0x4ff   :  { %6657 = vmatprep.mubr.msk.f32.mxu0 %vm9305_vm2, %v7763_v27 }
 0x578   :  { %v450_v14 = vpop.f32.mrb[6].mxu0 }
 0x579   :  { %v6535_v18 = vpop.f32.mrb[7].mxu0 }
 0x57c   :  { %v455_v47 = vpop.f32.mrb[8].mxu0 }
 0x57d   :  { %v6538_v48 = vpop.f32.mrb[9].mxu0 }
 0x580   :  { %v8187_v52 = vpop.f32.mrb[10].mxu0 }
 0x581   :  { %v6541_v43 = vpop.f32.mrb[11].mxu0 }
 0x584   :  { %v686_v54 = vpop.f32.mrb[12].mxu0 }
 0x585   :  { %1175 = vrot.lane.b32.xlu1 %v686_v54, %s7776_s10  ;;  %v6565_v39 = vpop.f32.mrb[13].mxu0 }
 0x588   :  { %v691_v44 = vpop.f32.mrb[14].mxu0 }
 0x589   :  { %1177 = vrot.lane.b32.xlu1 %v691_v44, %s7776_s10  ;;  %v6568_v45 = vpop.f32.mrb[15].mxu0  ;;  %v7736_v44 = vld [vmem:[%s9293_s0 + $0x10] sm:$0x3] }
 0x58c   :  { %v696_v57 = vpop.f32.mrb[16].mxu0 }
 0x58d   :  { %v6571_v49 = vpop.f32.mrb[17].mxu0 }
 0x5bd   :  { %v922_v1 = vpop.f32.mrb[18].mxu0 }
 0x5be   :  { %1187 = vrot.lane.b32.xlu1 %v922_v1, %s7777_s19  ;;  %v6595_v50 = vpop.f32.mrb[19].mxu0 }
 0x5c1   :  { %v927_v2 = vpop.f32.mrb[20].mxu0 }
 0x5c2   :  { %v6598_v3 = vpop.f32.mrb[21].mxu0 }
 0x5c5   :  { %v932_v0 = vpop.f32.mrb[22].mxu0 }
 0x5c6   :  { %v6601_v56 = vpop.f32.mrb[23].mxu0 }
 0x5c9   :  { %v1158_v5 = vpop.f32.mrb[24].mxu0 }
 0x5ca   :  { %1199 = vrot.lane.b32.xlu1 %v1158_v5, %s7778_s20  ;;  %v6625_v8 = vpop.f32.mrb[25].mxu0 }
 0x5cd   :  { %v1163_v9 = vpop.f32.mrb[26].mxu0 }
 0x5ce   :  { %1189 = vrot.lane.b32.xlu1 %v927_v2, %s7777_s19  ;;  %1201 = vrot.lane.b32.xlu0 %v1163_v9, %s7778_s20  ;;  %v6628_v60 = vpop.f32.mrb[27].mxu0 }
 0x5d1   :  { %v1168_v10 = vpop.f32.mrb[28].mxu0 }
 0x5d2   :  { %1179 = vrot.lane.b32.xlu1 %v696_v57, %s7776_s10  ;;  %v6631_v11 = vpop.f32.mrb[29].mxu0 }
 0x5d3   :  { %v5996_v11 = vld [vmem:[%s9296_s3 + $0x28] sm:$0xff] }
 0x5d6   :  { %1191 = vrot.lane.b32.xlu1 %v932_v0, %s7777_s19 }
 0x5da   :  { %1203 = vrot.lane.b32.xlu1 %v1168_v10, %s7778_s20  ;;  %v5995_v10 = vld [vmem:[%s9296_s3 + $0x20] sm:$0xff] }
 0x5f7   :  { %v1176_v59 = vpop.permute.xlu1 %1175 }
 0x5f8   :  { %v1208_v4 = vsel %vm233_vm3, %v450_v14, %v1176_v59  ;;  %v7123_v59 = vpack.c.bf16 %v5996_v11, %v5995_v10 }
 0x5fa   :  { %7124 = vmatpush3.bf16.msra.mxu0 %v7123_v59 }
 0x5fb   :  { %v1178_v13 = vpop.permute.xlu1 %1177  ;;  %7125 = vmatprep.subr.bf16.mxu0 %v7761_v26 }
 0x5fc   :  { %v1209_v7 = vsel %vm233_vm3, %v455_v47, %v1178_v13  ;;  %v7735_v47 = vld [vmem:[%s9293_s0 + $0x8] sm:$0xff]  ;;  %v5997_v13 = vld [vmem:[%s9296_s3 + $0x30] sm:$0xff]  ;;  %s7780_s0 = smov [#allocation2]  }
 0x5fd   :  { %s5935_s11 = sshll.u32 %s7780_s0, 4  ;;  %s5936_s11 = int_to_ptr.vmem [resolvable:$true] %s5935_s11 }
 0x5fe   :  { %s7737_s12 = scalar_lea.vmem %s5936_s11, 32  ;;  %p7742_p1 = scmp.lt.s32.totalorder %s5936_s11, %s5936_s11 }
 0x5ff   :  { %p7738_p0 = scmp.ne.s32.totalorder %s5936_s11, %s7737_s12  ;;  %p7743_p2 = scmp.lt.s32.totalorder %s7737_s12, %s7737_s12 }
 0x601   :  { %p7744_p3 = por %p7743_p2, %p7742_p1 }
 0x603   :  { %p7745_p4 = pnand %p7744_p3, %p7738_p0 }
 0x630   :  { %v1188_v15 = vpop.permute.xlu1 %1187 }
 0x631   :  { %v1212_v16 = vsel %vm9307_vm0, %v1208_v4, %v1188_v15  ;;  %v5998_v15 = vld [vmem:[%s9296_s3 + $0x38] sm:$0xff] }
 0x632   :  { %v7126_v4 = vpack.c.bf16 %v5998_v15, %v5997_v13 }
 0x634   :  { %7127 = vmatpush3.bf16.msra.mxu0 %v7126_v4 }
 0x635   :  { %7134 = vmatprep.subr.bf16.mxu0 %v7761_v26 }
 0x63c   :  { %v1200_v17 = vpop.permute.xlu1 %1199 }
 0x63d   :  { %v1216_v19 = vsel %vm9306_vm8, %v1212_v16, %v1200_v17  ;;  %v6004_v16 = vld [vmem:[%s9296_s3 + $0x40] sm:$0xff]  ;;  %v6005_v17 = vld [vmem:[%s9296_s3 + $0x48] sm:$0xff] }
 0x63e   :  { %6641 = vmatmul.mubr.msk.f32.vlgmr.msra.gmra.mrb[24].mxu1 %vm9310_vm9, %v1216_v19  ;;  %vm9318_vm9 = vmmov %vm9315_vm14  ;;  %v7129_v19 = vpack.c.bf16 %v6005_v17, %v6004_v16 }
 0x63f   :  { %6643 = vmatprep.mubr.msk.f32.mxu1 %vm9305_vm2, %v7763_v27 }
 0x640   :  { %v1190_v12 = vpop.permute.xlu1 %1189  ;;  %v1202_v20 = vpop.permute.xlu0 %1201  ;;  %7130 = vmatpush3.bf16.msra.mxu1 %v7129_v19 }
 0x641   :  { %v1213_v23 = vsel %vm9307_vm0, %v1209_v7, %v1190_v12  ;;  %7131 = vmatprep.subr.bf16.mxu1 %v7761_v26 }
 0x642   :  { %v1217_v25 = vsel %vm9306_vm8, %v1213_v23, %v1202_v20 }
 0x643   :  { %6644 = vmatmul.mubr.msk.f32.gmra.mrb[26].mxu1 %vm9311_vm10, %v1217_v25  ;;  %vm9319_vm10 = vmmov %vm9317_vm6 }
 0x644   :  { %v1180_v28 = vpop.permute.xlu1 %1179  ;;  %6646 = vmatprep.mubr.msk.f32.mxu1 %vm9305_vm2, %v7763_v27 }
 0x645   :  { %v1210_v30 = vsel %vm233_vm3, %v8187_v52, %v1180_v28 }
 0x648   :  { %v1192_v29 = vpop.permute.xlu1 %1191 }
 0x649   :  { %v1214_v31 = vsel %vm9307_vm0, %v1210_v30, %v1192_v29  ;;  %v5993_v30 = vld [vmem:[%s9297_s4 + $0x1] ss:$0 sm:$0xff] }
 0x64c   :  { %v1204_v35 = vpop.permute.xlu1 %1203 }
 0x64d   :  { %v1218_v21 = vsel %vm9306_vm8, %v1214_v31, %v1204_v35 }
 0x64e   :  { %6647 = vmatmul.mubr.msk.f32.gmra.mrb[28].mxu1 %vm9312_vm11, %v1218_v21  ;;  %vm9320_vm11 = vmmov %vm9317_vm6 }
 0x64f   :  { %6674 = vmatprep.mubr.msk.f32.mxu1 %vm9305_vm2, %v7763_v27 }
 0x711   :  { %v1298_v38 = vpop.f32.mrb[24].mxu1 }
 0x712   :  { %v1312_v22 = vadd.f32 %v7734_v40, %v1298_v38  ;;  %v6642_v42 = vpop.f32.mrb[25].mxu1  ;;  %v5994_v38 = vld [vmem:[%s9297_s4 + $0x2] ss:$0 sm:$0xff] }
 0x714   :  { %v8237_v24 = vadd.f32 %v5990_v6, %v1312_v22 }
 0x716   :  { %v1303_v14 = vpop.f32.mrb[26].mxu1  ;;  %v1329_v18 = vsel %vm9313_vm12, %v8237_v24, 0.0  ;;  %vm9321_vm12 = vmmov %vm9317_vm6 }
 0x717   :  { %v1313_v48 = vadd.f32 %v7735_v47, %v1303_v14  ;;  %v6645_v52 = vpop.f32.mrb[27].mxu1  ;;  %1330 = vadd.xlane.f32.xlu1 %v1329_v18 }
 0x719   :  { %v8244_v43 = vadd.f32 %v5990_v6, %v1313_v48 }
 0x71b   :  { %v1332_v54 = vsel %vm9314_vm13, %v8244_v43, 0.0  ;;  %vm9322_vm13 = vmmov %vm9317_vm6 }
 0x71c   :  { %1333 = vadd.xlane.f32.xlu0 %v1332_v54 }
 0x721   :  { %v1308_v39 = vpop.f32.mrb[28].mxu1 }
 0x722   :  { %v1314_v45 = vadd.f32 %v7736_v44, %v1308_v39  ;;  %v6648_v57 = vpop.f32.mrb[29].mxu1  ;;  %v6006_v44 = vld [vmem:[%s9296_s3 + $0x50] sm:$0xff] }
 0x724   :  { %v8251_v49 = vadd.f32 %v5990_v6, %v1314_v45  ;;  %v6007_v45 = vld [vmem:[%s9296_s3 + $0x58] sm:$0xff] }
 0x725   :  { %v7132_v57 = vpack.c.bf16 %v6007_v45, %v6006_v44 }
 0x726   :  { %v1335_v58 = vsel %vm9315_vm14, %v8251_v49, 0.0  ;;  %vm9323_vm14 = vmmov %vm9317_vm6 }
 0x727   :  { %1336 = vadd.xlane.f32.xlu1 %v1335_v58  ;;  %7133 = vmatpush3.bf16.msra.mxu1 %v7132_v57  ;;  %v6000_v58 = vld [vmem:[%s9297_s4 + $0x3] ss:$0 sm:$0xff] }
 0x728   :  { %7140 = vmatprep.subr.bf16.mxu1 %v7761_v26 }
 0x7a4   :  { %v1331_v55 = vpop.xlane.xlu1 %1330 }
 0x7a5   :  { %v1338_v61 = vmul.f32 0.03125, %v1331_v55 }
 0x7a7   :  { %v1341_v51 = vsub.f32 %v8237_v24, %v1338_v61 }
 0x7a9   :  { %v1334_v53 = vpop.xlane.xlu0 %1333  ;;  %v1344_v63 = vmul.f32 %v1341_v51, %v1341_v51 }
 0x7aa   :  { %v1339_v1 = vmul.f32 0.03125, %v1334_v53 }
 0x7ab   :  { %v1347_v50 = vsel %vm9316_vm15, %v1344_v63, 0.0  ;;  %vm9324_vm15 = vmmov %vm9317_vm6 }
 0x7ac   :  { %v1342_v2 = vsub.f32 %v8244_v43, %v1339_v1  ;;  %1348 = vadd.xlane.f32.xlu1 %v1347_v50 }
 0x7ae   :  { %v1345_v3 = vmul.f32 %v1342_v2, %v1342_v2 }
 0x7b0   :  { %v1350_v0 = vsel %vm9317_vm6, %v1345_v3, 0.0 }
 0x7b1   :  { %1351 = vadd.xlane.f32.xlu0 %v1350_v0 }
 0x7b4   :  { %v1337_v56 = vpop.xlane.xlu1 %1336 }
 0x7b5   :  { %v1340_v5 = vmul.f32 0.03125, %v1337_v56 }
 0x7b7   :  { %v1343_v8 = vsub.f32 %v8251_v49, %v1340_v5 }
 0x7b9   :  { %v1346_v9 = vmul.f32 %v1343_v8, %v1343_v8 }
 0x7bb   :  { %v1353_v60 = vsel %vm9318_vm9, %v1346_v9, 0.0  ;;  %v6012_v9 = vld [vmem:[%s9297_s4 + $0x4] ss:$0 sm:$0xff]  ;;  %vm9325_vm9 = vmmov %vm9317_vm6 }
 0x7bc   :  { %1354 = vadd.xlane.f32.xlu1 %v1353_v60 }
 0x839   :  { %v1349_v7 = vpop.xlane.xlu1 %1348 }
 0x83a   :  { %v1356_v12 = vmul.f32 0.03125, %v1349_v7 }
 0x83c   :  { %v1359_v20 = vadd.f32 1e-05, %v1356_v12 }
 0x83e   :  { %7586 = vrsqrt.f32 %v1359_v20  ;;  %v1352_v23 = vpop.xlane.xlu0 %1351 }
 0x83f   :  { %v1357_v25 = vmul.f32 0.03125, %v1352_v23 }
 0x841   :  { %v1360_v28 = vadd.f32 1e-05, %v1357_v25 }
 0x843   :  { %7588 = vrsqrt.f32 %v1360_v28 }
 0x848   :  { %v7587_v29 = vpop.eup %7586 }
 0x849   :  { %v1365_v31 = vmul.f32 %v7587_v29, %v1341_v51  ;;  %v1355_v35 = vpop.xlane.xlu1 %1354 }
 0x84a   :  { %v1358_v21 = vmul.f32 0.03125, %v1355_v35 }
 0x84b   :  { %v1374_v6 = vmul.f32 %v5993_v30, %v1365_v31 }
 0x84c   :  { %v1361_v40 = vadd.f32 1e-05, %v1358_v21 }
 0x84d   :  { %v7589_v22 = vpop.eup %7588  ;;  %v1383_v42 = vadd.f32 %v5994_v38, %v1374_v6 }
 0x84e   :  { %7590 = vrsqrt.f32 %v1361_v40  ;;  %v1366_v14 = vmul.f32 %v7589_v22, %v1342_v2 }
 0x84f   :  { %6658 = vmatmul.mubr.msk.f32.vlgmr.msra.gmra.mrb[30].mxu0 %vm9319_vm10, %v1383_v42  ;;  %vm9326_vm10 = vcmask 254976  }
 0x850   :  { %6660 = vmatprep.mubr.msk.f32.mxu0 %vm9305_vm2, %v7763_v27  ;;  %v1375_v18 = vmul.f32 %v5993_v30, %v1366_v14  ;;  %v6013_v14 = vld [vmem:[%s9294_s1 + $0x20] sm:$0xff] }
 0x852   :  { %v1384_v47 = vadd.f32 %v5994_v38, %v1375_v18  ;;  %v6014_v18 = vld [vmem:[%s9294_s1 + $0x28] sm:$0xff] }
 0x854   :  { %6661 = vmatmul.mubr.msk.f32.gmra.mrb[32].mxu0 %vm9320_vm11, %v1384_v47  ;;  %vm9327_vm11 = vmmov %vm9317_vm6  ;;  %v7135_v47 = vpack.c.bf16 %v6014_v18, %v6013_v14 }
 0x855   :  { %6663 = vmatprep.mubr.msk.f32.mxu0 %vm9305_vm2, %v7763_v27 }
 0x856   :  { %7136 = vmatpush3.bf16.msra.mxu0 %v7135_v47 }
 0x857   :  { %7137 = vmatprep.subr.bf16.mxu0 %v7761_v26 }
 0x858   :  { %v7591_v48 = vpop.eup %7590 }
 0x859   :  { %v1367_v52 = vmul.f32 %v7591_v48, %v1343_v8  ;;  %v6015_v48 = vld [vmem:[%s9294_s1 + $0x30] sm:$0xff] }
 0x85b   :  { %v1376_v54 = vmul.f32 %v5993_v30, %v1367_v52  ;;  %v6016_v52 = vld [vmem:[%s9294_s1 + $0x38] sm:$0xff] }
 0x85d   :  { %v1385_v39 = vadd.f32 %v5994_v38, %v1376_v54  ;;  %v7138_v54 = vpack.c.bf16 %v6016_v52, %v6015_v48 }
 0x85f   :  { %6664 = vmatmul.mubr.msk.f32.gmra.mrb[34].mxu0 %vm9321_vm12, %v1385_v39  ;;  %vm9328_vm12 = vmmov %vm9317_vm6 }
 0x860   :  { %6691 = vmatprep.mubr.msk.f32.mxu0 %vm9305_vm2, %v7763_v27  ;;  %7139 = vmatpush3.bf16.msra.mxu0 %v7138_v54 }
 0x861   :  { %7144 = vmatprep.subr.bf16.mxu0 %v7761_v26 }
 0x922   :  { %v1474_v55 = vpop.f32.mrb[30].mxu0 }
 0x923   :  { %v1475_v61 = vadd.f32 %v6000_v58, %v1474_v55  ;;  %v6659_v51 = vpop.f32.mrb[31].mxu0 }
 0x925   :  { %v1488_v53 = vmax.f32 %v1475_v61, 0.0 }
 0x927   :  { %v1479_v63 = vpop.f32.mrb[32].mxu0  ;;  %6675 = vmatmul.mubr.msk.f32.vlgmr.msra.gmra.mrb[30].mxu1 %vm9322_vm13, %v1488_v53  ;;  %vm9329_vm13 = vmmov %vm9326_vm10 }
 0x928   :  { %v1480_v1 = vadd.f32 %v6000_v58, %v1479_v63  ;;  %v6662_v50 = vpop.f32.mrb[33].mxu0  ;;  %6677 = vmatprep.mubr.msk.f32.mxu1 %vm9305_vm2, %v7763_v27 }
 0x92a   :  { %v1489_v2 = vmax.f32 %v1480_v1, 0.0 }
 0x92c   :  { %6678 = vmatmul.mubr.msk.f32.gmra.mrb[32].mxu1 %vm9323_vm14, %v1489_v2  ;;  %vm9330_vm14 = vmmov %vm9317_vm6 }
 0x92d   :  { %6680 = vmatprep.mubr.msk.f32.mxu1 %vm9305_vm2, %v7763_v27 }
 0x932   :  { %v1484_v3 = vpop.f32.mrb[34].mxu0 }
 0x933   :  { %v1485_v0 = vadd.f32 %v6000_v58, %v1484_v3  ;;  %v6665_v56 = vpop.f32.mrb[35].mxu0 }
 0x935   :  { %v1490_v5 = vmax.f32 %v1485_v0, 0.0 }
 0x937   :  { %6681 = vmatmul.mubr.msk.f32.gmra.mrb[34].mxu1 %vm9324_vm15, %v1490_v5  ;;  %vm9331_vm15 = vmmov %vm9317_vm6 }
 0x938   :  { %6706 = vmatprep.mubr.msk.f32.mxu1 %vm9305_vm2, %v7763_v27 }
 0x9fa   :  { %v1571_v8 = vpop.f32.mrb[30].mxu1 }
 0x9fb   :  { %v1585_v60 = vadd.f32 %v1571_v8, %v8237_v24  ;;  %v6676_v10 = vpop.f32.mrb[31].mxu1  ;;  %v6018_v8 = vld [vmem:[%s9295_s2 + $0x1] ss:$0 sm:$0xff] }
 0x9fd   :  { %v8320_v11 = vadd.f32 %v6012_v9, %v1585_v60 }
 0x9ff   :  { %v1576_v59 = vpop.f32.mrb[32].mxu1  ;;  %v1599_v13 = vsel %vm9317_vm6, %v8320_v11, 0.0 }
 0xa00   :  { %v1586_v15 = vadd.f32 %v1576_v59, %v8244_v43  ;;  %1600 = vadd.xlane.f32.xlu0 %v1599_v13  ;;  %v6679_v4 = vpop.f32.mrb[33].mxu1 }
 0xa02   :  { %v8325_v16 = vadd.f32 %v6012_v9, %v1586_v15 }
 0xa04   :  { %v1602_v17 = vsel %vm9325_vm9, %v8325_v16, 0.0 }
 0xa05   :  { %1603 = vadd.xlane.f32.xlu1 %v1602_v17 }
 0xa0a   :  { %v1581_v19 = vpop.f32.mrb[34].mxu1 }
 0xa0b   :  { %v1587_v24 = vadd.f32 %v1581_v19, %v8251_v49  ;;  %v6682_v7 = vpop.f32.mrb[35].mxu1 }
 0xa0d   :  { %v8330_v12 = vadd.f32 %v6012_v9, %v1587_v24 }
 0xa0f   :  { %v1605_v20 = vsel %vm9326_vm10, %v8330_v12, 0.0 }
 0xa10   :  { %1606 = vadd.xlane.f32.xlu0 %v1605_v20 }
 0xa8d   :  { %v1601_v23 = vpop.xlane.xlu0 %1600 }
 0xa8e   :  { %v1608_v43 = vmul.f32 0.03125, %v1601_v23 }
 0xa90   :  { %v1611_v25 = vsub.f32 %v8320_v11, %v1608_v43 }
 0xa92   :  { %v1604_v28 = vpop.xlane.xlu1 %1603  ;;  %v1614_v29 = vmul.f32 %v1611_v25, %v1611_v25 }
 0xa93   :  { %v1609_v30 = vmul.f32 0.03125, %v1604_v28 }
 0xa94   :  { %v1617_v31 = vsel %vm9327_vm11, %v1614_v29, 0.0 }
 0xa95   :  { %v1612_v35 = vsub.f32 %v8325_v16, %v1609_v30  ;;  %1618 = vadd.xlane.f32.xlu1 %v1617_v31 }
 0xa97   :  { %v1615_v49 = vmul.f32 %v1612_v35, %v1612_v35 }
 0xa99   :  { %v1620_v21 = vsel %vm9328_vm12, %v1615_v49, 0.0  ;;  %vm9337_vm12 = vmmov %vm9329_vm13 }
 0xa9a   :  { %1621 = vadd.xlane.f32.xlu0 %v1620_v21 }
 0xa9d   :  { %v1607_v38 = vpop.xlane.xlu0 %1606 }
 0xa9e   :  { %v1610_v6 = vmul.f32 0.03125, %v1607_v38 }
 0xaa0   :  { %v1613_v40 = vsub.f32 %v8330_v12, %v1610_v6 }
 0xaa2   :  { %v1616_v22 = vmul.f32 %v1613_v40, %v1613_v40 }
 0xaa4   :  { %v1623_v42 = vsel %vm9329_vm13, %v1616_v22, 0.0 }
 0xaa5   :  { %1624 = vadd.xlane.f32.xlu1 %v1623_v42 }
 0xb22   :  { %v1619_v39 = vpop.xlane.xlu1 %1618 }
 0xb23   :  { %v1626_v44 = vmul.f32 0.03125, %v1619_v39 }
 0xb25   :  { %v1629_v45 = vadd.f32 1e-05, %v1626_v44 }
 0xb27   :  { %7592 = vrsqrt.f32 %v1629_v45  ;;  %v1622_v57 = vpop.xlane.xlu0 %1621 }
 0xb28   :  { %v1627_v58 = vmul.f32 0.03125, %v1622_v57 }
 0xb2a   :  { %v1630_v55 = vadd.f32 1e-05, %v1627_v58 }
 0xb2c   :  { %7594 = vrsqrt.f32 %v1630_v55 }
 0xb31   :  { %v7593_v61 = vpop.eup %7592 }
 0xb32   :  { %v1635_v51 = vmul.f32 %v7593_v61, %v1611_v25  ;;  %v1625_v53 = vpop.xlane.xlu1 %1624 }
 0xb33   :  { %v1628_v63 = vmul.f32 0.03125, %v1625_v53 }
 0xb34   :  { %6692 = vmatmul.mubr.msk.f32.vlgmr.msra.gmra.mrb[36].mxu0 %vm9330_vm14, %v1635_v51 }
 0xb35   :  { %v1631_v1 = vadd.f32 1e-05, %v1628_v63  ;;  %6694 = vmatprep.mubr.msk.f32.mxu0 %vm9305_vm2, %v7763_v27 }
 0xb36   :  { %v7595_v50 = vpop.eup %7594 }
 0xb37   :  { %7596 = vrsqrt.f32 %v1631_v1  ;;  %v1636_v2 = vmul.f32 %v7595_v50, %v1612_v35 }
 0xb39   :  { %6695 = vmatmul.mubr.msk.f32.gmra.mrb[38].mxu0 %vm9331_vm15, %v1636_v2  ;;  %vm9340_vm15 = vmmov %vm9337_vm12 }
 0xb3a   :  { %6697 = vmatprep.mubr.msk.f32.mxu0 %vm9305_vm2, %v7763_v27 }
 0xb41   :  { %v7597_v3 = vpop.eup %7596 }
 0xb42   :  { %v1637_v0 = vmul.f32 %v7597_v3, %v1613_v40 }
 0xb44   :  { %6698 = vmatmul.mubr.msk.f32.gmra.mrb[40].mxu0 %vm9317_vm6, %v1637_v0 }
 0xb45   :  { %6721 = vmatprep.mubr.msk.f32.mxu0 %vm9305_vm2, %v7763_v27 }
 0xc07   :  { %v1726_v56 = vpop.f32.mrb[36].mxu0 }
 0xc08   :  { %v6693_v5 = vpop.f32.mrb[37].mxu0  ;;  %v1727_v60 = vadd.f32 %v6018_v8, %v1726_v56 }
 0xc0a   :  { %v1740_v19 = vmul.f32 0.35355338, %v1727_v60 }
 0xc0c   :  { %v1731_v9 = vpop.f32.mrb[38].mxu0 }
 0xc0d   :  { %v1732_v10 = vadd.f32 %v6018_v8, %v1731_v9  ;;  %v6696_v59 = vpop.f32.mrb[39].mxu0 }
 0xc0f   :  { %v8366_v13 = vpack.i.bf16 %v1732_v10, %v1727_v60  ;;  %v1741_v7 = vmul.f32 0.35355338, %v1732_v10 }
 0xc11   :  { %7413 = vrot.lane.b32.xlu0 %v8366_v13, %s7764_s21 }
 0xc17   :  { %v1736_v15 = vpop.f32.mrb[40].mxu0 }
 0xc18   :  { %v8370_v4 = vadd.f32 %v6018_v8, %v1736_v15  ;;  %v6699_v17 = vpop.f32.mrb[41].mxu0 }
 0xc1a   :  { %1989 = vrot.lane.b32.xlu0 %v8370_v4, %s7766_s23  ;;  %1750 = vrot.lane.b32.xlu1 %v8370_v4, %s7764_s21  ;;  %v1742_v24 = vmul.f32 0.35355338, %v8370_v4 }
 0xc1e   :  { %1979 = vrot.lane.b32.xlu0 %v1740_v19, %s7767_s24  ;;  %7418 = vrot.lane.b32.xlu1 %v8366_v13, %s7766_s23 }
 0xc22   :  { %7423 = vrot.lane.b32.xlu1 %v8366_v13, %s7765_s22  ;;  %1983 = vrot.lane.b32.xlu0 %v1742_v24, %s7767_s24 }
 0xc26   :  { %1981 = vrot.lane.b32.xlu1 %v1741_v7, %s7767_s24  ;;  %7428 = vrot.lane.b32.xlu0 %v8366_v13, %s7769_s26 }
 0xc2a   :  { %2225 = vrot.lane.b32.xlu1 %v8370_v4, %s7765_s22  ;;  %2217 = vrot.lane.b32.xlu0 %v1741_v7, %s7768_s25 }
 0xc2e   :  { %2215 = vrot.lane.b32.xlu1 %v1740_v19, %s7768_s25  ;;  %2461 = vrot.lane.b32.xlu0 %v8370_v4, %s7769_s26 }
 0xc32   :  { %2219 = vrot.lane.b32.xlu1 %v1742_v24, %s7768_s25  ;;  %2453 = vrot.lane.b32.xlu0 %v1741_v7, %s7770_s27 }
 0xc36   :  { %2451 = vrot.lane.b32.xlu1 %v1740_v19, %s7770_s27 }
 0xc3a   :  { %2455 = vrot.lane.b32.xlu1 %v1742_v24, %s7770_s27 }
 0xc83   :  { %v7414_v20 = vpop.permute.xlu0 %7413 }
 0xc84   :  { %v7416_v23 = vunpack.i.h.bf16 %v7414_v20  ;;  %v7415_v43 = vunpack.i.l.bf16 %v7414_v20 }
 0xc86   :  { %v7141_v25 = vpack.c.bf16 %v7416_v23, %v7415_v43 }
 0xc88   :  { %7143 = vmatpush3.bf16.xpose.msk.msra.mxu1 %vm7909_vm4, %v7141_v25 }
 0xc89   :  { %6704 = vmatprep.subr.mxu1 %v7763_v27 }
 0xc8c   :  { %v1751_v28 = vpop.permute.xlu1 %1750  ;;  %v1990_v35 = vpop.permute.xlu0 %1989 }
 0xc90   :  { %6705 = vmatpush3.xpose.msk.msra.mxu1 %vm233_vm3, %v1751_v28  ;;  %v7419_v29 = vpop.permute.xlu1 %7418  ;;  %v1980_v21 = vpop.permute.xlu0 %1979 }
 0xc91   :  { %v7421_v30 = vunpack.i.h.bf16 %v7419_v29  ;;  %v7420_v31 = vunpack.i.l.bf16 %v7419_v29  ;;  %7147 = vmatprep.subr.bf16.mxu1 %v7761_v26 }
 0xc93   :  { %v7148_v49 = vpack.c.bf16 %v7421_v30, %v7420_v31  ;;  %6707 = vmatmul.mubr.msk.f32.vlgmr.msra.gmra.mrb[36].mxu1 %vm233_vm3, %v1740_v19 }
 0xc94   :  { %6709 = vmatprep.mubr.msk.f32.mxu1 %vm9305_vm2, %v7763_v27  ;;  %v7424_v38 = vpop.permute.xlu1 %7423  ;;  %v1984_v22 = vpop.permute.xlu0 %1983 }
 0xc95   :  { %7150 = vmatpush3.bf16.xpose.msk.msra.mxu1 %vm7909_vm4, %v7148_v49  ;;  %v7426_v6 = vunpack.i.h.bf16 %v7424_v38  ;;  %v7425_v40 = vunpack.i.l.bf16 %v7424_v38 }
 0xc96   :  { %6734 = vmatprep.subr.mxu1 %v7763_v27 }
 0xc97   :  { %6710 = vmatmul.mubr.msk.f32.gmra.mrb[38].mxu1 %vm233_vm3, %v1741_v7  ;;  %v7155_v42 = vpack.c.bf16 %v7426_v6, %v7425_v40 }
 0xc98   :  { %6712 = vmatprep.mubr.msk.f32.mxu1 %vm9305_vm2, %v7763_v27  ;;  %v1982_v14 = vpop.permute.xlu1 %1981  ;;  %v7429_v18 = vpop.permute.xlu0 %7428 }
 0xc99   :  { %v7431_v48 = vunpack.i.h.bf16 %v7429_v18  ;;  %v7430_v52 = vunpack.i.l.bf16 %v7429_v18 }
 0xc9b   :  { %6713 = vmatmul.mubr.msk.f32.gmra.mrb[40].mxu1 %vm233_vm3, %v1742_v24  ;;  %v7162_v54 = vpack.c.bf16 %v7431_v48, %v7430_v52 }
 0xc9c   :  { %6736 = vmatprep.mubr.msk.f32.mxu1 %vm9305_vm2, %v7763_v27  ;;  %v2226_v47 = vpop.permute.xlu1 %2225  ;;  %v2218_v44 = vpop.permute.xlu0 %2217 }
 0xc9d   :  { %6735 = vmatpush3.xpose.msk.msra.mxu1 %vm233_vm3, %v1990_v35 }
 0xc9e   :  { %7154 = vmatprep.subr.bf16.mxu1 %v7761_v26 }
 0xca0   :  { %6737 = vmatmul.mubr.msk.f32.vlgmr.msra.gmra.mrb[42].mxu1 %vm233_vm3, %v1980_v21  ;;  %v2216_v39 = vpop.permute.xlu1 %2215  ;;  %v2462_v57 = vpop.permute.xlu0 %2461 }
 0xca1   :  { %7157 = vmatpush3.bf16.xpose.msk.msra.mxu1 %vm7909_vm4, %v7155_v42  ;;  %6739 = vmatprep.mubr.msk.f32.mxu1 %vm9305_vm2, %v7763_v27 }
 0xca2   :  { %6764 = vmatprep.subr.mxu1 %v7763_v27 }
 0xca4   :  { %6740 = vmatmul.mubr.msk.f32.gmra.mrb[44].mxu1 %vm233_vm3, %v1982_v14  ;;  %v2220_v45 = vpop.permute.xlu1 %2219  ;;  %v2454_v55 = vpop.permute.xlu0 %2453 }
 0xca5   :  { %6742 = vmatprep.mubr.msk.f32.mxu1 %vm9305_vm2, %v7763_v27 }
 0xca8   :  { %6743 = vmatmul.mubr.msk.f32.gmra.mrb[46].mxu1 %vm233_vm3, %v1984_v22  ;;  %v2452_v58 = vpop.permute.xlu1 %2451 }
 0xca9   :  { %6765 = vmatpush3.xpose.msk.msra.mxu1 %vm233_vm3, %v2226_v47  ;;  %6766 = vmatprep.mubr.msk.f32.mxu1 %vm9305_vm2, %v7763_v27 }
 0xcaa   :  { %7161 = vmatprep.subr.bf16.mxu1 %v7761_v26 }
 0xcac   :  { %6767 = vmatmul.mubr.msk.f32.vlgmr.msra.gmra.mrb[48].mxu1 %vm233_vm3, %v2216_v39  ;;  %v2456_v61 = vpop.permute.xlu1 %2455 }
 0xcad   :  { %7164 = vmatpush3.bf16.xpose.msk.msra.mxu1 %vm7909_vm4, %v7162_v54  ;;  %6769 = vmatprep.mubr.msk.f32.mxu1 %vm9305_vm2, %v7763_v27 }
 0xcae   :  { %6794 = vmatprep.subr.mxu1 %v7763_v27 }
 0xcb0   :  { %6770 = vmatmul.mubr.msk.f32.gmra.mrb[50].mxu1 %vm233_vm3, %v2218_v44 }
 0xcb1   :  { %6772 = vmatprep.mubr.msk.f32.mxu1 %vm9305_vm2, %v7763_v27 }
 0xcb4   :  { %6773 = vmatmul.mubr.msk.f32.gmra.mrb[52].mxu1 %vm233_vm3, %v2220_v45 }
 0xcb5   :  { %6795 = vmatpush3.xpose.msk.msra.mxu1 %vm233_vm3, %v2462_v57  ;;  %6796 = vmatprep.mubr.msk.f32.mxu1 %vm9305_vm2, %v7763_v27 }
 0xcb6   :  { %7168 = vmatprep.subr.bf16.mxu1 %v7761_v26 }
 0xcb8   :  { %6797 = vmatmul.mubr.msk.f32.vlgmr.msra.gmra.mrb[54].mxu1 %vm233_vm3, %v2452_v58 }
 0xcb9   :  { %6799 = vmatprep.mubr.msk.f32.mxu1 %vm9305_vm2, %v7763_v27 }
 0xcbc   :  { %6800 = vmatmul.mubr.msk.f32.gmra.mrb[56].mxu1 %vm233_vm3, %v2454_v55 }
 0xcbd   :  { %6802 = vmatprep.mubr.msk.f32.mxu1 %vm9305_vm2, %v7763_v27 }
 0xcc0   :  { %6803 = vmatmul.mubr.msk.f32.gmra.mrb[58].mxu1 %vm233_vm3, %v2456_v61 }
 0xcc1   :  { %6828 = vmatprep.mubr.msk.f32.mxu1 %vm9305_vm2, %v7763_v27 }
 0xd66   :  { %v1833_v51 = vpop.f32.mrb[36].mxu1 }
 0xd67   :  { %v8453_v53 = vadd.f32 %v1833_v51, %v7988_v37  ;;  %v6708_v63 = vpop.f32.mrb[37].mxu1 }
 0xd69   :  { %v1847_v1 = vsel %vm329_vm1, %v8453_v53, -inf }
 0xd6a   :  { %v1838_v50 = vpop.f32.mrb[38].mxu1  ;;  %1848 = vmax.xlane.f32.xlu0 %v1847_v1 }
 0xd6b   :  { %v8458_v2 = vadd.f32 %v1838_v50, %v7994_v41  ;;  %v6711_v3 = vpop.f32.mrb[39].mxu1 }
 0xd6d   :  { %v1850_v0 = vsel %vm329_vm1, %v8458_v2, -inf }
 0xd6e   :  { %1851 = vmax.xlane.f32.xlu1 %v1850_v0  ;;  %v1843_v56 = vpop.f32.mrb[40].mxu1 }
 0xd6f   :  { %v1844_v5 = vadd.f32 %v1843_v56, %v8004_v46  ;;  %v6714_v8 = vpop.f32.mrb[41].mxu1 }
 0xd71   :  { %v1853_v9 = vsel %vm336_vm7, %v1844_v5, -inf }
 0xd72   :  { %1854 = vmax.xlane.f32.xlu0 %v1853_v9 }
 0xd73   :  { %v2069_v60 = vpop.f32.mrb[42].mxu1 }
 0xd74   :  { %v2070_v10 = vadd.f32 %v2069_v60, %v7988_v37  ;;  %v6738_v59 = vpop.f32.mrb[43].mxu1 }
 0xd76   :  { %v2083_v15 = vsel %vm329_vm1, %v2070_v10, -inf }
 0xd77   :  { %2084 = vmax.xlane.f32.xlu0 %v2083_v15  ;;  %v2074_v17 = vpop.f32.mrb[44].mxu1 }
 0xd78   :  { %v8467_v19 = vadd.f32 %v2074_v17, %v7994_v41  ;;  %v6741_v24 = vpop.f32.mrb[45].mxu1 }
 0xd7a   :  { %v2086_v7 = vsel %vm329_vm1, %v8467_v19, -inf }
 0xd7b   :  { %2087 = vmax.xlane.f32.xlu1 %v2086_v7  ;;  %v2079_v20 = vpop.f32.mrb[46].mxu1 }
 0xd7c   :  { %v8472_v23 = vadd.f32 %v2079_v20, %v8004_v46  ;;  %v6744_v43 = vpop.f32.mrb[47].mxu1 }
 0xd7e   :  { %v2089_v25 = vsel %vm336_vm7, %v8472_v23, -inf }
 0xd7f   :  { %2090 = vmax.xlane.f32.xlu0 %v2089_v25  ;;  %v2305_v28 = vpop.f32.mrb[48].mxu1 }
 0xd80   :  { %v8477_v29 = vadd.f32 %v2305_v28, %v7988_v37  ;;  %v6768_v30 = vpop.f32.mrb[49].mxu1 }
 0xd82   :  { %v2319_v31 = vsel %vm329_vm1, %v8477_v29, -inf }
 0xd83   :  { %2320 = vmax.xlane.f32.xlu1 %v2319_v31  ;;  %v2310_v35 = vpop.f32.mrb[50].mxu1 }
 0xd84   :  { %v8482_v49 = vadd.f32 %v2310_v35, %v7994_v41  ;;  %v6771_v21 = vpop.f32.mrb[51].mxu1 }
 0xd86   :  { %v2322_v38 = vsel %vm329_vm1, %v8482_v49, -inf }
 0xd87   :  { %2323 = vmax.xlane.f32.xlu0 %v2322_v38  ;;  %v2315_v6 = vpop.f32.mrb[52].mxu1 }
 0xd88   :  { %v8487_v40 = vadd.f32 %v2315_v6, %v8004_v46  ;;  %v6774_v22 = vpop.f32.mrb[53].mxu1 }
 0xd8a   :  { %v2325_v42 = vsel %vm336_vm7, %v8487_v40, -inf }
 0xd8b   :  { %2326 = vmax.xlane.f32.xlu1 %v2325_v42  ;;  %v2541_v14 = vpop.f32.mrb[54].mxu1 }
 0xd8c   :  { %v8492_v18 = vadd.f32 %v2541_v14, %v7988_v37  ;;  %v6798_v47 = vpop.f32.mrb[55].mxu1 }
 0xd8e   :  { %v2555_v48 = vsel %vm329_vm1, %v8492_v18, -inf }
 0xd8f   :  { %2556 = vmax.xlane.f32.xlu0 %v2555_v48  ;;  %v2546_v52 = vpop.f32.mrb[56].mxu1 }
 0xd90   :  { %v8497_v54 = vadd.f32 %v2546_v52, %v7994_v41  ;;  %v6801_v39 = vpop.f32.mrb[57].mxu1 }
 0xd92   :  { %v2558_v44 = vsel %vm329_vm1, %v8497_v54, -inf }
 0xd93   :  { %2559 = vmax.xlane.f32.xlu1 %v2558_v44  ;;  %v2551_v45 = vpop.f32.mrb[58].mxu1 }
 0xd94   :  { %v8502_v57 = vadd.f32 %v2551_v45, %v8004_v46  ;;  %v6804_v37 = vpop.f32.mrb[59].mxu1 }
 0xd96   :  { %v2561_v58 = vsel %vm336_vm7, %v8502_v57, -inf }
 0xd97   :  { %2562 = vmax.xlane.f32.xlu0 %v2561_v58 }
 0xda4   :  { %1884 = vrot.lane.b32.xlu1 %v8370_v4, %s7771_s28 }
 0xda8   :  { %7438 = vrot.lane.b32.xlu1 %v8366_v13, %s7773_s29 }
 0xdad   :  { %7433 = vrot.lane.b32.xlu0 %v8366_v13, %s7771_s28 }
 0xdf7   :  { %v1849_v41 = vpop.xlane.xlu0 %1848 }
 0xdf8   :  { %v1856_v55 = vsub.f32 %v8453_v53, %v1849_v41 }
 0xdfa   :  { %v1859_v61 = vmul.f32 1.442695, %v1856_v55 }
 0xdfb   :  { %v1852_v46 = vpop.xlane.xlu1 %1851 }
 0xdfc   :  { %7598 = vpow2.f32 %v1859_v61  ;;  %v1857_v51 = vsub.f32 %v8458_v2, %v1852_v46 }
 0xdfe   :  { %v1861_v63 = vmul.f32 1.442695, %v1857_v51 }
 0xdff   :  { %v1855_v1 = vpop.xlane.xlu0 %1854 }
 0xe00   :  { %7600 = vpow2.f32 %v1861_v63  ;;  %v1858_v50 = vsub.f32 %v1844_v5, %v1855_v1 }
 0xe02   :  { %v1863_v3 = vmul.f32 1.442695, %v1858_v50 }
 0xe04   :  { %7602 = vpow2.f32 %v1863_v3  ;;  %v2085_v0 = vpop.xlane.xlu0 %2084 }
 0xe05   :  { %v2092_v56 = vsub.f32 %v2070_v10, %v2085_v0 }
 0xe06   :  { %v8514_v8 = vpop.eup %7598 }
 0xe07   :  { %v2095_v9 = vmul.f32 1.442695, %v2092_v56  ;;  %v1865_v60 = vsel %vm329_vm1, %v8514_v8, 0.0 }
 0xe08   :  { %v2088_v53 = vpop.xlane.xlu1 %2087  ;;  %1866 = vadd.xlane.f32.xlu1 %v1865_v60 }
 0xe09   :  { %7604 = vpow2.f32 %v2095_v9  ;;  %v2093_v59 = vsub.f32 %v8467_v19, %v2088_v53 }
 0xe0a   :  { %v8519_v2 = vpop.eup %7600 }
 0xe0b   :  { %v2097_v15 = vmul.f32 1.442695, %v2093_v59  ;;  %v1868_v5 = vsel %vm329_vm1, %v8519_v2, 0.0 }
 0xe0c   :  { %v2091_v17 = vpop.xlane.xlu0 %2090  ;;  %1869 = vadd.xlane.f32.xlu0 %v1868_v5 }
 0xe0d   :  { %7606 = vpow2.f32 %v2097_v15  ;;  %v2094_v10 = vsub.f32 %v8472_v23, %v2091_v17 }
 0xe0e   :  { %v8524_v24 = vpop.eup %7602 }
 0xe0f   :  { %v2099_v7 = vmul.f32 1.442695, %v2094_v10  ;;  %v1871_v20 = vsel %vm336_vm7, %v8524_v24, 0.0 }
 0xe10   :  { %v2321_v43 = vpop.xlane.xlu1 %2320  ;;  %1872 = vadd.xlane.f32.xlu1 %v1871_v20 }
 0xe11   :  { %7608 = vpow2.f32 %v2099_v7  ;;  %v2328_v19 = vsub.f32 %v8477_v29, %v2321_v43 }
 0xe13   :  { %v8529_v25 = vpop.eup %7604  ;;  %v2331_v28 = vmul.f32 1.442695, %v2328_v19 }
 0xe14   :  { %v2324_v30 = vpop.xlane.xlu0 %2323  ;;  %v2101_v31 = vsel %vm329_vm1, %v8529_v25, 0.0 }
 0xe15   :  { %7610 = vpow2.f32 %v2331_v28  ;;  %v2329_v23 = vsub.f32 %v8482_v49, %v2324_v30  ;;  %2102 = vadd.xlane.f32.xlu0 %v2101_v31 }
 0xe17   :  { %v8534_v35 = vpop.eup %7606  ;;  %v2333_v21 = vmul.f32 1.442695, %v2329_v23 }
 0xe18   :  { %v2327_v38 = vpop.xlane.xlu1 %2326  ;;  %v2104_v6 = vsel %vm329_vm1, %v8534_v35, 0.0 }
 0xe19   :  { %7612 = vpow2.f32 %v2333_v21  ;;  %v2330_v29 = vsub.f32 %v8487_v40, %v2327_v38  ;;  %2105 = vadd.xlane.f32.xlu1 %v2104_v6 }
 0xe1b   :  { %v8539_v22 = vpop.eup %7608  ;;  %v2335_v42 = vmul.f32 1.442695, %v2330_v29 }
 0xe1c   :  { %v2557_v14 = vpop.xlane.xlu0 %2556  ;;  %v2107_v47 = vsel %vm336_vm7, %v8539_v22, 0.0 }
 0xe1d   :  { %7614 = vpow2.f32 %v2335_v42  ;;  %v2564_v49 = vsub.f32 %v8492_v18, %v2557_v14  ;;  %2108 = vadd.xlane.f32.xlu1 %v2107_v47 }
 0xe1f   :  { %v8544_v48 = vpop.eup %7610  ;;  %v2567_v52 = vmul.f32 1.442695, %v2564_v49 }
 0xe20   :  { %v2337_v39 = vsel %vm329_vm1, %v8544_v48, 0.0  ;;  %v2560_v46 = vpop.xlane.xlu1 %2559 }
 0xe21   :  { %7616 = vpow2.f32 %v2567_v52  ;;  %2338 = vadd.xlane.f32.xlu1 %v2337_v39  ;;  %v2565_v50 = vsub.f32 %v8497_v54, %v2560_v46 }
 0xe23   :  { %v8548_v40 = vpop.eup %7612  ;;  %v2569_v3 = vmul.f32 1.442695, %v2565_v50 }
 0xe24   :  { %v2563_v44 = vpop.xlane.xlu0 %2562  ;;  %v2340_v45 = vsel %vm329_vm1, %v8548_v40, 0.0  ;;  %v1885_v1 = vpop.permute.xlu1 %1884 }
 0xe25   :  { %2341 = vadd.xlane.f32.xlu0 %v2340_v45  ;;  %v2566_v0 = vsub.f32 %v8502_v57, %v2563_v44  ;;  %7618 = vpow2.f32 %v2569_v3 }
 0xe27   :  { %v8552_v37 = vpop.eup %7614  ;;  %v2571_v56 = vmul.f32 1.442695, %v2566_v0 }
 0xe28   :  { %v7434_v58 = vpop.permute.xlu0 %7433  ;;  %v2343_v18 = vsel %vm336_vm7, %v8552_v37, 0.0  ;;  %v7439_v54 = vpop.permute.xlu1 %7438 }
 0xe29   :  { %v7436_v41 = vunpack.i.h.bf16 %v7434_v58  ;;  %2344 = vadd.xlane.f32.xlu1 %v2343_v18  ;;  %v7435_v55 = vunpack.i.l.bf16 %v7434_v58  ;;  %7620 = vpow2.f32 %v2571_v56  ;;  %v7441_v17 = vunpack.i.h.bf16 %v7439_v54 }
 0xe2a   :  { %v7440_v10 = vunpack.i.l.bf16 %v7439_v54 }
 0xe2b   :  { %v8556_v61 = vpop.eup %7616  ;;  %v7145_v51 = vpack.c.bf16 %v7436_v41, %v7435_v55 }
 0xe2c   :  { %v2573_v63 = vsel %vm329_vm1, %v8556_v61, 0.0  ;;  %v7152_v43 = vpack.c.bf16 %v7441_v17, %v7440_v10 }
 0xe2d   :  { %2574 = vadd.xlane.f32.xlu0 %v2573_v63  ;;  %7146 = vmatpush3.bf16.msra.mxu0 %v7145_v51 }
 0xe2e   :  { %6719 = vmatprep.subr.mxu0 %v7763_v27 }
 0xe2f   :  { %v8569_v9 = vpop.eup %7618 }
 0xe30   :  { %v2576_v60 = vsel %vm329_vm1, %v8569_v9, 0.0 }
 0xe31   :  { %6720 = vmatpush3.msk.msra.mxu0 %vm381_vm5, %v1885_v1 }
 0xe32   :  { %7151 = vmatprep.subr.bf16.mxu0 %v7761_v26 }
 0xe33   :  { %v8573_v53 = vpop.eup %7620 }
 0xe34   :  { %v2579_v59 = vsel %vm336_vm7, %v8573_v53, 0.0 }
 0xe3a   :  { %7443 = vrot.lane.b32.xlu1 %v8366_v13, %s7774_s30 }
 0xe43   :  { %2120 = vrot.lane.b32.xlu0 %v8370_v4, %s7773_s29 }
 0xe5e   :  { %2577 = vadd.xlane.f32.xlu1 %v2576_v60 }
 0xe62   :  { %2580 = vadd.xlane.f32.xlu0 %v2579_v59 }
 0xe6f   :  { %2356 = vrot.lane.b32.xlu1 %v8370_v4, %s7774_s30 }
 0xe73   :  { %7448 = vrot.lane.b32.xlu1 %v8366_v13, %s7775_s9 }
 0xe77   :  { %2592 = vrot.lane.b32.xlu1 %v8370_v4, %s7775_s9 }
 0xe95   :  { %v1867_v57 = vpop.xlane.xlu1 %1866 }
 0xe96   :  { %7622 = vrcp.f32 %v1867_v57 }
 0xe99   :  { %v1870_v15 = vpop.xlane.xlu0 %1869 }
 0xe9a   :  { %7624 = vrcp.f32 %v1870_v15 }
 0xe9d   :  { %v1873_v5 = vpop.xlane.xlu1 %1872 }
 0xe9e   :  { %7626 = vrcp.f32 %v1873_v5 }
 0xea0   :  { %v7623_v7 = vpop.eup %7622 }
 0xea1   :  { %v1877_v20 = vmul.f32 %v7623_v7, %v8514_v8 }
 0xea2   :  { %v2103_v31 = vpop.xlane.xlu0 %2102 }
 0xea3   :  { %6722 = vmatmul.mubr.msk.f32.vlgmr.msra.gmra.mrb[42].mxu0 %vm329_vm1, %v1877_v20  ;;  %7628 = vrcp.f32 %v2103_v31 }
 0xea4   :  { %v7625_v19 = vpop.eup %7624  ;;  %7153 = vmatpush3.bf16.msra.mxu0 %v7152_v43  ;;  %6724 = vmatprep.mubr.msk.f32.mxu0 %vm9305_vm2, %v7763_v27 }
 0xea5   :  { %v1878_v13 = vmul.f32 %v7625_v19, %v8519_v2  ;;  %6749 = vmatprep.subr.mxu0 %v7763_v27  ;;  %v6062_v19 = vld [vmem:[%s9296_s3 + $0x60] sm:$0xff] }
 0xea6   :  { %v2106_v4 = vpop.xlane.xlu1 %2105 }
 0xea7   :  { %6725 = vmatmul.mubr.msk.f32.gmra.mrb[44].mxu0 %vm329_vm1, %v1878_v13  ;;  %7630 = vrcp.f32 %v2106_v4  ;;  %v6063_v13 = vld [vmem:[%s9296_s3 + $0x68] sm:$0xff]  ;;  %v6064_v4 = vld [vmem:[%s9296_s3 + $0x70] sm:$0xff] }
 0xea8   :  { %v7627_v28 = vpop.eup %7626  ;;  %6727 = vmatprep.mubr.msk.f32.mxu0 %vm9305_vm2, %v7763_v27 }
 0xea9   :  { %v1879_v8 = vmul.f32 %v7627_v28, %v8524_v24  ;;  %v7169_v28 = vpack.c.bf16 %v6063_v13, %v6062_v19 }
 0xeaa   :  { %v2109_v30 = vpop.xlane.xlu1 %2108 }
 0xeab   :  { %6728 = vmatmul.mubr.msk.f32.gmra.mrb[46].mxu0 %vm329_vm1, %v1879_v8  ;;  %7632 = vrcp.f32 %v2109_v30  ;;  %v6065_v8 = vld [vmem:[%s9296_s3 + $0x78] sm:$0xff]  ;;  %7170 = vmatpush3.bf16.msra.mxu1 %v7169_v28 }
 0xeac   :  { %6751 = vmatprep.mubr.msk.f32.mxu0 %vm9305_vm2, %v7763_v27  ;;  %v7172_v30 = vpack.c.bf16 %v6065_v8, %v6064_v4  ;;  %7171 = vmatprep.subr.bf16.mxu1 %v7761_v26 }
 0xead   :  { %v7629_v29 = vpop.eup %7628 }
 0xeae   :  { %v2339_v2 = vpop.xlane.xlu1 %2338  ;;  %v2113_v24 = vmul.f32 %v7629_v29, %v8529_v25 }
 0xeaf   :  { %7634 = vrcp.f32 %v2339_v2  ;;  %7173 = vmatpush3.bf16.msra.mxu1 %v7172_v30 }
 0xeb0   :  { %7180 = vmatprep.subr.bf16.mxu1 %v7761_v26 }
 0xeb1   :  { %v7631_v49 = vpop.eup %7630 }
 0xeb2   :  { %v2342_v23 = vpop.xlane.xlu0 %2341  ;;  %v2114_v39 = vmul.f32 %v7631_v49, %v8534_v35 }
 0xeb3   :  { %7636 = vrcp.f32 %v2342_v23 }
 0xeb5   :  { %v7633_v44 = vpop.eup %7632 }
 0xeb6   :  { %v2345_v21 = vpop.xlane.xlu1 %2344  ;;  %v2115_v25 = vmul.f32 %v7633_v44, %v8539_v22 }
 0xeb7   :  { %7638 = vrcp.f32 %v2345_v21 }
 0xeb9   :  { %v7635_v35 = vpop.eup %7634 }
 0xeba   :  { %v7444_v38 = vpop.permute.xlu1 %7443  ;;  %v2575_v6 = vpop.xlane.xlu0 %2574  ;;  %v2349_v58 = vmul.f32 %v7635_v35, %v8544_v48 }
 0xebb   :  { %v7446_v42 = vunpack.i.h.bf16 %v7444_v38  ;;  %v7445_v14 = vunpack.i.l.bf16 %v7444_v38  ;;  %7640 = vrcp.f32 %v2575_v6 }
 0xebd   :  { %v7159_v52 = vpack.c.bf16 %v7446_v42, %v7445_v14  ;;  %v7637_v41 = vpop.eup %7636 }
 0xebe   :  { %v2121_v47 = vpop.permute.xlu0 %2120  ;;  %v2350_v46 = vmul.f32 %v7637_v41, %v8548_v40 }
 0xebf   :  { %6750 = vmatpush3.msk.msra.mxu0 %vm381_vm5, %v2121_v47 }
 0xec0   :  { %6752 = vmatmul.mubr.msk.f32.vlgmr.msra.gmra.mrb[48].mxu0 %vm329_vm1, %v2113_v24  ;;  %7158 = vmatprep.subr.bf16.mxu0 %v7761_v26 }
 0xec1   :  { %7160 = vmatpush3.bf16.msra.mxu0 %v7159_v52  ;;  %6754 = vmatprep.mubr.msk.f32.mxu0 %vm9305_vm2, %v7763_v27  ;;  %v7639_v51 = vpop.eup %7638 }
 0xec2   :  { %6779 = vmatprep.subr.mxu0 %v7763_v27  ;;  %v2351_v50 = vmul.f32 %v7639_v51, %v8552_v37 }
 0xec4   :  { %6755 = vmatmul.mubr.msk.f32.gmra.mrb[50].mxu0 %vm329_vm1, %v2114_v39 }
 0xec5   :  { %6757 = vmatprep.mubr.msk.f32.mxu0 %vm9305_vm2, %v7763_v27  ;;  %v7641_v3 = vpop.eup %7640 }
 0xec6   :  { %v2585_v40 = vmul.f32 %v7641_v3, %v8556_v61 }
 0xec8   :  { %6758 = vmatmul.mubr.msk.f32.gmra.mrb[52].mxu0 %vm329_vm1, %v2115_v25 }
 0xec9   :  { %6781 = vmatprep.mubr.msk.f32.mxu0 %vm9305_vm2, %v7763_v27 }
 0xeeb   :  { %v2578_v45 = vpop.xlane.xlu1 %2577 }
 0xeec   :  { %7642 = vrcp.f32 %v2578_v45 }
 0xeef   :  { %v2357_v18 = vpop.permute.xlu1 %2356  ;;  %v2581_v22 = vpop.xlane.xlu0 %2580 }
 0xef0   :  { %6780 = vmatpush3.msk.msra.mxu0 %vm381_vm5, %v2357_v18  ;;  %7644 = vrcp.f32 %v2581_v22 }
 0xef1   :  { %6782 = vmatmul.mubr.msk.f32.vlgmr.msra.gmra.mrb[54].mxu0 %vm329_vm1, %v2349_v58  ;;  %7165 = vmatprep.subr.bf16.mxu0 %v7761_v26 }
 0xef2   :  { %6784 = vmatprep.mubr.msk.f32.mxu0 %vm9305_vm2, %v7763_v27 }
 0xef3   :  { %v7449_v55 = vpop.permute.xlu1 %7448 }
 0xef4   :  { %v7451_v63 = vunpack.i.h.bf16 %v7449_v55  ;;  %v7450_v1 = vunpack.i.l.bf16 %v7449_v55 }
 0xef5   :  { %6785 = vmatmul.mubr.msk.f32.gmra.mrb[56].mxu0 %vm329_vm1, %v2350_v46 }
 0xef6   :  { %v7166_v48 = vpack.c.bf16 %v7451_v63, %v7450_v1  ;;  %6787 = vmatprep.mubr.msk.f32.mxu0 %vm9305_vm2, %v7763_v27  ;;  %v7643_v56 = vpop.eup %7642 }
 0xef7   :  { %v2593_v0 = vpop.permute.xlu1 %2592  ;;  %v2586_v37 = vmul.f32 %v7643_v56, %v8569_v9 }
 0xef8   :  { %7167 = vmatpush3.bf16.msra.mxu0 %v7166_v48 }
 0xef9   :  { %6788 = vmatmul.mubr.msk.f32.gmra.mrb[58].mxu0 %vm329_vm1, %v2351_v50  ;;  %6809 = vmatprep.subr.mxu0 %v7763_v27 }
 0xefa   :  { %6811 = vmatprep.mubr.msk.f32.mxu0 %vm9305_vm2, %v7763_v27  ;;  %v7645_v60 = vpop.eup %7644 }
 0xefb   :  { %v2587_v61 = vmul.f32 %v7645_v60, %v8573_v53 }
 0xefc   :  { %6810 = vmatpush3.msk.msra.mxu0 %vm381_vm5, %v2593_v0  ;;  %v6070_v0 = vld [vmem:[%s9297_s4 + $0x5] ss:$0 sm:$0xff] }
 0xefd   :  { %6812 = vmatmul.mubr.msk.f32.vlgmr.msra.gmra.mrb[60].mxu0 %vm329_vm1, %v2585_v40  ;;  %7174 = vmatprep.subr.bf16.mxu0 %v7761_v26 }
 0xefe   :  { %6814 = vmatprep.mubr.msk.f32.mxu0 %vm9305_vm2, %v7763_v27 }
 0xf01   :  { %6815 = vmatmul.mubr.msk.f32.gmra.mrb[62].mxu0 %vm329_vm1, %v2586_v37 }
 0xf02   :  { %6817 = vmatprep.mubr.msk.f32.mxu0 %vm9305_vm2, %v7763_v27 }
 0xf05   :  { %6818 = vmatmul.mubr.msk.f32.gmra.mrb[64].mxu0 %vm329_vm1, %v2587_v61  ;;  %vm9332_vm1 = vmmov %vm9317_vm6 }
 0xf06   :  { %6845 = vmatprep.mubr.msk.f32.mxu0 %vm9305_vm2, %v7763_v27  ;;  %vm9333_vm7 = vmmov %vm9332_vm1 }
 0xf07   :  { %vm9334_vm9 = vmmov %vm9332_vm1 }
 0xf08   :  { %vm9335_vm10 = vmmov %vm9332_vm1 }
 0xf09   :  { %vm9336_vm11 = vmmov %vm9332_vm1 }
 0xf0a   :  { %vm9338_vm13 = vmmov %vm9332_vm1 }
 0xf0b   :  { %vm9339_vm14 = vmmov %vm9332_vm1 }
 0xf0c   :  { %vm9341_vm6 = vmmov %vm9332_vm1 }
 0xf76   :  { %v1965_v59 = vpop.f32.mrb[42].mxu0 }
 0xf77   :  { %v6723_v54 = vpop.f32.mrb[43].mxu0 }
 0xf7a   :  { %v1970_v57 = vpop.f32.mrb[44].mxu0 }
 0xf7b   :  { %v6726_v15 = vpop.f32.mrb[45].mxu0 }
 0xf7e   :  { %v1975_v5 = vpop.f32.mrb[46].mxu0 }
 0xf7f   :  { %v6729_v17 = vpop.f32.mrb[47].mxu0 }
 0xf93   :  { %v2201_v9 = vpop.f32.mrb[48].mxu0 }
 0xf94   :  { %2690 = vrot.lane.b32.xlu1 %v2201_v9, %s7776_s10  ;;  %v6753_v10 = vpop.f32.mrb[49].mxu0 }
 0xf97   :  { %v2206_v7 = vpop.f32.mrb[50].mxu0 }
 0xf98   :  { %2692 = vrot.lane.b32.xlu0 %v2206_v7, %s7776_s10  ;;  %v6756_v20 = vpop.f32.mrb[51].mxu0 }
 0xf9b   :  { %v2211_v53 = vpop.f32.mrb[52].mxu0 }
 0xf9c   :  { %2694 = vrot.lane.b32.xlu1 %v2211_v53, %s7776_s10  ;;  %v6759_v43 = vpop.f32.mrb[53].mxu0 }
 0xfc4   :  { %v2437_v31 = vpop.f32.mrb[54].mxu0 }
 0xfc5   :  { %2702 = vrot.lane.b32.xlu1 %v2437_v31, %s7777_s19  ;;  %v6783_v2 = vpop.f32.mrb[55].mxu0 }
 0xfc8   :  { %v2442_v23 = vpop.f32.mrb[56].mxu0 }
 0xfc9   :  { %2704 = vrot.lane.b32.xlu1 %v2442_v23, %s7777_s19  ;;  %v6786_v21 = vpop.f32.mrb[57].mxu0 }
 0xfcc   :  { %v2447_v38 = vpop.f32.mrb[58].mxu0 }
 0xfcd   :  { %v6789_v6 = vpop.f32.mrb[59].mxu0 }
 0xfce   :  { %v6076_v6 = vld [vmem:[%s9296_s3 + $0x88] sm:$0xff] }
 0xfd0   :  { %v2673_v29 = vpop.f32.mrb[60].mxu0 }
 0xfd1   :  { %2714 = vrot.lane.b32.xlu1 %v2673_v29, %s7778_s20  ;;  %v6813_v42 = vpop.f32.mrb[61].mxu0 }
 0xfd2   :  { %v6077_v42 = vld [vmem:[%s9296_s3 + $0x90] sm:$0xff] }
 0xfd4   :  { %v2678_v14 = vpop.f32.mrb[62].mxu0 }
 0xfd5   :  { %2716 = vrot.lane.b32.xlu1 %v2678_v14, %s7778_s20  ;;  %v6816_v24 = vpop.f32.mrb[63].mxu0  ;;  %v6078_v14 = vld [vmem:[%s9296_s3 + $0x98] sm:$0xff] }
 0xfd6   :  { %v7178_v24 = vpack.c.bf16 %v6078_v14, %v6077_v42 }
 0xfd8   :  { %v2683_v47 = vpop.f32.mrb[64].mxu0 }
 0xfd9   :  { %2706 = vrot.lane.b32.xlu1 %v2447_v38, %s7777_s19  ;;  %v6819_v49 = vpop.f32.mrb[65].mxu0  ;;  %v6075_v38 = vld [vmem:[%s9296_s3 + $0x80] sm:$0xff] }
 0xfda   :  { %v7175_v29 = vpack.c.bf16 %v6076_v6, %v6075_v38  ;;  %v6085_v49 = vld [vmem:[%s9296_s3 + $0xa8] sm:$0xff] }
 0xfdc   :  { %7176 = vmatpush3.bf16.msra.mxu0 %v7175_v29 }
 0xfdd   :  { %2718 = vrot.lane.b32.xlu1 %v2683_v47, %s7778_s20  ;;  %7177 = vmatprep.subr.bf16.mxu0 %v7761_v26  ;;  %v6084_v47 = vld [vmem:[%s9296_s3 + $0xa0] sm:$0xff] }
 0xfe0   :  { %7179 = vmatpush3.bf16.msra.mxu0 %v7178_v24 }
0x1006   :  { %v2691_v52 = vpop.permute.xlu1 %2690 }
0x1007   :  { %v2723_v45 = vsel %vm233_vm3, %v1965_v59, %v2691_v52  ;;  %v7181_v52 = vpack.c.bf16 %v6085_v49, %v6084_v47 }
0x100a   :  { %v2693_v35 = vpop.permute.xlu0 %2692 }
0x100b   :  { %v2724_v22 = vsel %vm233_vm3, %v1970_v57, %v2693_v35 }
0x100e   :  { %v2695_v39 = vpop.permute.xlu1 %2694 }
0x100f   :  { %v2725_v1 = vsel %vm233_vm3, %v1975_v5, %v2695_v39 }
0x1037   :  { %v2703_v44 = vpop.permute.xlu1 %2702 }
0x1038   :  { %v2726_v58 = vsel %vm9307_vm0, %v2723_v45, %v2703_v44 }
0x103b   :  { %v2705_v25 = vpop.permute.xlu1 %2704 }
0x103c   :  { %v2727_v55 = vsel %vm9307_vm0, %v2724_v22, %v2705_v25 }
0x1043   :  { %v2715_v18 = vpop.permute.xlu1 %2714 }
0x1044   :  { %v2729_v41 = vsel %vm9306_vm8, %v2726_v58, %v2715_v18 }
0x1045   :  { %6829 = vmatmul.mubr.msk.f32.vlgmr.msra.gmra.mrb[60].mxu1 %vm9332_vm1, %v2729_v41 }
0x1046   :  { %6831 = vmatprep.mubr.msk.f32.mxu1 %vm9305_vm2, %v7763_v27  ;;  %7182 = vmatpush3.bf16.msra.mxu1 %v7181_v52 }
0x1047   :  { %v2717_v46 = vpop.permute.xlu1 %2716  ;;  %7183 = vmatprep.subr.bf16.mxu1 %v7761_v26 }
0x1048   :  { %v2730_v51 = vsel %vm9306_vm8, %v2727_v55, %v2717_v46  ;;  %v6073_v55 = vld [vmem:[%s9297_s4 + $0x6] ss:$0 sm:$0xff] }
0x1049   :  { %6832 = vmatmul.mubr.msk.f32.gmra.mrb[62].mxu1 %vm9333_vm7, %v2730_v51  ;;  %vm9342_vm7 = vmmov %vm9332_vm1 }
0x104a   :  { %6834 = vmatprep.mubr.msk.f32.mxu1 %vm9305_vm2, %v7763_v27 }
0x104b   :  { %v2707_v63 = vpop.permute.xlu1 %2706 }
0x104c   :  { %v2728_v48 = vsel %vm9307_vm0, %v2725_v1, %v2707_v63  ;;  %v6074_v63 = vld [vmem:[%s9297_s4 + $0x7] ss:$0 sm:$0xff]  ;;  %vm3435_vm0 = vcmask 80896  }
0x104f   :  { %v2719_v50 = vpop.permute.xlu1 %2718 }
0x1050   :  { %v2731_v3 = vsel %vm9306_vm8, %v2728_v48, %v2719_v50 }
0x1051   :  { %6835 = vmatmul.mubr.msk.f32.gmra.mrb[64].mxu1 %vm9334_vm9, %v2731_v3  ;;  %vm9343_vm9 = vmmov %vm9332_vm1 }
0x1052   :  { %6862 = vmatprep.mubr.msk.f32.mxu1 %vm9305_vm2, %v7763_v27 }
0x1118   :  { %v2812_v40 = vpop.f32.mrb[60].mxu1 }
0x1119   :  { %v2826_v56 = vadd.f32 %v2812_v40, %v8320_v11  ;;  %v6830_v37 = vpop.f32.mrb[61].mxu1 }
0x111b   :  { %v8685_v60 = vadd.f32 %v6070_v0, %v2826_v56 }
0x111c   :  { %v2817_v61 = vpop.f32.mrb[62].mxu1 }
0x111d   :  { %v2827_v59 = vadd.f32 %v2817_v61, %v8325_v16  ;;  %v6833_v54 = vpop.f32.mrb[63].mxu1  ;;  %v2844_v57 = vsel %vm9335_vm10, %v8685_v60, 0.0  ;;  %vm9344_vm10 = vmmov %vm9332_vm1 }
0x111e   :  { %2845 = vadd.xlane.f32.xlu0 %v2844_v57  ;;  %v6086_v54 = vld [vmem:[%s9296_s3 + $0xb0] sm:$0xff]  ;;  %v6087_v57 = vld [vmem:[%s9296_s3 + $0xb8] sm:$0xff] }
0x111f   :  { %v8690_v15 = vadd.f32 %v6070_v0, %v2827_v59 }
0x1121   :  { %v2847_v5 = vsel %vm9336_vm11, %v8690_v15, 0.0  ;;  %vm9345_vm11 = vmmov %vm9332_vm1 }
0x1122   :  { %2848 = vadd.xlane.f32.xlu1 %v2847_v5  ;;  %v7184_v5 = vpack.c.bf16 %v6087_v57, %v6086_v54 }
0x1124   :  { %v2822_v17 = vpop.f32.mrb[64].mxu1  ;;  %7185 = vmatpush3.bf16.msra.mxu1 %v7184_v5 }
0x1125   :  { %v2828_v11 = vadd.f32 %v2822_v17, %v8330_v12  ;;  %v6836_v9 = vpop.f32.mrb[65].mxu1  ;;  %v6080_v17 = vld [vmem:[%s9297_s4 + $0x8] ss:$0 sm:$0xff] }
0x1127   :  { %v8695_v10 = vadd.f32 %v6070_v0, %v2828_v11 }
0x1129   :  { %v2850_v16 = vsel %vm9337_vm12, %v8695_v10, 0.0  ;;  %vm3114_vm12 = vcmask 256001  }
0x112a   :  { %2851 = vadd.xlane.f32.xlu0 %v2850_v16 }
0x11ab   :  { %v2846_v7 = vpop.xlane.xlu0 %2845 }
0x11ac   :  { %v2853_v20 = vmul.f32 0.03125, %v2846_v7 }
0x11ae   :  { %v2856_v53 = vsub.f32 %v8685_v60, %v2853_v20 }
0x11af   :  { %v2849_v43 = vpop.xlane.xlu1 %2848 }
0x11b0   :  { %v2854_v19 = vmul.f32 0.03125, %v2849_v43  ;;  %v2859_v13 = vmul.f32 %v2856_v53, %v2856_v53 }
0x11b2   :  { %v2857_v4 = vsub.f32 %v8690_v15, %v2854_v19  ;;  %v2862_v28 = vsel %vm9338_vm13, %v2859_v13, 0.0  ;;  %vm3122_vm13 = vcmask 258051  }
0x11b3   :  { %2863 = vadd.xlane.f32.xlu0 %v2862_v28 }
0x11b4   :  { %v2860_v12 = vmul.f32 %v2857_v4, %v2857_v4 }
0x11b6   :  { %v2865_v8 = vsel %vm9339_vm14, %v2860_v12, 0.0  ;;  %vm3130_vm14 = vcmask 260101  }
0x11b7   :  { %v2852_v30 = vpop.xlane.xlu0 %2851  ;;  %2866 = vadd.xlane.f32.xlu1 %v2865_v8 }
0x11b8   :  { %v2855_v31 = vmul.f32 0.03125, %v2852_v30  ;;  %v6092_v30 = vld [vmem:[%s9297_s4 + $0x9] ss:$0 sm:$0xff] }
0x11ba   :  { %v2858_v2 = vsub.f32 %v8695_v10, %v2855_v31 }
0x11bc   :  { %v2861_v23 = vmul.f32 %v2858_v2, %v2858_v2 }
0x11be   :  { %v2868_v21 = vsel %vm9340_vm15, %v2861_v23, 0.0  ;;  %vm3138_vm15 = vcmask 261127  }
0x11bf   :  { %2869 = vadd.xlane.f32.xlu0 %v2868_v21 }
0x1240   :  { %v2864_v39 = vpop.xlane.xlu0 %2863 }
0x1241   :  { %v2871_v44 = vmul.f32 0.03125, %v2864_v39 }
0x1243   :  { %v2874_v25 = vadd.f32 1e-05, %v2871_v44 }
0x1244   :  { %v2867_v45 = vpop.xlane.xlu1 %2866 }
0x1245   :  { %7646 = vrsqrt.f32 %v2874_v25  ;;  %v2872_v35 = vmul.f32 0.03125, %v2867_v45 }
0x1247   :  { %v2875_v58 = vadd.f32 1e-05, %v2872_v35 }
0x1249   :  { %7648 = vrsqrt.f32 %v2875_v58 }
0x124c   :  { %v2870_v18 = vpop.xlane.xlu0 %2869 }
0x124d   :  { %v2873_v41 = vmul.f32 0.03125, %v2870_v18 }
0x124f   :  { %v7647_v22 = vpop.eup %7646  ;;  %v2876_v46 = vadd.f32 1e-05, %v2873_v41 }
0x1250   :  { %v2880_v51 = vmul.f32 %v7647_v22, %v2856_v53 }
0x1251   :  { %7650 = vrsqrt.f32 %v2876_v46 }
0x1252   :  { %v2889_v1 = vmul.f32 %v6073_v55, %v2880_v51 }
0x1253   :  { %v7649_v48 = vpop.eup %7648 }
0x1254   :  { %v2898_v50 = vadd.f32 %v6074_v63, %v2889_v1  ;;  %v2881_v3 = vmul.f32 %v7649_v48, %v2857_v4 }
0x1256   :  { %6846 = vmatmul.mubr.msk.f32.vlgmr.msra.gmra.mrb[66].mxu0 %vm9341_vm6, %v2898_v50  ;;  %v2890_v40 = vmul.f32 %v6073_v55, %v2881_v3  ;;  %vm3140_vm6 = vcmask 253952  }
0x1257   :  { %6848 = vmatprep.mubr.msk.f32.mxu0 %vm9305_vm2, %v7763_v27 }
0x1258   :  { %v2899_v0 = vadd.f32 %v6074_v63, %v2890_v40 }
0x125a   :  { %6849 = vmatmul.mubr.msk.f32.gmra.mrb[68].mxu0 %vm9332_vm1, %v2899_v0  ;;  %vm3149_vm1 = vcmask 257026  }
0x125b   :  { %v7651_v56 = vpop.eup %7650  ;;  %6851 = vmatprep.mubr.msk.f32.mxu0 %vm9305_vm2, %v7763_v27 }
0x125c   :  { %v2882_v37 = vmul.f32 %v7651_v56, %v2858_v2 }
0x125e   :  { %v2891_v61 = vmul.f32 %v6073_v55, %v2882_v37 }
0x1260   :  { %v2900_v59 = vadd.f32 %v6074_v63, %v2891_v61 }
0x1262   :  { %6852 = vmatmul.mubr.msk.f32.gmra.mrb[70].mxu0 %vm9342_vm7, %v2900_v59  ;;  %vm3157_vm7 = vcmask 259076  }
0x1329   :  { %v2989_v11 = vpop.f32.mrb[66].mxu0 }
0x132a   :  { %v2990_v9 = vadd.f32 %v6080_v17, %v2989_v11  ;;  %v6847_v16 = vpop.f32.mrb[67].mxu0 }
0x132c   :  { %v3003_v7 = vmax.f32 %v2990_v9, 0.0 }
0x132d   :  { %v2994_v20 = vpop.f32.mrb[68].mxu0 }
0x132e   :  { %v2995_v53 = vadd.f32 %v6080_v17, %v2994_v20  ;;  %v6850_v43 = vpop.f32.mrb[69].mxu0  ;;  %6863 = vmatmul.mubr.msk.f32.vlgmr.msra.gmra.mrb[66].mxu1 %vm9343_vm9, %v3003_v7  ;;  %vm3165_vm9 = vcmask 261126  }
0x132f   :  { %6865 = vmatprep.mubr.msk.f32.mxu1 %vm9305_vm2, %v7763_v27 }
0x1330   :  { %v3004_v19 = vmax.f32 %v2995_v53, 0.0 }
0x1332   :  { %6866 = vmatmul.mubr.msk.f32.gmra.mrb[68].mxu1 %vm9344_vm10, %v3004_v19  ;;  %vm9304_vm10 = vcmask 1040384  }
0x1333   :  { %6868 = vmatprep.mubr.msk.f32.mxu1 %vm9305_vm2, %v7763_v27 }
0x1335   :  { %v2999_v13 = vpop.f32.mrb[70].mxu0 }
0x1336   :  { %v3000_v4 = vadd.f32 %v6080_v17, %v2999_v13  ;;  %v6853_v28 = vpop.f32.mrb[71].mxu0 }
0x1338   :  { %v3005_v12 = vmax.f32 %v3000_v4, 0.0 }
0x133a   :  { %6869 = vmatmul.mubr.msk.f32.gmra.mrb[70].mxu1 %vm9345_vm11, %v3005_v12  ;;  %vm9346_vm11 = vcmask 254976  }
0x1401   :  { %v3086_v8 = vpop.f32.mrb[66].mxu1 }
0x1402   :  { %v3100_v31 = vadd.f32 %v3086_v8, %v8685_v60  ;;  %v6864_v2 = vpop.f32.mrb[67].mxu1 }
0x1404   :  { %v3111_v23 = vadd.f32 %v6092_v30, %v3100_v31 }
0x1405   :  { %v3091_v21 = vpop.f32.mrb[68].mxu1 }
0x1406   :  { %v3115_v38 = vsel %vm3114_vm12, %v3111_v23, -inf  ;;  %v3123_v6 = vsel %vm3122_vm13, %v3111_v23, -inf  ;;  %v3131_v29 = vsel %vm3130_vm14, %v3111_v23, -inf  ;;  %v6867_v42 = vpop.f32.mrb[69].mxu1  ;;  %v3101_v49 = vadd.f32 %v3091_v21, %v8690_v15 }
0x1407   :  { %v3116_v14 = vrot.slane %v3115_v38, 4  ;;  %v3124_v24 = vrot.slane %v3123_v6, 4  ;;  %v3132_v47 = vrot.slane %v3131_v29, 4  ;;  %v3139_v25 = vsel %vm3138_vm15, %v3111_v23, -inf }
0x1408   :  { %v8759_v44 = vadd.f32 %v6092_v30, %v3101_v49  ;;  %vm3186_vm12 = vcmask 1042432   ;;  %vm3188_vm13 = vcmask 1043456   ;;  %vm3190_vm14 = vcmask 1044480  }
0x1409   :  { %v3117_v60 = vmax.f32 %v3115_v38, %v3116_v14  ;;  %v3125_v52 = vmax.f32 %v3123_v6, %v3124_v24  ;;  %v3133_v39 = vmax.f32 %v3131_v29, %v3132_v47  ;;  %vm3192_vm15 = vcmask 1045504  }
0x140a   :  { %v3141_v18 = vsel %vm3140_vm6, %v8759_v44, -inf  ;;  %v3150_v22 = vsel %vm3149_vm1, %v8759_v44, -inf  ;;  %v3158_v15 = vsel %vm3157_vm7, %v8759_v44, -inf  ;;  %v3166_v40 = vsel %vm3165_vm9, %v8759_v44, -inf  ;;  %vm9348_vm7 = vmmov %vm9346_vm11 }
0x140b   :  { %v3118_v45 = vrot.slane %v3117_v60, 2  ;;  %v3126_v35 = vrot.slane %v3125_v52, 2  ;;  %v3134_v58 = vrot.slane %v3133_v39, 2  ;;  %v3142_v41 = vmax.f32 %v3139_v25, %v3141_v18 }
0x140c   :  { %v3151_v51 = vrot.slane %v3150_v22, 4  ;;  %v3159_v3 = vrot.slane %v3158_v15, 4  ;;  %v3167_v5 = vrot.slane %v3166_v40, 4  ;;  %v3181_v14 = vrot.slane %v8759_v44, 4 }
0x140d   :  { %v3119_v55 = vmax.f32 %v3117_v60, %v3118_v45  ;;  %v3127_v46 = vmax.f32 %v3125_v52, %v3126_v35  ;;  %v3096_v63 = vpop.f32.mrb[70].mxu1  ;;  %v3143_v1 = vrot.slane %v3142_v41, 4  ;;  %v3135_v37 = vmax.f32 %v3133_v39, %v3134_v58 }
0x140e   :  { %v3102_v48 = vadd.f32 %v3096_v63, %v8695_v10  ;;  %v6870_v50 = vpop.f32.mrb[71].mxu1  ;;  %v3152_v61 = vmax.f32 %v3150_v22, %v3151_v51  ;;  %v3160_v57 = vmax.f32 %v3158_v15, %v3159_v3  ;;  %v3168_v20 = vmax.f32 %v3166_v40, %v3167_v5 }
0x140f   :  { %v3120_v0 = vrot.slane %v3119_v55, 1  ;;  %v3128_v56 = vrot.slane %v3127_v46, 1  ;;  %v3144_v59 = vmax.f32 %v3142_v41, %v3143_v1  ;;  %v3136_v19 = vrot.slane %v3135_v37, 1 }
0x1410   :  { %v3113_v54 = vadd.f32 %v6092_v30, %v3102_v48  ;;  %v3153_v9 = vrot.slane %v3152_v61, 2  ;;  %v3161_v10 = vrot.slane %v3160_v57, 2  ;;  %v3169_v12 = vrot.slane %v3168_v20, 2 }
0x1411   :  { %v3121_v17 = vmax.f32 %v3119_v55, %v3120_v0  ;;  %v3129_v11 = vmax.f32 %v3127_v46, %v3128_v56  ;;  %v3145_v7 = vrot.slane %v3144_v59, 2  ;;  %v3137_v6 = vmax.f32 %v3135_v37, %v3136_v19  ;;  %v6093_v0 = vld [vmem:[%s9294_s1 + $0x40] sm:$0xff]  ;;  %v6094_v56 = vld [vmem:[%s9294_s1 + $0x48] sm:$0xff] }
0x1412   :  { %v3173_v16 = vsel %vm9346_vm11, %v3113_v54, -inf  ;;  %v3154_v13 = vmax.f32 %v3152_v61, %v3153_v9  ;;  %v3162_v28 = vmax.f32 %v3160_v57, %v3161_v10  ;;  %v3170_v21 = vmax.f32 %v3168_v20, %v3169_v12  ;;  %vm9350_vm11 = vmmov %vm9348_vm7  ;;  %v6095_v61 = vld [vmem:[%s9294_s1 + $0x50] sm:$0xff] }
0x1413   :  { %v3184_v53 = vsel %vm9304_vm10, %v3111_v23, %v3121_v17  ;;  %v3174_v43 = vrot.slane %v3173_v16, 4  ;;  %v3146_v4 = vmax.f32 %v3144_v59, %v3145_v7  ;;  %vm3194_vm6 = vcmask 1046528   ;;  %v6096_v59 = vld [vmem:[%s9294_s1 + $0x58] sm:$0xff] }
0x1414   :  { %v3155_v31 = vrot.slane %v3154_v13, 1  ;;  %v3185_v2 = vsel %vm381_vm5, %v3184_v53, %v3129_v11  ;;  %v3163_v29 = vrot.slane %v3162_v28, 1  ;;  %v3171_v47 = vrot.slane %v3170_v21, 1 }
0x1415   :  { %v3175_v8 = vmax.f32 %v3173_v16, %v3174_v43  ;;  %v3147_v30 = vrot.slane %v3146_v4, 1  ;;  %v3187_v24 = vsel %vm3186_vm12, %v3185_v2, %v3137_v6  ;;  %vm9347_vm1 = vcmask 261120   ;;  %v6098_v43 = vld [vmem:[%s9295_s2 + $0x2] ss:$0 sm:$0xff] }
0x1416   :  { %v3156_v49 = vmax.f32 %v3154_v13, %v3155_v31  ;;  %v3164_v39 = vmax.f32 %v3162_v28, %v3163_v29  ;;  %v3172_v58 = vmax.f32 %v3170_v21, %v3171_v47  ;;  %vm9349_vm9 = vmmov %vm9347_vm1  ;;  %v7186_v37 = vpack.c.bf16 %v6094_v56, %v6093_v0 }
0x1417   :  { %v3176_v38 = vrot.slane %v3175_v8, 2  ;;  %v3148_v42 = vmax.f32 %v3146_v4, %v3147_v30  ;;  %v7190_v54 = vpack.c.bf16 %v6096_v59, %v6095_v61  ;;  %vm9351_vm12 = vmmov %vm9347_vm1 }
0x1418   :  { %7187 = vmatprep.subr.bf16.mxu0 %v7186_v37 }
0x1419   :  { %v3177_v23 = vmax.f32 %v3175_v8, %v3176_v38  ;;  %v3189_v60 = vsel %vm3188_vm13, %v3187_v24, %v3148_v42  ;;  %7189 = vmatpush3.bf16.msra.mxu0 %v7186_v37  ;;  %vm9352_vm13 = vmmov %vm9347_vm1 }
0x141a   :  { %v3191_v25 = vsel %vm3190_vm14, %v3189_v60, %v3181_v14  ;;  %7191 = vmatprep.subr.bf16.mxu0 %v7190_v54  ;;  %vm7779_vm14 = vmmov 1  }
0x141b   :  { %v3178_v52 = vrot.slane %v3177_v23, 1  ;;  %v3193_v45 = vsel %vm3192_vm15, %v3191_v25, %v3156_v49  ;;  %vm8820_vm15 = vmpackc.low %vm381_vm5, %vm7779_vm14  ;;  %vm3206_vm5 = vcmp.ge.s32.totalorder %v7972_v32, 5 }
0x141c   :  { %v8771_v35 = vsel %vm3194_vm6, %v3193_v45, %v3164_v39  ;;  %vm3212_vm6 = vcmp.ge.s32.totalorder %v7974_v33, 5 }
0x141d   :  { %v3179_v18 = vmax.f32 %v3177_v23, %v3178_v52  ;;  %v3222_v41 = vsel %vm9347_vm1, %v8771_v35, 0.0  ;;  %7193 = vmatpush3.bf16.msra.mxu0 %v7190_v54  ;;  %vm3197_vm1 = vcmp.lt.s32.totalorder %v7972_v32, 5  ;;  %v6195_v23 = vld [vmem:[%s9296_s3 + $0x130] sm:$0xff] }
0x141e   :  { %3223 = vadd.xlane.f32.xlu1 %v3222_v41 }
0x141f   :  { %v8776_v22 = vsel %vm9304_vm10, %v3172_v58, %v3179_v18 }
0x1420   :  { %v3225_v44 = vsel %vm9348_vm7, %v8776_v22, 0.0  ;;  %vm3203_vm7 = vcmp.lt.s32.totalorder %v7974_v33, 5 }
0x1421   :  { %3226 = vadd.xlane.f32.xlu0 %v3225_v44 }
0x14ab   :  { %v3224_v15 = vpop.xlane.xlu1 %3223 }
0x14ac   :  { %v3228_v55 = vmul.f32 0.03125, %v3224_v15 }
0x14ae   :  { %v3227_v46 = vpop.xlane.xlu0 %3226  ;;  %v3230_v51 = vsub.f32 %v8771_v35, %v3228_v55 }
0x14af   :  { %v3229_v63 = vmul.f32 0.03125, %v3227_v46 }
0x14b0   :  { %v3232_v48 = vmul.f32 %v3230_v51, %v3230_v51 }
0x14b1   :  { %v3231_v1 = vsub.f32 %v8776_v22, %v3229_v63 }
0x14b2   :  { %v3234_v50 = vsel %vm9349_vm9, %v3232_v48, 0.0  ;;  %vm3215_vm9 = vcmp.lt.s32.totalorder %v7974_v33, 10 }
0x14b3   :  { %v3233_v3 = vmul.f32 %v3231_v1, %v3231_v1  ;;  %3235 = vadd.xlane.f32.xlu1 %v3234_v50 }
0x14b5   :  { %v3237_v40 = vsel %vm9350_vm11, %v3233_v3, 0.0  ;;  %vm3213_vm11 = vmand %vm3206_vm5, %vm3212_vm6  ;;  %vm3439_vm5 = vcmask 74752  }
0x14b6   :  { %3238 = vadd.xlane.f32.xlu0 %v3237_v40  ;;  %vm3216_vm14 = vmand %vm3213_vm11, %vm3215_vm9 }
0x1540   :  { %v3236_v57 = vpop.xlane.xlu1 %3235 }
0x1541   :  { %v3240_v5 = vmul.f32 0.03125, %v3236_v57 }
0x1543   :  { %v3239_v17 = vpop.xlane.xlu0 %3238  ;;  %v3242_v11 = vadd.f32 1e-05, %v3240_v5 }
0x1544   :  { %v3241_v9 = vmul.f32 0.03125, %v3239_v17 }
0x1545   :  { %7652 = vrsqrt.f32 %v3242_v11 }
0x1546   :  { %v3243_v16 = vadd.f32 1e-05, %v3241_v9 }
0x1548   :  { %7654 = vrsqrt.f32 %v3243_v16 }
0x154f   :  { %v7653_v7 = vpop.eup %7652 }
0x1550   :  { %v3246_v10 = vmul.f32 %v7653_v7, %v3230_v51 }
0x1552   :  { %v7655_v20 = vpop.eup %7654  ;;  %6879 = vmatprep.mubr.msk.f32.mxu0 %vm9351_vm12, %v3246_v10  ;;  %vm3209_vm12 = vcmp.lt.s32.totalorder %v7977_v34, 10 }
0x1553   :  { %v3247_v53 = vmul.f32 %v7655_v20, %v3231_v1  ;;  %vm3214_vm10 = vmand %vm3209_vm12, %vm3212_vm6 }
0x1554   :  { %vm3217_vm8 = vmand %vm3214_vm10, %vm3215_vm9  ;;  %vm9357_vm10 = vcmask 195584   ;;  %vm9361_vm9 = vcmask 254976  }
0x1555   :  { %6880 = vmatmul.mubr.msk.f32.vlgmr.msra.gmra.mrb[72].mxu0 %vm9352_vm13, %v3247_v53  ;;  %vm3204_vm13 = vmand %vm3197_vm1, %vm3203_vm7  ;;  %v8842_v49 = vsel %vm3217_vm8, 0.0, %v7772_v36  ;;  %vm9359_vm1 = vcmask 261120  }
0x1556   :  { %vm3218_vm2 = vmor %vm3204_vm13, %vm3216_vm14 }
0x1557   :  { %v8839_v24 = vsel %vm3218_vm2, 0.0, %v7772_v36  ;;  %vm9355_vm2 = vcmask 130048   ;;  %vm9358_vm6 = vmmov %vm9357_vm10 }
0x1558   :  { %vm9356_vm8 = vmmov %vm9355_vm2 }
0x1559   :  { %vm9360_vm7 = vmmov %vm9359_vm1 }
0x155a   :  { %vm9362_vm11 = vmmov %vm9359_vm1 }
0x155b   :  { %vm9363_vm12 = vmmov %vm9359_vm1 }
0x155c   :  { %vm9364_vm13 = vmmov %vm9361_vm9 }
0x155d   :  { %vm9365_vm14 = vmmov %vm9359_vm1 }
0x1628   :  { %v6881_v19 = vpop.f32.mrb[72].mxu0 }
0x1629   :  { %v3339_v13 = vadd.f32 %v6881_v19, %v6098_v43  ;;  %v3333_v4 = vpop.f32.mrb[73].mxu0 }
0x162a   :  { %v3334_v28 = vadd.f32 %v6098_v43, %v3333_v4 }
0x162b   :  { %v8813_v30 = vmul.f32 0.35355338, %v3339_v13 }
0x162c   :  { %v8801_v12 = vpack.i.bf16 %v3339_v13, %v3334_v28  ;;  %v8803_v8 = vmul.f32 0.35355338, %v3334_v28 }
0x162e   :  { %7453 = vrot.lane.b32.xlu1 %v8801_v12, %s7764_s21  ;;  %6886 = vmatprep.mubr.msk.f32.mxu1 %vm233_vm3, %v8803_v8 }
0x1632   :  { %7458 = vrot.lane.b32.xlu1 %v8801_v12, %s7771_s28 }
0x1636   :  { %3547 = vrot.lane.b32.xlu1 %v8803_v8, %s7767_s24 }
0x163a   :  { %3549 = vrot.lane.b32.xlu1 %v8813_v30, %s7767_s24 }
0x16a0   :  { %v7454_v31 = vpop.permute.xlu1 %7453 }
0x16a1   :  { %v7456_v2 = vunpack.i.h.bf16 %v7454_v31  ;;  %v7455_v21 = vunpack.i.l.bf16 %v7454_v31 }
0x16a3   :  { %v7194_v38 = vpack.c.bf16 %v7456_v2, %v7455_v21 }
0x16a4   :  { %v7459_v6 = vpop.permute.xlu1 %7458 }
0x16a5   :  { %v7461_v29 = vunpack.i.h.bf16 %v7459_v6  ;;  %v7460_v42 = vunpack.i.l.bf16 %v7459_v6  ;;  %7196 = vmatprep.subr.msk.bf16.mxu1 %vm7909_vm4, %v7194_v38 }
0x16a6   :  { %7199 = vmatpush3.bf16.xpose.msk.msra.mxu1 %vm7909_vm4, %v7194_v38 }
0x16a7   :  { %v7200_v14 = vpack.c.bf16 %v7461_v29, %v7460_v42 }
0x16a8   :  { %v3548_v37 = vpop.permute.xlu1 %3547 }
0x16a9   :  { %7202 = vmatprep.subr.msk.bf16.mxu0 %vm8820_vm15, %v7200_v14 }
0x16aa   :  { %7205 = vmatpush3.bf16.msk.msra.mxu0 %vm8820_vm15, %v7200_v14 }
0x16ac   :  { %v3550_v61 = vpop.permute.xlu1 %3549 }
0x16ad   :  { %6887 = vmatmul.mubr.msk.f32.vlgmr.msra.gmra.mrb[72].mxu1 %vm233_vm3, %v8813_v30 }
0x1780   :  { %v6888_v47 = vpop.f32.mrb[72].mxu1 }
0x1781   :  { %v3426_v32 = vpop.f32.mrb[73].mxu1  ;;  %v3432_v33 = vadd.f32 %v6888_v47, %v8842_v49 }
0x1782   :  { %v3427_v60 = vadd.f32 %v3426_v32, %v8839_v24 }
0x1783   :  { %v3440_v52 = vsel %vm3439_vm5, %v3432_v33, -inf }
0x1784   :  { %v3436_v34 = vsel %vm3435_vm0, %v3427_v60, -inf }
0x1785   :  { %3437 = vmax.xlane.f32.xlu0 %v3436_v34 }
0x1789   :  { %3441 = vmax.xlane.f32.xlu0 %v3440_v52 }
0x1812   :  { %v3438_v39 = vpop.xlane.xlu0 %3437 }
0x1813   :  { %v3443_v25 = vsub.f32 %v3427_v60, %v3438_v39 }
0x1815   :  { %v3445_v18 = vmul.f32 1.442695, %v3443_v25 }
0x1816   :  { %v3442_v45 = vpop.xlane.xlu0 %3441 }
0x1817   :  { %v3444_v58 = vsub.f32 %v3432_v33, %v3442_v45 }
0x1819   :  { %v3447_v36 = vmul.f32 1.442695, %v3444_v58 }
0x181b   :  { %7656 = vpow2.f32 %v3447_v36 }
0x181c   :  { %7658 = vpow2.f32 %v3445_v18 }
0x1825   :  { %v7657_v41 = vpop.eup %7656 }
0x1826   :  { %v3452_v44 = vsel %vm3439_vm5, %v7657_v41, 0.0  ;;  %v7659_v15 = vpop.eup %7658 }
0x1827   :  { %3453 = vadd.xlane.f32.xlu0 %v3452_v44  ;;  %v3449_v55 = vsel %vm3435_vm0, %v7659_v15, 0.0 }
0x182b   :  { %3450 = vadd.xlane.f32.xlu0 %v3449_v55 }
0x1841   :  { %7463 = vrot.lane.b32.xlu0 %v8801_v12, %s7766_s23 }
0x18b4   :  { %v3454_v46 = vpop.xlane.xlu0 %3453 }
0x18b5   :  { %7660 = vrcp.f32 %v3454_v46 }
0x18b8   :  { %v3451_v51 = vpop.xlane.xlu0 %3450 }
0x18b9   :  { %7662 = vrcp.f32 %v3451_v51 }
0x18bc   :  { %v7464_v63 = vpop.permute.xlu0 %7463 }
0x18bd   :  { %v7466_v1 = vunpack.i.h.bf16 %v7464_v63  ;;  %v7465_v48 = vunpack.i.l.bf16 %v7464_v63 }
0x18bf   :  { %v7206_v50 = vpack.c.bf16 %v7466_v1, %v7465_v48  ;;  %v7661_v3 = vpop.eup %7660 }
0x18c0   :  { %v3458_v56 = vmul.f32 %v7661_v3, %v7657_v41 }
0x18c1   :  { %7208 = vmatprep.subr.msk.bf16.mxu0 %vm7909_vm4, %v7206_v50 }
0x18c3   :  { %v7663_v40 = vpop.eup %7662 }
0x18c4   :  { %v3457_v0 = vmul.f32 %v7663_v40, %v7659_v15 }
0x18c6   :  { %6893 = vmatprep.mubr.msk.f32.mxu0 %vm3435_vm0, %v3457_v0 }
0x18c7   :  { %6894 = vmatmul.mubr.msk.f32.vlgmr.msra.gmra.mrb[74].mxu0 %vm3435_vm0, %v3458_v56 }
0x18c8   :  { %7211 = vmatpush3.bf16.xpose.msk.msra.mxu0 %vm7909_vm4, %v7206_v50  ;;  %6900 = vmatprep.mubr.msk.f32.mxu0 %vm233_vm3, %v3548_v37 }
0x18cf   :  { %6901 = vmatmul.mubr.msk.f32.vlgmr.msra.gmra.mrb[76].mxu0 %vm233_vm3, %v3550_v61 }
0x199a   :  { %v8860_v59 = vpop.f32.mrb[74].mxu0 }
0x199b   :  { %v8862_v54 = vpop.f32.mrb[75].mxu0 }
0x19a2   :  { %v6902_v57 = vpop.f32.mrb[76].mxu0 }
0x19a3   :  { %v3635_v5 = vadd.f32 %v6902_v57, %v8842_v49  ;;  %v3629_v17 = vpop.f32.mrb[77].mxu0 }
0x19a4   :  { %v3630_v11 = vadd.f32 %v3629_v17, %v8839_v24 }
0x19a5   :  { %v3641_v9 = vsel %vm3439_vm5, %v3635_v5, -inf }
0x19a6   :  { %3642 = vmax.xlane.f32.xlu0 %v3641_v9  ;;  %v3638_v16 = vsel %vm3435_vm0, %v3630_v11, -inf }
0x19a7   :  { %3639 = vmax.xlane.f32.xlu1 %v3638_v16 }
0x19b8   :  { %7473 = vrot.lane.b32.xlu1 %v8801_v12, %s7765_s22 }
0x19bc   :  { %7468 = vrot.lane.b32.xlu0 %v8801_v12, %s7773_s29 }
0x19c0   :  { %3750 = vrot.lane.b32.xlu0 %v8813_v30, %s7768_s25 }
0x1a33   :  { %v3643_v7 = vpop.xlane.xlu0 %3642 }
0x1a34   :  { %v3645_v10 = vsub.f32 %v3635_v5, %v3643_v7  ;;  %v3640_v20 = vpop.xlane.xlu1 %3639 }
0x1a35   :  { %v3644_v53 = vsub.f32 %v3630_v11, %v3640_v20 }
0x1a36   :  { %v3648_v43 = vmul.f32 1.442695, %v3645_v10 }
0x1a37   :  { %v3646_v19 = vmul.f32 1.442695, %v3644_v53  ;;  %v7469_v13 = vpop.permute.xlu0 %7468 }
0x1a38   :  { %7664 = vpow2.f32 %v3648_v43  ;;  %v7471_v4 = vunpack.i.h.bf16 %v7469_v13  ;;  %v7470_v28 = vunpack.i.l.bf16 %v7469_v13  ;;  %v7474_v31 = vpop.permute.xlu1 %7473 }
0x1a39   :  { %v7476_v2 = vunpack.i.h.bf16 %v7474_v31  ;;  %v7475_v21 = vunpack.i.l.bf16 %v7474_v31  ;;  %7666 = vpow2.f32 %v3646_v19 }
0x1a3a   :  { %v7212_v38 = vpack.c.bf16 %v7471_v4, %v7470_v28 }
0x1a3b   :  { %v7218_v6 = vpack.c.bf16 %v7476_v2, %v7475_v21  ;;  %v3751_v45 = vpop.permute.xlu0 %3750 }
0x1a3c   :  { %7214 = vmatprep.subr.msk.bf16.mxu1 %vm8820_vm15, %v7212_v38 }
0x1a3d   :  { %7217 = vmatpush3.bf16.msk.msra.mxu1 %vm8820_vm15, %v7212_v38 }
0x1a3e   :  { %7220 = vmatprep.subr.msk.bf16.mxu1 %vm7909_vm4, %v7218_v6 }
0x1a42   :  { %v7665_v29 = vpop.eup %7664 }
0x1a43   :  { %v3653_v42 = vsel %vm3439_vm5, %v7665_v29, 0.0  ;;  %v7667_v14 = vpop.eup %7666 }
0x1a44   :  { %3654 = vadd.xlane.f32.xlu1 %v3653_v42  ;;  %v3650_v47 = vsel %vm3435_vm0, %v7667_v14, 0.0 }
0x1a48   :  { %3651 = vadd.xlane.f32.xlu1 %v3650_v47 }
0x1a59   :  { %3748 = vrot.lane.b32.xlu1 %v8803_v8, %s7768_s25 }
0x1ad1   :  { %v3655_v32 = vpop.xlane.xlu1 %3654 }
0x1ad2   :  { %7668 = vrcp.f32 %v3655_v32 }
0x1ad5   :  { %v3652_v60 = vpop.xlane.xlu1 %3651 }
0x1ad6   :  { %7670 = vrcp.f32 %v3652_v60 }
0x1ad9   :  { %v3749_v25 = vpop.permute.xlu1 %3748 }
0x1adc   :  { %v7669_v33 = vpop.eup %7668 }
0x1add   :  { %v3659_v39 = vmul.f32 %v7669_v33, %v7665_v29 }
0x1ae0   :  { %v7671_v34 = vpop.eup %7670 }
0x1ae1   :  { %v3658_v52 = vmul.f32 %v7671_v34, %v7667_v14 }
0x1ae3   :  { %6907 = vmatprep.mubr.msk.f32.mxu1 %vm3435_vm0, %v3658_v52 }
0x1ae4   :  { %6908 = vmatmul.mubr.msk.f32.vlgmr.msra.gmra.mrb[74].mxu1 %vm3435_vm0, %v3659_v39 }
0x1ae5   :  { %7223 = vmatpush3.bf16.xpose.msk.msra.mxu1 %vm7909_vm4, %v7218_v6  ;;  %6914 = vmatprep.mubr.msk.f32.mxu1 %vm233_vm3, %v3749_v25 }
0x1aec   :  { %6915 = vmatmul.mubr.msk.f32.vlgmr.msra.gmra.mrb[76].mxu1 %vm233_vm3, %v3751_v45 }
0x1bb7   :  { %v8890_v58 = vpop.f32.mrb[74].mxu1 }
0x1bb8   :  { %v8892_v18 = vpop.f32.mrb[75].mxu1 }
0x1bbf   :  { %v6916_v36 = vpop.f32.mrb[76].mxu1 }
0x1bc0   :  { %v3836_v41 = vadd.f32 %v6916_v36, %v8842_v49  ;;  %v3830_v44 = vpop.f32.mrb[77].mxu1 }
0x1bc1   :  { %v3831_v15 = vadd.f32 %v3830_v44, %v8839_v24 }
0x1bc2   :  { %v3842_v55 = vsel %vm3439_vm5, %v3836_v41, -inf }
0x1bc3   :  { %3843 = vmax.xlane.f32.xlu0 %v3842_v55  ;;  %v3839_v46 = vsel %vm3435_vm0, %v3831_v15, -inf }
0x1bc4   :  { %3840 = vmax.xlane.f32.xlu1 %v3839_v46 }
0x1c50   :  { %v3844_v51 = vpop.xlane.xlu0 %3843 }
0x1c51   :  { %v3846_v63 = vsub.f32 %v3836_v41, %v3844_v51  ;;  %v3841_v1 = vpop.xlane.xlu1 %3840  ;;  %v6129_v51 = vld [vmem:[%s9296_s3 + $0xc0] sm:$0xff] }
0x1c52   :  { %v3845_v48 = vsub.f32 %v3831_v15, %v3841_v1  ;;  %v6131_v1 = vld [vmem:[%s9296_s3 + $0xd0] sm:$0xff] }
0x1c53   :  { %v3849_v50 = vmul.f32 1.442695, %v3846_v63  ;;  %v6130_v63 = vld [vmem:[%s9296_s3 + $0xc8] sm:$0xff] }
0x1c54   :  { %v3847_v3 = vmul.f32 1.442695, %v3845_v48  ;;  %v7242_v48 = vpack.c.bf16 %v6130_v63, %v6129_v51 }
0x1c55   :  { %7672 = vpow2.f32 %v3849_v50  ;;  %v6132_v50 = vld [vmem:[%s9296_s3 + $0xd8] sm:$0xff] }
0x1c56   :  { %7674 = vpow2.f32 %v3847_v3  ;;  %v7246_v3 = vpack.c.bf16 %v6132_v50, %v6131_v1 }
0x1c5f   :  { %v7673_v40 = vpop.eup %7672 }
0x1c60   :  { %v7675_v0 = vpop.eup %7674  ;;  %v3854_v56 = vsel %vm3439_vm5, %v7673_v40, 0.0 }
0x1c61   :  { %3855 = vadd.xlane.f32.xlu1 %v3854_v56  ;;  %v3851_v37 = vsel %vm3435_vm0, %v7675_v0, 0.0 }
0x1c62   :  { %3852 = vadd.xlane.f32.xlu0 %v3851_v37 }
0x1c72   :  { %7483 = vrot.lane.b32.xlu1 %v8801_v12, %s7769_s26 }
0x1c76   :  { %3949 = vrot.lane.b32.xlu1 %v8803_v8, %s7770_s27 }
0x1c78   :  { %7478 = vrot.lane.b32.xlu0 %v8801_v12, %s7774_s30 }
0x1c7c   :  { %3951 = vrot.lane.b32.xlu0 %v8813_v30, %s7770_s27 }
0x1cee   :  { %v3856_v61 = vpop.xlane.xlu1 %3855 }
0x1cef   :  { %7676 = vrcp.f32 %v3856_v61  ;;  %v3853_v57 = vpop.xlane.xlu0 %3852 }
0x1cf0   :  { %7678 = vrcp.f32 %v3853_v57 }
0x1cf2   :  { %v7484_v5 = vpop.permute.xlu1 %7483 }
0x1cf3   :  { %v7479_v17 = vpop.permute.xlu0 %7478  ;;  %v7486_v11 = vunpack.i.h.bf16 %v7484_v5  ;;  %v7485_v9 = vunpack.i.l.bf16 %v7484_v5 }
0x1cf4   :  { %v7481_v16 = vunpack.i.h.bf16 %v7479_v17  ;;  %v7480_v7 = vunpack.i.l.bf16 %v7479_v17 }
0x1cf5   :  { %v7230_v20 = vpack.c.bf16 %v7486_v11, %v7485_v9 }
0x1cf6   :  { %v7224_v10 = vpack.c.bf16 %v7481_v16, %v7480_v7  ;;  %v3950_v19 = vpop.permute.xlu1 %3949 }
0x1cf7   :  { %v3952_v13 = vpop.permute.xlu0 %3951 }
0x1cf8   :  { %7226 = vmatprep.subr.msk.bf16.mxu0 %vm8820_vm15, %v7224_v10 }
0x1cf9   :  { %v7677_v8 = vpop.eup %7676  ;;  %7229 = vmatpush3.bf16.msk.msra.mxu0 %vm8820_vm15, %v7224_v10 }
0x1cfa   :  { %v7679_v30 = vpop.eup %7678  ;;  %7232 = vmatprep.subr.msk.bf16.mxu0 %vm7909_vm4, %v7230_v20  ;;  %v3860_v43 = vmul.f32 %v7677_v8, %v7673_v40 }
0x1cfb   :  { %v3859_v53 = vmul.f32 %v7679_v30, %v7675_v0 }
0x1cfd   :  { %6921 = vmatprep.mubr.msk.f32.mxu0 %vm3435_vm0, %v3859_v53 }
0x1cfe   :  { %6922 = vmatmul.mubr.msk.f32.vlgmr.msra.gmra.mrb[78].mxu0 %vm3435_vm0, %v3860_v43 }
0x1cff   :  { %6928 = vmatprep.mubr.msk.f32.mxu0 %vm233_vm3, %v3950_v19 }
0x1d02   :  { %7235 = vmatpush3.bf16.xpose.msk.msra.mxu0 %vm7909_vm4, %v7230_v20 }
0x1d09   :  { %6929 = vmatmul.mubr.msk.f32.vlgmr.msra.gmra.mrb[80].mxu0 %vm233_vm3, %v3952_v13 }
0x1dd1   :  { %v6923_v4 = vpop.f32.mrb[78].mxu0 }
0x1dd2   :  { %v3940_v28 = vpop.f32.mrb[79].mxu0 }
0x1ddc   :  { %v6930_v31 = vpop.f32.mrb[80].mxu0 }
0x1ddd   :  { %v4037_v2 = vadd.f32 %v6930_v31, %v8842_v49  ;;  %v4031_v21 = vpop.f32.mrb[81].mxu0 }
0x1dde   :  { %v4032_v38 = vadd.f32 %v4031_v21, %v8839_v24 }
0x1ddf   :  { %v4043_v6 = vsel %vm3439_vm5, %v4037_v2, -inf }
0x1de0   :  { %4044 = vmax.xlane.f32.xlu0 %v4043_v6  ;;  %v4040_v29 = vsel %vm3435_vm0, %v4032_v38, -inf }
0x1de1   :  { %4041 = vmax.xlane.f32.xlu1 %v4040_v29 }
0x1e6d   :  { %v4045_v42 = vpop.xlane.xlu0 %4044 }
0x1e6e   :  { %v4047_v14 = vsub.f32 %v4037_v2, %v4045_v42  ;;  %v4042_v47 = vpop.xlane.xlu1 %4041 }
0x1e6f   :  { %v4046_v32 = vsub.f32 %v4032_v38, %v4042_v47  ;;  %v6142_v47 = vld [vmem:[%s9296_s3 + $0xe8] sm:$0xff] }
0x1e70   :  { %v4050_v60 = vmul.f32 1.442695, %v4047_v14  ;;  %v6141_v14 = vld [vmem:[%s9296_s3 + $0xe0] sm:$0xff] }
0x1e71   :  { %v4048_v33 = vmul.f32 1.442695, %v4046_v32  ;;  %v7250_v32 = vpack.c.bf16 %v6142_v47, %v6141_v14  ;;  %v6160_v14 = vld [vmem:[%s9294_s1 + $0x78] sm:$0xff] }
0x1e72   :  { %7680 = vpow2.f32 %v4050_v60  ;;  %v6143_v60 = vld [vmem:[%s9296_s3 + $0xf0] sm:$0xff] }
0x1e73   :  { %7682 = vpow2.f32 %v4048_v33  ;;  %v6144_v33 = vld [vmem:[%s9296_s3 + $0xf8] sm:$0xff]  ;;  %7251 = vmatprep.subr.bf16.mxu0 %v7250_v32 }
0x1e74   :  { %7253 = vmatpush3.bf16.msra.mxu0 %v7250_v32 }
0x1e7c   :  { %v7681_v34 = vpop.eup %7680 }
0x1e7d   :  { %v7683_v52 = vpop.eup %7682  ;;  %v4055_v39 = vsel %vm3439_vm5, %v7681_v34, 0.0 }
0x1e7e   :  { %4056 = vadd.xlane.f32.xlu1 %v4055_v39  ;;  %v4052_v25 = vsel %vm3435_vm0, %v7683_v52, 0.0  ;;  %v6150_v39 = vld [vmem:[%s9296_s3 + $0x108] sm:$0xff] }
0x1e7f   :  { %4053 = vadd.xlane.f32.xlu0 %v4052_v25 }
0x1e8f   :  { %4152 = vrot.lane.b32.xlu1 %v8892_v18, %s7776_s10 }
0x1e93   :  { %4154 = vrot.lane.b32.xlu1 %v8890_v58, %s7776_s10 }
0x1e95   :  { %7488 = vrot.lane.b32.xlu0 %v8801_v12, %s7775_s9 }
0x1e97   :  { %4162 = vrot.lane.b32.xlu1 %v6923_v4, %s7777_s19 }
0x1e99   :  { %4160 = vrot.lane.b32.xlu0 %v3940_v28, %s7777_s19 }
0x1f0b   :  { %v4057_v45 = vpop.xlane.xlu1 %4056 }
0x1f0c   :  { %7684 = vrcp.f32 %v4057_v45  ;;  %v4054_v36 = vpop.xlane.xlu0 %4053 }
0x1f0d   :  { %7686 = vrcp.f32 %v4054_v36 }
0x1f0f   :  { %v4153_v56 = vpop.permute.xlu1 %4152 }
0x1f10   :  { %v7489_v41 = vpop.permute.xlu0 %7488  ;;  %v4174_v5 = vsel %vm233_vm3, %v8862_v54, %v4153_v56  ;;  %v6136_v54 = vld [vmem:[%s9297_s4 + $0xa] ss:$0 sm:$0xff] }
0x1f11   :  { %v7491_v44 = vunpack.i.h.bf16 %v7489_v41  ;;  %v7490_v15 = vunpack.i.l.bf16 %v7489_v41 }
0x1f13   :  { %v7236_v55 = vpack.c.bf16 %v7491_v44, %v7490_v15  ;;  %v4155_v37 = vpop.permute.xlu1 %4154 }
0x1f14   :  { %v4161_v57 = vpop.permute.xlu0 %4160  ;;  %v4175_v11 = vsel %vm233_vm3, %v8860_v59, %v4155_v37  ;;  %v6146_v37 = vld [vmem:[%s9297_s4 + $0xd] ss:$0 sm:$0xff] }
0x1f15   :  { %7238 = vmatprep.subr.msk.bf16.mxu1 %vm8820_vm15, %v7236_v55  ;;  %v4176_v9 = vsel %vm9355_vm2, %v4174_v5, %v4161_v57  ;;  %vm9366_vm2 = vmmov %vm9359_vm1 }
0x1f16   :  { %v7685_v18 = vpop.eup %7684  ;;  %7241 = vmatpush3.bf16.msk.msra.mxu1 %vm8820_vm15, %v7236_v55 }
0x1f17   :  { %v7687_v12 = vpop.eup %7686  ;;  %v4061_v46 = vmul.f32 %v7685_v18, %v7681_v34  ;;  %7243 = vmatprep.subr.bf16.mxu1 %v7242_v48  ;;  %v4163_v61 = vpop.permute.xlu1 %4162  ;;  %v7254_v34 = vpack.c.bf16 %v6144_v33, %v6143_v60 }
0x1f18   :  { %v4060_v58 = vmul.f32 %v7687_v12, %v7683_v52  ;;  %v4177_v7 = vsel %vm9356_vm8, %v4175_v11, %v4163_v61  ;;  %v6149_v52 = vld [vmem:[%s9296_s3 + $0x100] sm:$0xff]  ;;  %v6139_v12 = vld [vmem:[%s9297_s4 + $0xb] ss:$0 sm:$0xff]  ;;  %vm9367_vm8 = vmmov %vm9359_vm1 }
0x1f19   :  { %7255 = vmatprep.subr.bf16.mxu0 %v7254_v34  ;;  %v7258_v25 = vpack.c.bf16 %v6150_v39, %v6149_v52 }
0x1f1a   :  { %6935 = vmatprep.mubr.msk.f32.mxu1 %vm3435_vm0, %v4060_v58  ;;  %7257 = vmatpush3.bf16.msra.mxu0 %v7254_v34 }
0x1f1b   :  { %6936 = vmatmul.mubr.msk.f32.vlgmr.msra.gmra.mrb[78].mxu1 %vm3435_vm0, %v4061_v46  ;;  %v6140_v46 = vld [vmem:[%s9297_s4 + $0xc] ss:$0 sm:$0xff] }
0x1f1c   :  { %7245 = vmatpush3.bf16.msra.mxu1 %v7242_v48 }
0x1f1d   :  { %7247 = vmatprep.subr.bf16.mxu1 %v7246_v3 }
0x1f20   :  { %7249 = vmatpush3.bf16.msra.mxu1 %v7246_v3 }
0x1f21   :  { %7259 = vmatprep.subr.bf16.mxu1 %v7258_v25 }
0x1fee   :  { %v6937_v40 = vpop.f32.mrb[78].mxu1 }
0x1fef   :  { %4170 = vrot.lane.b32.xlu1 %v6937_v40, %s7778_s20  ;;  %v4141_v0 = vpop.f32.mrb[79].mxu1  ;;  %v6151_v40 = vld [vmem:[%s9296_s3 + $0x110] sm:$0xff] }
0x1ff0   :  { %4168 = vrot.lane.b32.xlu0 %v4141_v0, %s7778_s20  ;;  %v6152_v0 = vld [vmem:[%s9296_s3 + $0x118] sm:$0xff] }
0x1ff1   :  { %v7262_v56 = vpack.c.bf16 %v6152_v0, %v6151_v40 }
0x2061   :  { %v4171_v17 = vpop.permute.xlu1 %4170 }
0x2062   :  { %v4169_v16 = vpop.permute.xlu0 %4168  ;;  %v4179_v20 = vsel %vm9358_vm6, %v4177_v7, %v4171_v17  ;;  %v6156_v7 = vld [vmem:[%s9297_s4 + $0xe] ss:$0 sm:$0xff]  ;;  %vm9369_vm6 = vmmov %vm9361_vm9 }
0x2063   :  { %v4178_v10 = vsel %vm9357_vm10, %v4176_v9, %v4169_v16  ;;  %vm9368_vm10 = vmmov %vm9359_vm1 }
0x2064   :  { %6946 = vmatprep.mubr.msk.f32.mxu1 %vm9359_vm1, %v4178_v10 }
0x2065   :  { %6947 = vmatmul.mubr.msk.f32.vlgmr.msra.gmra.mrb[80].mxu1 %vm9360_vm7, %v4179_v20  ;;  %vm9370_vm7 = vmmov %vm9369_vm6 }
0x2066   :  { %7261 = vmatpush3.bf16.msra.mxu1 %v7258_v25 }
0x2067   :  { %7263 = vmatprep.subr.bf16.mxu1 %v7262_v56 }
0x206a   :  { %7265 = vmatpush3.bf16.msra.mxu1 %v7262_v56 }
0x2138   :  { %v6948_v8 = vpop.f32.mrb[80].mxu1 }
0x2139   :  { %v4267_v59 = vadd.f32 %v6948_v8, %v8776_v22  ;;  %v4257_v30 = vpop.f32.mrb[81].mxu1 }
0x213a   :  { %v4266_v53 = vadd.f32 %v4257_v30, %v8771_v35 }
0x213b   :  { %v8969_v43 = vadd.f32 %v6136_v54, %v4267_v59 }
0x213c   :  { %v8971_v19 = vadd.f32 %v6136_v54, %v4266_v53 }
0x213d   :  { %v4285_v13 = vsel %vm9361_vm9, %v8969_v43, 0.0  ;;  %vm9371_vm9 = vmmov %vm9359_vm1 }
0x213e   :  { %4286 = vadd.xlane.f32.xlu1 %v4285_v13  ;;  %v4282_v4 = vsel %vm9362_vm11, %v8971_v19, 0.0  ;;  %vm9372_vm11 = vmmov %vm9359_vm1 }
0x213f   :  { %4283 = vadd.xlane.f32.xlu0 %v4282_v4 }
0x21cb   :  { %v4287_v28 = vpop.xlane.xlu1 %4286 }
0x21cc   :  { %v4289_v31 = vmul.f32 0.03125, %v4287_v28  ;;  %v4284_v2 = vpop.xlane.xlu0 %4283 }
0x21cd   :  { %v4288_v21 = vmul.f32 0.03125, %v4284_v2 }
0x21ce   :  { %v4291_v22 = vsub.f32 %v8969_v43, %v4289_v31 }
0x21cf   :  { %v4290_v35 = vsub.f32 %v8971_v19, %v4288_v21 }
0x21d0   :  { %v4293_v29 = vmul.f32 %v4291_v22, %v4291_v22 }
0x21d1   :  { %v4292_v38 = vmul.f32 %v4290_v35, %v4290_v35 }
0x21d2   :  { %v4297_v42 = vsel %vm9364_vm13, %v4293_v29, 0.0  ;;  %v6159_v29 = vld [vmem:[%s9294_s1 + $0x70] sm:$0xff]  ;;  %vm9378_vm13 = vmmov %vm9359_vm1 }
0x21d3   :  { %v4294_v6 = vsel %vm9363_vm12, %v4292_v38, 0.0  ;;  %v6157_v38 = vld [vmem:[%s9294_s1 + $0x60] sm:$0xff]  ;;  %v7270_v47 = vpack.c.bf16 %v6160_v14, %v6159_v29  ;;  %vm9373_vm12 = vmmov %vm9359_vm1 }
0x21d4   :  { %4295 = vadd.xlane.f32.xlu0 %v4294_v6  ;;  %v6158_v6 = vld [vmem:[%s9294_s1 + $0x68] sm:$0xff] }
0x21d8   :  { %4298 = vadd.xlane.f32.xlu0 %v4297_v42  ;;  %v7266_v42 = vpack.c.bf16 %v6158_v6, %v6157_v38 }
0x21da   :  { %7267 = vmatprep.subr.bf16.mxu0 %v7266_v42 }
0x2261   :  { %v4296_v45 = vpop.xlane.xlu0 %4295 }
0x2262   :  { %v4300_v36 = vmul.f32 0.03125, %v4296_v45 }
0x2264   :  { %v4302_v41 = vadd.f32 1e-05, %v4300_v36 }
0x2265   :  { %v4299_v44 = vpop.xlane.xlu0 %4298 }
0x2266   :  { %7688 = vrsqrt.f32 %v4302_v41  ;;  %v4301_v15 = vmul.f32 0.03125, %v4299_v44  ;;  %v6162_v44 = vld [vmem:[%s9295_s2 + $0x3] ss:$0 sm:$0xff] }
0x2268   :  { %v4303_v55 = vadd.f32 1e-05, %v4301_v15 }
0x226a   :  { %7690 = vrsqrt.f32 %v4303_v55 }
0x2270   :  { %v7689_v18 = vpop.eup %7688 }
0x2271   :  { %v4306_v58 = vmul.f32 %v7689_v18, %v4290_v35 }
0x2273   :  { %v4314_v51 = vmul.f32 %v6139_v12, %v4306_v58 }
0x2274   :  { %v7691_v63 = vpop.eup %7690 }
0x2275   :  { %v4307_v1 = vmul.f32 %v7691_v63, %v4291_v22  ;;  %v4322_v48 = vadd.f32 %v6140_v46, %v4314_v51 }
0x2277   :  { %v4315_v50 = vmul.f32 %v6139_v12, %v4307_v1  ;;  %6957 = vmatprep.mubr.msk.f32.mxu0 %vm9365_vm14, %v4322_v48  ;;  %vm9379_vm14 = vmmov %vm9359_vm1 }
0x2279   :  { %v4323_v3 = vadd.f32 %v6140_v46, %v4315_v50 }
0x227b   :  { %6958 = vmatmul.mubr.msk.f32.vlgmr.msra.gmra.mrb[82].mxu0 %vm9366_vm2, %v4323_v3  ;;  %vm9381_vm2 = vmmov %vm9359_vm1 }
0x227c   :  { %7269 = vmatpush3.bf16.msra.mxu0 %v7266_v42 }
0x227d   :  { %7271 = vmatprep.subr.bf16.mxu0 %v7270_v47 }
0x2280   :  { %7273 = vmatpush3.bf16.msra.mxu0 %v7270_v47 }
0x234e   :  { %v6959_v61 = vpop.f32.mrb[82].mxu0 }
0x234f   :  { %v4415_v57 = vadd.f32 %v6959_v61, %v6146_v37  ;;  %v4409_v5 = vpop.f32.mrb[83].mxu0 }
0x2350   :  { %v4410_v17 = vadd.f32 %v6146_v37, %v4409_v5 }
0x2351   :  { %v4419_v9 = vmax.f32 %v4415_v57, 0.0 }
0x2352   :  { %v4418_v11 = vmax.f32 %v4410_v17, 0.0 }
0x2354   :  { %6968 = vmatprep.mubr.msk.f32.mxu1 %vm9367_vm8, %v4418_v11  ;;  %vm9382_vm8 = vmmov %vm9359_vm1 }
0x2355   :  { %6969 = vmatmul.mubr.msk.f32.vlgmr.msra.gmra.mrb[82].mxu1 %vm9368_vm10, %v4419_v9 }
0x2428   :  { %v6970_v16 = vpop.f32.mrb[82].mxu1 }
0x2429   :  { %v4507_v10 = vadd.f32 %v6970_v16, %v8969_v43  ;;  %v4497_v20 = vpop.f32.mrb[83].mxu1 }
0x242a   :  { %v4506_v8 = vadd.f32 %v4497_v20, %v8971_v19 }
0x242b   :  { %v9023_v54 = vadd.f32 %v6156_v7, %v4507_v10 }
0x242c   :  { %v9025_v59 = vadd.f32 %v6156_v7, %v4506_v8 }
0x242d   :  { %v4521_v30 = vsel %vm9369_vm6, %v9023_v54, 0.0 }
0x242e   :  { %4522 = vadd.xlane.f32.xlu0 %v4521_v30  ;;  %v4518_v53 = vsel %vm9359_vm1, %v9025_v59, 0.0 }
0x242f   :  { %4519 = vadd.xlane.f32.xlu1 %v4518_v53 }
0x24bb   :  { %v4523_v13 = vpop.xlane.xlu0 %4522 }
0x24bc   :  { %v4525_v4 = vmul.f32 0.03125, %v4523_v13  ;;  %v4520_v28 = vpop.xlane.xlu1 %4519 }
0x24bd   :  { %v4524_v31 = vmul.f32 0.03125, %v4520_v28 }
0x24be   :  { %v4527_v43 = vsub.f32 %v9023_v54, %v4525_v4 }
0x24bf   :  { %v4526_v19 = vsub.f32 %v9025_v59, %v4524_v31 }
0x24c0   :  { %v4529_v2 = vmul.f32 %v4527_v43, %v4527_v43 }
0x24c1   :  { %v4528_v21 = vmul.f32 %v4526_v19, %v4526_v19 }
0x24c2   :  { %v4533_v22 = vsel %vm9370_vm7, %v4529_v2, 0.0  ;;  %vm9385_vm7 = vmmov 0  }
0x24c3   :  { %4534 = vadd.xlane.f32.xlu0 %v4533_v22  ;;  %v4530_v35 = vsel %vm9371_vm9, %v4528_v21, 0.0  ;;  %vm9386_vm9 = vmmov %vm9359_vm1 }
0x24c4   :  { %4531 = vadd.xlane.f32.xlu1 %v4530_v35 }
0x2550   :  { %v4535_v32 = vpop.xlane.xlu0 %4534 }
0x2551   :  { %v4537_v60 = vmul.f32 0.03125, %v4535_v32  ;;  %v4532_v33 = vpop.xlane.xlu1 %4531 }
0x2552   :  { %v4536_v34 = vmul.f32 0.03125, %v4532_v33 }
0x2553   :  { %v4539_v52 = vadd.f32 1e-05, %v4537_v60 }
0x2554   :  { %v4538_v39 = vadd.f32 1e-05, %v4536_v34 }
0x2555   :  { %7692 = vrsqrt.f32 %v4539_v52 }
0x2556   :  { %7694 = vrsqrt.f32 %v4538_v39 }
0x255f   :  { %v7693_v25 = vpop.eup %7692 }
0x2560   :  { %v7695_v45 = vpop.eup %7694  ;;  %v4543_v41 = vmul.f32 %v7693_v25, %v4527_v43 }
0x2561   :  { %v4542_v36 = vmul.f32 %v7695_v45, %v4526_v19 }
0x2563   :  { %6979 = vmatprep.mubr.msk.f32.mxu0 %vm9372_vm11, %v4542_v36  ;;  %vm9387_vm11 = vmmov %vm9359_vm1 }
0x2564   :  { %6980 = vmatmul.mubr.msk.f32.vlgmr.msra.gmra.mrb[84].mxu0 %vm9373_vm12, %v4543_v41  ;;  %vm9388_vm12 = vcmask 1040384  }
0x2637   :  { %v6981_v15 = vpop.f32.mrb[84].mxu0 }
0x2638   :  { %v4635_v55 = vadd.f32 %v6981_v15, %v6162_v44  ;;  %v4629_v18 = vpop.f32.mrb[85].mxu0 }
0x2639   :  { %v4630_v12 = vadd.f32 %v6162_v44, %v4629_v18 }
0x263a   :  { %v9064_v51 = vmul.f32 0.35355338, %v4635_v55 }
0x263b   :  { %v9052_v58 = vpack.i.bf16 %v4635_v55, %v4630_v12  ;;  %v9054_v46 = vmul.f32 0.35355338, %v4630_v12 }
0x263d   :  { %7493 = vrot.lane.b32.xlu1 %v9052_v58, %s7764_s21  ;;  %6986 = vmatprep.mubr.msk.f32.mxu1 %vm233_vm3, %v9054_v46 }
0x2641   :  { %7498 = vrot.lane.b32.xlu1 %v9052_v58, %s7771_s28 }
0x2645   :  { %4841 = vrot.lane.b32.xlu1 %v9054_v46, %s7767_s24 }
0x2649   :  { %4843 = vrot.lane.b32.xlu1 %v9064_v51, %s7767_s24 }
0x26af   :  { %v7494_v63 = vpop.permute.xlu1 %7493 }
0x26b0   :  { %v7496_v1 = vunpack.i.h.bf16 %v7494_v63  ;;  %v7495_v48 = vunpack.i.l.bf16 %v7494_v63 }
0x26b2   :  { %v7274_v50 = vpack.c.bf16 %v7496_v1, %v7495_v48 }
0x26b3   :  { %v7499_v3 = vpop.permute.xlu1 %7498 }
0x26b4   :  { %v7501_v40 = vunpack.i.h.bf16 %v7499_v3  ;;  %v7500_v0 = vunpack.i.l.bf16 %v7499_v3  ;;  %7276 = vmatprep.subr.msk.bf16.mxu1 %vm7909_vm4, %v7274_v50 }
0x26b5   :  { %7279 = vmatpush3.bf16.xpose.msk.msra.mxu1 %vm7909_vm4, %v7274_v50 }
0x26b6   :  { %v7280_v56 = vpack.c.bf16 %v7501_v40, %v7500_v0 }
0x26b7   :  { %v4842_v29 = vpop.permute.xlu1 %4841 }
0x26b8   :  { %7282 = vmatprep.subr.msk.bf16.mxu0 %vm8820_vm15, %v7280_v56 }
0x26b9   :  { %7285 = vmatpush3.bf16.msk.msra.mxu0 %vm8820_vm15, %v7280_v56 }
0x26bb   :  { %v4844_v42 = vpop.permute.xlu1 %4843 }
0x26bc   :  { %6987 = vmatmul.mubr.msk.f32.vlgmr.msra.gmra.mrb[84].mxu1 %vm233_vm3, %v9064_v51 }
0x278f   :  { %v6988_v37 = vpop.f32.mrb[84].mxu1 }
0x2790   :  { %v4722_v61 = vpop.f32.mrb[85].mxu1  ;;  %v4728_v5 = vadd.f32 %v6988_v37, %v8842_v49 }
0x2791   :  { %v4723_v57 = vadd.f32 %v4722_v61, %v8839_v24 }
0x2792   :  { %v4734_v11 = vsel %vm3439_vm5, %v4728_v5, -inf }
0x2793   :  { %v4731_v17 = vsel %vm3435_vm0, %v4723_v57, -inf }
0x2794   :  { %4732 = vmax.xlane.f32.xlu0 %v4731_v17 }
0x2798   :  { %4735 = vmax.xlane.f32.xlu0 %v4734_v11 }
0x2821   :  { %v4733_v9 = vpop.xlane.xlu0 %4732 }
0x2822   :  { %v4737_v16 = vsub.f32 %v4723_v57, %v4733_v9 }
0x2824   :  { %v4739_v20 = vmul.f32 1.442695, %v4737_v16 }
0x2825   :  { %v4736_v7 = vpop.xlane.xlu0 %4735 }
0x2826   :  { %v4738_v10 = vsub.f32 %v4728_v5, %v4736_v7 }
0x2828   :  { %v4741_v8 = vmul.f32 1.442695, %v4738_v10 }
0x282a   :  { %7696 = vpow2.f32 %v4741_v8 }
0x282b   :  { %7698 = vpow2.f32 %v4739_v20 }
0x2834   :  { %v7697_v30 = vpop.eup %7696 }
0x2835   :  { %v4746_v53 = vsel %vm3439_vm5, %v7697_v30, 0.0  ;;  %v7699_v13 = vpop.eup %7698 }
0x2836   :  { %4747 = vadd.xlane.f32.xlu0 %v4746_v53  ;;  %v4743_v4 = vsel %vm3435_vm0, %v7699_v13, 0.0 }
0x283a   :  { %4744 = vadd.xlane.f32.xlu0 %v4743_v4 }
0x2850   :  { %7503 = vrot.lane.b32.xlu0 %v9052_v58, %s7766_s23 }
0x28c3   :  { %v4748_v28 = vpop.xlane.xlu0 %4747 }
0x28c4   :  { %7700 = vrcp.f32 %v4748_v28 }
0x28c7   :  { %v4745_v31 = vpop.xlane.xlu0 %4744 }
0x28c8   :  { %7702 = vrcp.f32 %v4745_v31 }
0x28cb   :  { %v7504_v43 = vpop.permute.xlu0 %7503 }
0x28cc   :  { %v7506_v19 = vunpack.i.h.bf16 %v7504_v43  ;;  %v7505_v2 = vunpack.i.l.bf16 %v7504_v43 }
0x28ce   :  { %v7286_v21 = vpack.c.bf16 %v7506_v19, %v7505_v2  ;;  %v7701_v22 = vpop.eup %7700 }
0x28cf   :  { %v4752_v6 = vmul.f32 %v7701_v22, %v7697_v30 }
0x28d0   :  { %7288 = vmatprep.subr.msk.bf16.mxu0 %vm7909_vm4, %v7286_v21 }
0x28d2   :  { %v7703_v35 = vpop.eup %7702 }
0x28d3   :  { %v4751_v38 = vmul.f32 %v7703_v35, %v7699_v13 }
0x28d5   :  { %6993 = vmatprep.mubr.msk.f32.mxu0 %vm3435_vm0, %v4751_v38 }
0x28d6   :  { %6994 = vmatmul.mubr.msk.f32.vlgmr.msra.gmra.mrb[86].mxu0 %vm3435_vm0, %v4752_v6 }
0x28d7   :  { %7291 = vmatpush3.bf16.xpose.msk.msra.mxu0 %vm7909_vm4, %v7286_v21  ;;  %7000 = vmatprep.mubr.msk.f32.mxu0 %vm233_vm3, %v4842_v29 }
0x28de   :  { %7001 = vmatmul.mubr.msk.f32.vlgmr.msra.gmra.mrb[88].mxu0 %vm233_vm3, %v4844_v42 }
0x29a9   :  { %v9094_v14 = vpop.f32.mrb[86].mxu0 }
0x29aa   :  { %v9096_v47 = vpop.f32.mrb[87].mxu0 }
0x29b1   :  { %v7002_v32 = vpop.f32.mrb[88].mxu0 }
0x29b2   :  { %v4929_v60 = vadd.f32 %v7002_v32, %v8842_v49  ;;  %v4923_v33 = vpop.f32.mrb[89].mxu0 }
0x29b3   :  { %v4924_v34 = vadd.f32 %v4923_v33, %v8839_v24 }
0x29b4   :  { %v4935_v52 = vsel %vm3439_vm5, %v4929_v60, -inf }
0x29b5   :  { %4936 = vmax.xlane.f32.xlu0 %v4935_v52  ;;  %v4932_v39 = vsel %vm3435_vm0, %v4924_v34, -inf }
0x29b6   :  { %4933 = vmax.xlane.f32.xlu1 %v4932_v39 }
0x29c7   :  { %7513 = vrot.lane.b32.xlu1 %v9052_v58, %s7765_s22 }
0x29cb   :  { %7508 = vrot.lane.b32.xlu0 %v9052_v58, %s7773_s29 }
0x29cf   :  { %5044 = vrot.lane.b32.xlu0 %v9064_v51, %s7768_s25 }
0x2a42   :  { %v4937_v25 = vpop.xlane.xlu0 %4936 }
0x2a43   :  { %v4939_v45 = vsub.f32 %v4929_v60, %v4937_v25  ;;  %v4934_v36 = vpop.xlane.xlu1 %4933 }
0x2a44   :  { %v4938_v41 = vsub.f32 %v4924_v34, %v4934_v36 }
0x2a45   :  { %v4942_v44 = vmul.f32 1.442695, %v4939_v45 }
0x2a46   :  { %v4940_v15 = vmul.f32 1.442695, %v4938_v41  ;;  %v7509_v55 = vpop.permute.xlu0 %7508 }
0x2a47   :  { %7704 = vpow2.f32 %v4942_v44  ;;  %v7511_v18 = vunpack.i.h.bf16 %v7509_v55  ;;  %v7510_v12 = vunpack.i.l.bf16 %v7509_v55  ;;  %v7514_v63 = vpop.permute.xlu1 %7513 }
0x2a48   :  { %v7516_v1 = vunpack.i.h.bf16 %v7514_v63  ;;  %v7515_v48 = vunpack.i.l.bf16 %v7514_v63  ;;  %7706 = vpow2.f32 %v4940_v15 }
0x2a49   :  { %v7292_v50 = vpack.c.bf16 %v7511_v18, %v7510_v12 }
0x2a4a   :  { %v7298_v3 = vpack.c.bf16 %v7516_v1, %v7515_v48  ;;  %v5045_v7 = vpop.permute.xlu0 %5044 }
0x2a4b   :  { %7294 = vmatprep.subr.msk.bf16.mxu1 %vm8820_vm15, %v7292_v50 }
0x2a4c   :  { %7297 = vmatpush3.bf16.msk.msra.mxu1 %vm8820_vm15, %v7292_v50 }
0x2a4d   :  { %7300 = vmatprep.subr.msk.bf16.mxu1 %vm7909_vm4, %v7298_v3 }
0x2a51   :  { %v7705_v40 = vpop.eup %7704 }
0x2a52   :  { %v4947_v0 = vsel %vm3439_vm5, %v7705_v40, 0.0  ;;  %v7707_v56 = vpop.eup %7706 }
0x2a53   :  { %4948 = vadd.xlane.f32.xlu1 %v4947_v0  ;;  %v4944_v37 = vsel %vm3435_vm0, %v7707_v56, 0.0 }
0x2a57   :  { %4945 = vadd.xlane.f32.xlu1 %v4944_v37 }
0x2a68   :  { %5042 = vrot.lane.b32.xlu1 %v9054_v46, %s7768_s25 }
0x2ae0   :  { %v4949_v61 = vpop.xlane.xlu1 %4948 }
0x2ae1   :  { %7708 = vrcp.f32 %v4949_v61 }
0x2ae4   :  { %v4946_v57 = vpop.xlane.xlu1 %4945 }
0x2ae5   :  { %7710 = vrcp.f32 %v4946_v57 }
0x2ae8   :  { %v5043_v16 = vpop.permute.xlu1 %5042 }
0x2aeb   :  { %v7709_v5 = vpop.eup %7708 }
0x2aec   :  { %v4953_v9 = vmul.f32 %v7709_v5, %v7705_v40 }
0x2aef   :  { %v7711_v17 = vpop.eup %7710 }
0x2af0   :  { %v4952_v11 = vmul.f32 %v7711_v17, %v7707_v56 }
0x2af2   :  { %7007 = vmatprep.mubr.msk.f32.mxu1 %vm3435_vm0, %v4952_v11 }
0x2af3   :  { %7008 = vmatmul.mubr.msk.f32.vlgmr.msra.gmra.mrb[86].mxu1 %vm3435_vm0, %v4953_v9 }
0x2af4   :  { %7303 = vmatpush3.bf16.xpose.msk.msra.mxu1 %vm7909_vm4, %v7298_v3  ;;  %7014 = vmatprep.mubr.msk.f32.mxu1 %vm233_vm3, %v5043_v16 }
0x2afb   :  { %7015 = vmatmul.mubr.msk.f32.vlgmr.msra.gmra.mrb[88].mxu1 %vm233_vm3, %v5045_v7 }
0x2bc6   :  { %v9124_v10 = vpop.f32.mrb[86].mxu1 }
0x2bc7   :  { %v9126_v20 = vpop.f32.mrb[87].mxu1 }
0x2bce   :  { %v7016_v8 = vpop.f32.mrb[88].mxu1 }
0x2bcf   :  { %v5130_v30 = vadd.f32 %v7016_v8, %v8842_v49  ;;  %v5124_v53 = vpop.f32.mrb[89].mxu1 }
0x2bd0   :  { %v5125_v13 = vadd.f32 %v5124_v53, %v8839_v24 }
0x2bd1   :  { %v5136_v4 = vsel %vm3439_vm5, %v5130_v30, -inf }
0x2bd2   :  { %5137 = vmax.xlane.f32.xlu0 %v5136_v4  ;;  %v5133_v28 = vsel %vm3435_vm0, %v5125_v13, -inf  ;;  %v6194_v4 = vld [vmem:[%s9296_s3 + $0x128] sm:$0xff] }
0x2bd3   :  { %5134 = vmax.xlane.f32.xlu1 %v5133_v28 }
0x2c5f   :  { %v5138_v31 = vpop.xlane.xlu0 %5137 }
0x2c60   :  { %v5140_v43 = vsub.f32 %v5130_v30, %v5138_v31  ;;  %v5135_v19 = vpop.xlane.xlu1 %5134  ;;  %v6196_v31 = vld [vmem:[%s9296_s3 + $0x138] sm:$0xff] }
0x2c61   :  { %v5139_v2 = vsub.f32 %v5125_v13, %v5135_v19  ;;  %v6193_v13 = vld [vmem:[%s9296_s3 + $0x120] sm:$0xff] }
0x2c62   :  { %v5143_v21 = vmul.f32 1.442695, %v5140_v43  ;;  %v7322_v28 = vpack.c.bf16 %v6194_v4, %v6193_v13  ;;  %v7326_v43 = vpack.c.bf16 %v6196_v31, %v6195_v23  ;;  %v6215_v23 = vld [vmem:[%s9296_s3 + $0x170] sm:$0xff] }
0x2c63   :  { %v5141_v22 = vmul.f32 1.442695, %v5139_v2 }
0x2c64   :  { %7712 = vpow2.f32 %v5143_v21 }
0x2c65   :  { %7714 = vpow2.f32 %v5141_v22 }
0x2c6e   :  { %v7713_v35 = vpop.eup %7712 }
0x2c6f   :  { %v7715_v38 = vpop.eup %7714  ;;  %v5148_v6 = vsel %vm3439_vm5, %v7713_v35, 0.0 }
0x2c70   :  { %5149 = vadd.xlane.f32.xlu1 %v5148_v6  ;;  %v5145_v29 = vsel %vm3435_vm0, %v7715_v38, 0.0 }
0x2c71   :  { %5146 = vadd.xlane.f32.xlu0 %v5145_v29 }
0x2c81   :  { %7523 = vrot.lane.b32.xlu1 %v9052_v58, %s7769_s26 }
0x2c85   :  { %5243 = vrot.lane.b32.xlu1 %v9054_v46, %s7770_s27 }
0x2c87   :  { %7518 = vrot.lane.b32.xlu0 %v9052_v58, %s7774_s30 }
0x2c8b   :  { %5245 = vrot.lane.b32.xlu0 %v9064_v51, %s7770_s27 }
0x2cfd   :  { %v5150_v42 = vpop.xlane.xlu1 %5149 }
0x2cfe   :  { %7716 = vrcp.f32 %v5150_v42  ;;  %v5147_v32 = vpop.xlane.xlu0 %5146 }
0x2cff   :  { %7718 = vrcp.f32 %v5147_v32 }
0x2d01   :  { %v7524_v60 = vpop.permute.xlu1 %7523 }
0x2d02   :  { %v7519_v33 = vpop.permute.xlu0 %7518  ;;  %v7526_v34 = vunpack.i.h.bf16 %v7524_v60  ;;  %v7525_v52 = vunpack.i.l.bf16 %v7524_v60 }
0x2d03   :  { %v7521_v39 = vunpack.i.h.bf16 %v7519_v33  ;;  %v7520_v25 = vunpack.i.l.bf16 %v7519_v33 }
0x2d04   :  { %v7310_v36 = vpack.c.bf16 %v7526_v34, %v7525_v52 }
0x2d05   :  { %v7304_v45 = vpack.c.bf16 %v7521_v39, %v7520_v25  ;;  %v5244_v15 = vpop.permute.xlu1 %5243 }
0x2d06   :  { %v5246_v55 = vpop.permute.xlu0 %5245 }
0x2d07   :  { %7306 = vmatprep.subr.msk.bf16.mxu0 %vm8820_vm15, %v7304_v45 }
0x2d08   :  { %v7717_v46 = vpop.eup %7716  ;;  %7309 = vmatpush3.bf16.msk.msra.mxu0 %vm8820_vm15, %v7304_v45 }
0x2d09   :  { %v7719_v51 = vpop.eup %7718  ;;  %7312 = vmatprep.subr.msk.bf16.mxu0 %vm7909_vm4, %v7310_v36  ;;  %v5154_v44 = vmul.f32 %v7717_v46, %v7713_v35 }
0x2d0a   :  { %v5153_v41 = vmul.f32 %v7719_v51, %v7715_v38 }
0x2d0c   :  { %7021 = vmatprep.mubr.msk.f32.mxu0 %vm3435_vm0, %v5153_v41 }
0x2d0d   :  { %7022 = vmatmul.mubr.msk.f32.vlgmr.msra.gmra.mrb[90].mxu0 %vm3435_vm0, %v5154_v44 }
0x2d0e   :  { %7028 = vmatprep.mubr.msk.f32.mxu0 %vm233_vm3, %v5244_v15 }
0x2d11   :  { %7315 = vmatpush3.bf16.xpose.msk.msra.mxu0 %vm7909_vm4, %v7310_v36  ;;  %vm9374_vm4 = vcmask 130048  }
0x2d18   :  { %7029 = vmatmul.mubr.msk.f32.vlgmr.msra.gmra.mrb[92].mxu0 %vm233_vm3, %v5246_v55 }
0x2de0   :  { %v7023_v18 = vpop.f32.mrb[90].mxu0 }
0x2de1   :  { %v5234_v12 = vpop.f32.mrb[91].mxu0 }
0x2deb   :  { %v7030_v63 = vpop.f32.mrb[92].mxu0 }
0x2dec   :  { %v5331_v1 = vadd.f32 %v7030_v63, %v8842_v49  ;;  %v5325_v48 = vpop.f32.mrb[93].mxu0 }
0x2ded   :  { %v5326_v50 = vadd.f32 %v5325_v48, %v8839_v24 }
0x2dee   :  { %v5337_v3 = vsel %vm3439_vm5, %v5331_v1, -inf }
0x2def   :  { %5338 = vmax.xlane.f32.xlu0 %v5337_v3  ;;  %v5334_v40 = vsel %vm3435_vm0, %v5326_v50, -inf  ;;  %v6206_v3 = vld [vmem:[%s9296_s3 + $0x148] sm:$0xff] }
0x2df0   :  { %5335 = vmax.xlane.f32.xlu1 %v5334_v40 }
0x2e7c   :  { %v5339_v0 = vpop.xlane.xlu0 %5338 }
0x2e7d   :  { %v5341_v62 = vsub.f32 %v5331_v1, %v5339_v0  ;;  %v5336_v56 = vpop.xlane.xlu1 %5335  ;;  %v6207_v0 = vld [vmem:[%s9296_s3 + $0x150] sm:$0xff] }
0x2e7e   :  { %v5340_v37 = vsub.f32 %v5326_v50, %v5336_v56  ;;  %v6205_v50 = vld [vmem:[%s9296_s3 + $0x140] sm:$0xff] }
0x2e7f   :  { %v5344_v61 = vmul.f32 1.442695, %v5341_v62  ;;  %v7330_v40 = vpack.c.bf16 %v6206_v3, %v6205_v50  ;;  %v6208_v62 = vld [vmem:[%s9296_s3 + $0x158] sm:$0xff] }
0x2e80   :  { %v5342_v57 = vmul.f32 1.442695, %v5340_v37  ;;  %v7334_v56 = vpack.c.bf16 %v6208_v62, %v6207_v0  ;;  %v6213_v37 = vld [vmem:[%s9296_s3 + $0x160] sm:$0xff] }
0x2e81   :  { %7720 = vpow2.f32 %v5344_v61  ;;  %7331 = vmatprep.subr.bf16.mxu0 %v7330_v40  ;;  %v6214_v61 = vld [vmem:[%s9296_s3 + $0x168] sm:$0xff] }
0x2e82   :  { %7722 = vpow2.f32 %v5342_v57  ;;  %7333 = vmatpush3.bf16.msra.mxu0 %v7330_v40  ;;  %v7338_v57 = vpack.c.bf16 %v6214_v61, %v6213_v37 }
0x2e83   :  { %7335 = vmatprep.subr.bf16.mxu0 %v7334_v56 }
0x2e86   :  { %7337 = vmatpush3.bf16.msra.mxu0 %v7334_v56 }
0x2e87   :  { %7346 = vmatprep.subr.bf16.mxu0 %v7761_v26 }
0x2e8b   :  { %v7721_v5 = vpop.eup %7720 }
0x2e8c   :  { %v7723_v17 = vpop.eup %7722  ;;  %v5349_v49 = vsel %vm3439_vm5, %v7721_v5, 0.0 }
0x2e8d   :  { %5350 = vadd.xlane.f32.xlu1 %v5349_v49  ;;  %v5346_v24 = vsel %vm3435_vm0, %v7723_v17, 0.0 }
0x2e8e   :  { %5347 = vadd.xlane.f32.xlu0 %v5346_v24 }
0x2e9e   :  { %5446 = vrot.lane.b32.xlu1 %v9126_v20, %s7776_s10 }
0x2ea2   :  { %5448 = vrot.lane.b32.xlu1 %v9124_v10, %s7776_s10 }
0x2ea4   :  { %7528 = vrot.lane.b32.xlu0 %v9052_v58, %s7775_s9 }
0x2ea6   :  { %5456 = vrot.lane.b32.xlu1 %v7023_v18, %s7777_s19 }
0x2ea8   :  { %5454 = vrot.lane.b32.xlu0 %v5234_v12, %s7777_s19 }
0x2f1a   :  { %v5351_v11 = vpop.xlane.xlu1 %5350 }
0x2f1b   :  { %7724 = vrcp.f32 %v5351_v11  ;;  %v5348_v9 = vpop.xlane.xlu0 %5347 }
0x2f1c   :  { %7726 = vrcp.f32 %v5348_v9 }
0x2f1e   :  { %v5447_v21 = vpop.permute.xlu1 %5446 }
0x2f1f   :  { %v7529_v16 = vpop.permute.xlu0 %7528  ;;  %v5468_v6 = vsel %vm233_vm3, %v9096_v47, %v5447_v21  ;;  %v6200_v47 = vld [vmem:[%s9297_s4 + $0xf] ss:$0 sm:$0xff] }
0x2f20   :  { %v7531_v7 = vunpack.i.h.bf16 %v7529_v16  ;;  %v7530_v8 = vunpack.i.l.bf16 %v7529_v16 }
0x2f22   :  { %v7316_v30 = vpack.c.bf16 %v7531_v7, %v7530_v8  ;;  %v5449_v22 = vpop.permute.xlu1 %5448  ;;  %v6203_v7 = vld [vmem:[%s9297_s4 + $0x10] ss:$0 sm:$0xff] }
0x2f23   :  { %v5455_v38 = vpop.permute.xlu0 %5454  ;;  %v5469_v42 = vsel %vm233_vm3, %v9094_v14, %v5449_v22  ;;  %vm9380_vm3 = vmmov %vm9369_vm6 }
0x2f24   :  { %7318 = vmatprep.subr.msk.bf16.mxu1 %vm8820_vm15, %v7316_v30  ;;  %v5470_v32 = vsel %vm9374_vm4, %v5468_v6, %v5455_v38  ;;  %vm9383_vm10 = vmmov %vm9380_vm3 }
0x2f25   :  { %v7725_v20 = vpop.eup %7724  ;;  %7321 = vmatpush3.bf16.msk.msra.mxu1 %vm8820_vm15, %v7316_v30  ;;  %vm9376_vm15 = vcmask 195584   ;;  %v6204_v30 = vld [vmem:[%s9297_s4 + $0x11] ss:$0 sm:$0xff]  ;;  %vm9384_vm6 = vmmov %vm9359_vm1 }
0x2f26   :  { %v7727_v58 = vpop.eup %7726  ;;  %v5355_v53 = vmul.f32 %v7725_v20, %v7721_v5  ;;  %7323 = vmatprep.subr.bf16.mxu1 %v7322_v28  ;;  %v5457_v35 = vpop.permute.xlu1 %5456  ;;  %vm9377_vm5 = vmmov %vm9376_vm15 }
0x2f27   :  { %v5354_v10 = vmul.f32 %v7727_v58, %v7723_v17 }
0x2f29   :  { %7035 = vmatprep.mubr.msk.f32.mxu1 %vm3435_vm0, %v5354_v10 }
0x2f2a   :  { %7036 = vmatmul.mubr.msk.f32.vlgmr.msra.gmra.mrb[90].mxu1 %vm3435_vm0, %v5355_v53  ;;  %vm9375_vm0 = vmmov %vm9374_vm4 }
0x2f2b   :  { %7325 = vmatpush3.bf16.msra.mxu1 %v7322_v28  ;;  %v5471_v33 = vsel %vm9375_vm0, %v5469_v42, %v5457_v35  ;;  %v6216_v28 = vld [vmem:[%s9296_s3 + $0x178] sm:$0xff]  ;;  %vm9389_vm4 = vmmov %vm9380_vm3 }
0x2f2c   :  { %7327 = vmatprep.subr.bf16.mxu1 %v7326_v43  ;;  %v7342_v31 = vpack.c.bf16 %v6216_v28, %v6215_v23  ;;  %vm9390_vm0 = vmmov %vm9380_vm3 }
0x2f2f   :  { %7329 = vmatpush3.bf16.msra.mxu1 %v7326_v43  ;;  %v6210_v43 = vld [vmem:[%s9297_s4 + $0x12] ss:$0 sm:$0xff] }
0x2f30   :  { %7339 = vmatprep.subr.bf16.mxu1 %v7338_v57 }
0x2ffd   :  { %v7037_v19 = vpop.f32.mrb[90].mxu1 }
0x2ffe   :  { %5464 = vrot.lane.b32.xlu1 %v7037_v19, %s7778_s20  ;;  %v5435_v2 = vpop.f32.mrb[91].mxu1 }
0x2fff   :  { %5462 = vrot.lane.b32.xlu0 %v5435_v2, %s7778_s20 }
0x3070   :  { %v5465_v29 = vpop.permute.xlu1 %5464 }
0x3071   :  { %v5463_v60 = vpop.permute.xlu0 %5462  ;;  %v5473_v52 = vsel %vm9377_vm5, %v5471_v33, %v5465_v29  ;;  %v6220_v29 = vld [vmem:[%s9297_s4 + $0x13] ss:$0 sm:$0xff]  ;;  %vm5927_vm5 = vcmask 33792  }
0x3072   :  { %v5472_v34 = vsel %vm9376_vm15, %v5470_v32, %v5463_v60  ;;  %vm9391_vm15 = vmmov %vm9359_vm1 }
0x3073   :  { %7046 = vmatprep.mubr.msk.f32.mxu1 %vm9378_vm13, %v5472_v34 }
0x3074   :  { %7047 = vmatmul.mubr.msk.f32.vlgmr.msra.gmra.mrb[92].mxu1 %vm9379_vm14, %v5473_v52 }
0x3075   :  { %7341 = vmatpush3.bf16.msra.mxu1 %v7338_v57 }
0x3076   :  { %7343 = vmatprep.subr.bf16.mxu1 %v7342_v31 }
0x3079   :  { %7345 = vmatpush3.bf16.msra.mxu1 %v7342_v31 }
0x3147   :  { %v7048_v39 = vpop.f32.mrb[92].mxu1 }
0x3148   :  { %v5561_v14 = vadd.f32 %v7048_v39, %v9023_v54  ;;  %v5551_v25 = vpop.f32.mrb[93].mxu1 }
0x3149   :  { %v5560_v45 = vadd.f32 %v5551_v25, %v9025_v59 }
0x314a   :  { %v5571_v36 = vadd.f32 %v6200_v47, %v5561_v14 }
0x314b   :  { %v9203_v46 = vadd.f32 %v6200_v47, %v5560_v45  ;;  %v5843_v45 = vld [vmem:[%s9299_s6] sm:$0xff] }
0x314c   :  { %v5579_v51 = vsel %vm9380_vm3, %v5571_v36, 0.0 }
0x314d   :  { %5580 = vadd.xlane.f32.xlu1 %v5579_v51  ;;  %v5576_v41 = vsel %vm9381_vm2, %v9203_v46, 0.0  ;;  %v5845_v51 = vld [vmem:[%s9299_s6 + $0x10] sm:$0xff] }
0x314e   :  { %5577 = vadd.xlane.f32.xlu0 %v5576_v41  ;;  %v5846_v41 = vld [vmem:[%s9299_s6 + $0x18] sm:$0xff] }
0x31da   :  { %v5581_v44 = vpop.xlane.xlu1 %5580 }
0x31db   :  { %v5583_v15 = vmul.f32 0.03125, %v5581_v44  ;;  %v5578_v55 = vpop.xlane.xlu0 %5577  ;;  %v7350_v44 = vpack.c.bf16 %v5846_v41, %v5845_v51 }
0x31dc   :  { %v5582_v18 = vmul.f32 0.03125, %v5578_v55 }
0x31dd   :  { %v5585_v12 = vsub.f32 %v5571_v36, %v5583_v15  ;;  %v5844_v36 = vld [vmem:[%s9299_s6 + $0x8] sm:$0xff] }
0x31de   :  { %v5584_v54 = vsub.f32 %v9203_v46, %v5582_v18 }
0x31df   :  { %v5587_v1 = vmul.f32 %v5585_v12, %v5585_v12 }
0x31e0   :  { %v5586_v63 = vmul.f32 %v5584_v54, %v5584_v54 }
0x31e1   :  { %v5591_v48 = vsel %vm9383_vm10, %v5587_v1, 0.0 }
0x31e2   :  { %v5588_v59 = vsel %vm9382_vm8, %v5586_v63, 0.0  ;;  %v6223_v63 = vld [vmem:[%s9298_s5 + $0x1] ss:$0 sm:$0xff] }
0x31e3   :  { %5589 = vadd.xlane.f32.xlu0 %v5588_v59 }
0x31e7   :  { %5592 = vadd.xlane.f32.xlu0 %v5591_v48  ;;  %v6224_v48 = vld [vmem:[%s9300_s7] ss:$0 sm:$0xff] }
0x3270   :  { %v5590_v5 = vpop.xlane.xlu0 %5589 }
0x3271   :  { %v5594_v17 = vmul.f32 0.03125, %v5590_v5 }
0x3273   :  { %v5596_v49 = vadd.f32 1e-05, %v5594_v17 }
0x3274   :  { %v5593_v24 = vpop.xlane.xlu0 %5592 }
0x3275   :  { %7728 = vrsqrt.f32 %v5596_v49  ;;  %v5595_v11 = vmul.f32 0.03125, %v5593_v24 }
0x3277   :  { %v5597_v9 = vadd.f32 1e-05, %v5595_v11 }
0x3279   :  { %7730 = vrsqrt.f32 %v5597_v9 }
0x327f   :  { %v7729_v16 = vpop.eup %7728 }
0x3280   :  { %v5600_v8 = vmul.f32 %v7729_v16, %v5584_v54  ;;  %v6222_v54 = vld [vmem:[%s9298_s5] ss:$0 sm:$0xff] }
0x3282   :  { %v5608_v20 = vmul.f32 %v6203_v7, %v5600_v8 }
0x3283   :  { %v7731_v58 = vpop.eup %7730 }
0x3284   :  { %v5601_v10 = vmul.f32 %v7731_v58, %v5585_v12  ;;  %v5616_v53 = vadd.f32 %v6204_v30, %v5608_v20 }
0x3286   :  { %v5609_v13 = vmul.f32 %v6203_v7, %v5601_v10  ;;  %7057 = vmatprep.mubr.msk.f32.mxu0 %vm9384_vm6, %v5616_v53 }
0x3288   :  { %v5617_v4 = vadd.f32 %v6204_v30, %v5609_v13 }
0x328a   :  { %7058 = vmatmul.mubr.msk.f32.vlgmr.msra.gmra.mrb[94].mxu0 %vm9359_vm1, %v5617_v4 }
0x328b   :  { %7079 = vmatprep.mubr.msk.f32.mxu0 %vm9385_vm7, %v7763_v27 }
0x335d   :  { %v7059_v19 = vpop.f32.mrb[94].mxu0 }
0x335e   :  { %v5709_v2 = vadd.f32 %v7059_v19, %v6210_v43  ;;  %v5703_v21 = vpop.f32.mrb[95].mxu0 }
0x335f   :  { %v5704_v22 = vadd.f32 %v6210_v43, %v5703_v21 }
0x3360   :  { %v5713_v35 = vmax.f32 %v5709_v2, 0.0 }
0x3361   :  { %v5712_v27 = vmax.f32 %v5704_v22, 0.0 }
0x3363   :  { %7068 = vmatprep.mubr.msk.f32.mxu1 %vm9386_vm9, %v5712_v27 }
0x3364   :  { %7069 = vmatmul.mubr.msk.f32.vlgmr.msra.gmra.mrb[94].mxu1 %vm9387_vm11, %v5713_v35 }
0x3437   :  { %v7070_v38 = vpop.f32.mrb[94].mxu1 }
0x3438   :  { %v5791_v6 = vpop.f32.mrb[95].mxu1 }
0x3439   :  { %v5799_v42 = vadd.f32 %v5791_v6, %v9203_v46  ;;  %v7347_v46 = vpack.c.bf16 %v5844_v36, %v5843_v45 }
0x343b   :  { %v5808_v32 = vadd.f32 %v6220_v29, %v5799_v42  ;;  %7348 = vmatpush3.bf16.msra.mxu0 %v7347_v46 }
0x343c   :  { %7349 = vmatprep.subr.bf16.mxu0 %v7761_v26 }
0x343d   :  { %v5810_v60 = vrot.slane %v5808_v32, 4 }
0x343f   :  { %v5812_v33 = vsel %vm9388_vm12, %v5808_v32, %v5810_v60  ;;  %7351 = vmatpush3.bf16.msra.mxu0 %v7350_v44 }
0x3440   :  { %v5816_v34 = vsel %vm9389_vm4, %v5812_v33, 0.0 }
0x3441   :  { %5817 = vadd.xlane.f32.xlu1 %v5816_v34 }
0x34ce   :  { %v5818_v52 = vpop.xlane.xlu1 %5817 }
0x34cf   :  { %v5819_v39 = vmul.f32 0.03125, %v5818_v52 }
0x34d1   :  { %v5820_v47 = vsub.f32 %v5812_v33, %v5819_v39 }
0x34d3   :  { %v5821_v14 = vmul.f32 %v5820_v47, %v5820_v47 }
0x34d5   :  { %v5822_v25 = vsel %vm9390_vm0, %v5821_v14, 0.0 }
0x34d6   :  { %5823 = vadd.xlane.f32.xlu0 %v5822_v25 }
0x3563   :  { %v5824_v15 = vpop.xlane.xlu0 %5823 }
0x3564   :  { %v5825_v55 = vmul.f32 0.03125, %v5824_v15 }
0x3566   :  { %v5826_v18 = vadd.f32 1e-05, %v5825_v55 }
0x3568   :  { %7732 = vrsqrt.f32 %v5826_v18 }
0x3572   :  { %v7733_v12 = vpop.eup %7732 }
0x3573   :  { %v5828_v26 = vmul.f32 %v7733_v12, %v5820_v47 }
0x3575   :  { %v5835_v59 = vmul.f32 %v6222_v54, %v5828_v26 }
0x3577   :  { %v5842_v1 = vadd.f32 %v6223_v63, %v5835_v59 }
0x3579   :  { %7080 = vmatmul.mubr.msk.f32.vlgmr.msra.gmra.mrb[96].mxu0 %vm9391_vm15, %v5842_v1 }
0x364c   :  { %v5923_v50 = vpop.f32.mrb[96].mxu0 }
0x364d   :  { %v5924_v3 = vadd.f32 %v6224_v48, %v5923_v50  ;;  %v7081_v40 = vpop.f32.mrb[97].mxu0 }
0x364f   :  { %5928 = vst.msk [vmem:[#allocation2] sm:$0x3] %vm5927_vm5, %v5924_v3 }
0x3650   :  { %7748 = shalt.err (!%p7745_p4)
}
0x3651   :  { %s7749_s13 = scalar_lea.hbm %s9301_s8, 32 }
0x3652   :  { %p7750_p5 = scmp.ne.s32.totalorder %s9301_s8, %s7749_s13  ;;  %p7753_p6 = scmp.lt.u32.totalorder %s7749_s13, %s9301_s8 }
0x3654   :  { %p7755_p7 = pnand %p7753_p6, %p7750_p5 }
0x3656   :  { %7758 = shalt.err (!%p7755_p7)
}
0x3657   :  { %5938 = dma.vmem_to_hbm [thread:$0]  %s5936_s11, 32, %s9301_s8, [#allocation3]  }
0x3658   :  { %7759 = dma.done.wait [#allocation3], 32  }
0x3659   :  { %7760 = vsyncadd [#allocation3], 4294967264 }
0x365a   :  { %5942 = vsyncpa [#allocation3], 1 }

</bundles_post_ra>
